<compile_context>
chip_gen: v6e
topology: v6e:2x2x1
jax: 0.10.0
libtpu: 0.0.40
codegen_flags: <defaults>
</compile_context>

<pallas_src>
import jax
import jax.numpy as jnp
import numpy as np
from jax import lax
from jax.experimental import pallas as pl
from jax.experimental.pallas import tpu as pltpu


def word_attention_kernel(
    x_ref, lenc_ref,
    wih_ref, whh_f_ref, whh_b_ref, bi_ref, bhn_f_ref, bhn_b_ref,
    gamma_f_ref, gamma_b_ref, beta_f_ref, beta_b_ref,
    watt_f_ref, watt_b_ref, batt_ref, cv_ref,
    sent_out_ref, attw_out_ref,
    outf_sc, outb_sc, gif_sc, gib_sc,
):
    T, Bt, E = x_ref.shape
    H = outf_sc.shape[-1]
    H3 = 3 * H

    # ---- hoisted loads (resident across the recurrence) ----
    len_col = lenc_ref[...]                                   # (Bt, 1) int32
    whh_f = whh_f_ref[...]                                    # (H, 3H)
    whh_b = whh_b_ref[...]
    bhn_f = bhn_f_ref[...]                                    # (1, H)  n-gate b_hh
    bhn_b = bhn_b_ref[...]

    # ---- merged input projection: ONE big MXU matmul for both directions ----
    x_flat = x_ref[...].reshape(T * Bt, E)
    proj = (jnp.dot(x_flat, wih_ref[...], preferred_element_type=jnp.float32)
            + bi_ref[...])                                    # (T*Bt, 6H)
    gif_sc[...] = proj[:, :H3].reshape(T, Bt, H3)
    gib_sc[...] = proj[:, H3:].reshape(T, Bt, H3)

    def gru_step(h, gi, whh, bhn):
        # PyTorch gate order [r, z, n]; b_ih + b_hh(r,z) already folded into gi.
        gh = jnp.dot(h, whh, preferred_element_type=jnp.float32)   # (Bt, 3H)
        r = jax.nn.sigmoid(gi[:, 0:H] + gh[:, 0:H])
        z = jax.nn.sigmoid(gi[:, H:2 * H] + gh[:, H:2 * H])
        n = jnp.tanh(gi[:, 2 * H:] + r * (gh[:, 2 * H:] + bhn))
        return (1.0 - z) * n + z * h

    # ---- fused forward/backward recurrence ----
    h0 = jnp.zeros((Bt, H), jnp.float32)

    def body(t, carry):
        hf, hb = carry
        tb = T - 1 - t
        hf_new = gru_step(hf, gif_sc[t], whh_f, bhn_f)
        hb_new = gru_step(hb, gib_sc[tb], whh_b, bhn_b)
        hf = jnp.where(len_col > t, hf_new, hf)              # per-step mask: 1 VPU cmp
        hb = jnp.where(len_col > tb, hb_new, hb)
        outf_sc[t] = hf
        outb_sc[tb] = hb
        return (hf, hb)

    unroll = True if T <= 16 else 4
    lax.fori_loop(0, T, body, (h0, h0), unroll=unroll)

    # ---- attention phase, vectorized over all T*Bt positions (no 2H concat) ----
    hf_flat = outf_sc[...].reshape(T * Bt, H)
    hb_flat = outb_sc[...].reshape(T * Bt, H)
    inv_2h = 1.0 / (2.0 * H)
    mu = (jnp.sum(hf_flat, axis=-1, keepdims=True)
          + jnp.sum(hb_flat, axis=-1, keepdims=True)) * inv_2h
    df = hf_flat - mu
    db = hb_flat - mu
    var = (jnp.sum(df * df, axis=-1, keepdims=True)
           + jnp.sum(db * db, axis=-1, keepdims=True)) * inv_2h
    inv_std = lax.rsqrt(var + 1e-5)
    normed_f = df * inv_std * gamma_f_ref[...] + beta_f_ref[...]
    normed_b = db * inv_std * gamma_b_ref[...] + beta_b_ref[...]

    a = jnp.tanh(
        jnp.dot(normed_f, watt_f_ref[...], preferred_element_type=jnp.float32)
        + jnp.dot(normed_b, watt_b_ref[...], preferred_element_type=jnp.float32)
        + batt_ref[...])                                      # (T*Bt, 2H)
    s_tb = jnp.sum((a * cv_ref[...]).reshape(T, Bt, 2 * H), axis=-1)   # (T, Bt)

    # softmax in (Bt, T) orientation: lengths broadcast naturally, and the
    # attention-weight output store is lane-dense with no extra transpose.
    s_bt = s_tb.T                                             # (Bt, T)
    mask_bt = (lax.broadcasted_iota(jnp.int32, (Bt, T), 1) < len_col).astype(jnp.float32)
    s_max = jnp.max(s_bt, axis=1, keepdims=True)              # (Bt, 1)
    e = jnp.exp(s_bt - s_max) * mask_bt
    denom = jnp.sum(e, axis=1, keepdims=True)
    # exact divide (weights sum to 1); clamp so fully-padded rows give 0, not NaN.
    w_bt = e / jnp.maximum(denom, 1e-30)                      # (Bt, T)

    attw_out_ref[...] = w_bt
    w3 = w_bt.T[:, :, None]                                   # (T, Bt, 1)
    sent_out_ref[:, 0:H] = jnp.sum(w3 * outf_sc[...], axis=0)
    sent_out_ref[:, H:] = jnp.sum(w3 * outb_sc[...], axis=0)


def _round_up(a, b):
    return ((a + b - 1) // b) * b


def _vmem_bytes_estimate(Bt, T, E, H):
    f32 = 4
    scratch = T * Bt * (8 * H) * f32            # outf(H) + outb(H) + gif(3H) + gib(3H)
    x_in = 2 * T * Bt * E * f32                 # double-buffered input tile
    weights = 2 * (E * 6 * H + 2 * H * 3 * H + 2 * H * 2 * H + 16 * H) * f32
    outputs = 2 * (Bt * 2 * H + Bt * T) * f32   # double-buffered output tiles
    transient = T * Bt * 6 * H * f32            # projection / attention temporaries
    return scratch + x_in + weights + outputs + transient


def _pick_batch_tile(B, T, E, H, budget_bytes=40 << 20):
    # largest multiple-of-8 batch tile (capped at 128 rows) that fits the budget.
    # TODO(synk): allow Bt up to 256 on v6e/v7x (256-wide MXU) once scratch is bf16.
    Bt = min(_round_up(max(B, 1), 8), 128)
    while Bt > 8 and _vmem_bytes_estimate(Bt, T, E, H) > budget_bytes:
        Bt -= 8
    return Bt


def init_params(key, vocab_size, embed_dim, hidden):
    ks = jax.random.split(key, 14)
    s = 0.1
    n = lambda k, shape: jax.random.normal(k, shape, jnp.float32) * s
    return {
        "embedding": n(ks[0], (vocab_size, embed_dim)),
        "w_ih_f": n(ks[1], (3 * hidden, embed_dim)),
        "w_hh_f": n(ks[2], (3 * hidden, hidden)),
        "b_ih_f": n(ks[3], (3 * hidden,)),
        "b_hh_f": n(ks[4], (3 * hidden,)),
        "w_ih_b": n(ks[5], (3 * hidden, embed_dim)),
        "w_hh_b": n(ks[6], (3 * hidden, hidden)),
        "b_ih_b": n(ks[7], (3 * hidden,)),
        "b_hh_b": n(ks[8], (3 * hidden,)),
        "ln_gamma": 1.0 + n(ks[9], (2 * hidden,)),
        "ln_beta": n(ks[10], (2 * hidden,)),
        "w_att": n(ks[11], (2 * hidden, 2 * hidden)),
        "b_att": n(ks[12], (2 * hidden,)),
        "cv": n(ks[13], (2 * hidden,)),
    }


def word_attention_forward(sents, lengths, params):
    H = params["w_hh_f"].shape[1]
    emb = jnp.take(params["embedding"], sents, axis=0)        # (B, T, E)
    B, T, E = emb.shape

    Bt = _pick_batch_tile(B, T, E, H)
    B_pad = _round_up(B, Bt)
    n_tiles = B_pad // Bt

    x = jnp.transpose(emb, (1, 0, 2)).astype(jnp.float32)     # (T, B, E)
    x = jnp.pad(x, ((0, 0), (0, B_pad - B), (0, 0)))
    lengths_p = jnp.pad(jnp.asarray(lengths, jnp.int32), (0, B_pad - B))
    len_col = lengths_p.reshape(B_pad, 1)                     # (B_pad, 1) int32

    f32 = jnp.float32
    t2 = lambda w: jnp.asarray(w, f32).T
    row = lambda v: jnp.asarray(v, f32).reshape(1, -1)

    def fold_bias(bih, bhh):
        bih = jnp.asarray(bih, f32)
        bhh = jnp.asarray(bhh, f32)
        combined = bih + jnp.concatenate([bhh[:2 * H], jnp.zeros((H,), f32)])
        return combined, bhh[2 * H:].reshape(1, -1)

    bi_f, bhn_f = fold_bias(params["b_ih_f"], params["b_hh_f"])
    bi_b, bhn_b = fold_bias(params["b_ih_b"], params["b_hh_b"])
    bi_cat = jnp.concatenate([bi_f, bi_b]).reshape(1, -1)                 # (1, 6H)
    wih_cat = jnp.concatenate([t2(params["w_ih_f"]), t2(params["w_ih_b"])], axis=1)  # (E, 6H)

    gamma = jnp.asarray(params["ln_gamma"], f32)
    beta = jnp.asarray(params["ln_beta"], f32)
    watt = t2(params["w_att"])                                            # (2H, 2H)

    inputs = (
        x, len_col,
        wih_cat, t2(params["w_hh_f"]), t2(params["w_hh_b"]), bi_cat, bhn_f, bhn_b,
        gamma[:H].reshape(1, -1), gamma[H:].reshape(1, -1),
        beta[:H].reshape(1, -1), beta[H:].reshape(1, -1),
        watt[:H, :], watt[H:, :], row(params["b_att"]), row(params["cv"]),
    )

    weight_specs = [pl.BlockSpec(w.shape, lambda i: (0, 0)) for w in inputs[2:]]
    in_specs = [
        pl.BlockSpec((T, Bt, E), lambda i: (0, i, 0)),
        pl.BlockSpec((Bt, 1), lambda i: (i, 0)),
    ] + weight_specs

    vmem_limit = int(min(max(2 * _vmem_bytes_estimate(Bt, T, E, H), 32 << 20), 64 << 20))

    sent, attw = pl.pallas_call(
        word_attention_kernel,
        out_shape=(
            jax.ShapeDtypeStruct((B_pad, 2 * H), jnp.float32),
            jax.ShapeDtypeStruct((B_pad, T), jnp.float32),
        ),
        grid=(n_tiles,),
        in_specs=in_specs,
        out_specs=(
            pl.BlockSpec((Bt, 2 * H), lambda i: (i, 0)),
            pl.BlockSpec((Bt, T), lambda i: (i, 0)),
        ),
        scratch_shapes=[
            pltpu.VMEM((T, Bt, H), jnp.float32),      # forward GRU outputs
            pltpu.VMEM((T, Bt, H), jnp.float32),      # backward GRU outputs
            pltpu.VMEM((T, Bt, 3 * H), jnp.float32),  # precomputed fwd input proj
            pltpu.VMEM((T, Bt, 3 * H), jnp.float32),  # precomputed bwd input proj
        ],
        compiler_params=pltpu.CompilerParams(
            dimension_semantics=("parallel",),
            vmem_limit_bytes=vmem_limit),
    )(*inputs)

    return sent[:B], attw[:B]


def reference_forward(sents, lengths, p):
    """Pure-JAX reference mirroring the PyTorch module (eval mode)."""
    emb = p["embedding"][sents].astype(jnp.float32)            # (B, T, E)
    B, T, _E = emb.shape
    H = p["w_hh_f"].shape[1]

    def gru_dir(wih, whh, bih, bhh, reverse):
        h = jnp.zeros((B, H), jnp.float32)
        outs = [None] * T
        ts = range(T - 1, -1, -1) if reverse else range(T)
        for t in ts:
            m = (t < lengths).astype(jnp.float32)[:, None]
            x_t = emb[:, t]
            gi = x_t @ wih.T + bih
            gh = h @ whh.T + bhh
            r = jax.nn.sigmoid(gi[:, :H] + gh[:, :H])
            z = jax.nn.sigmoid(gi[:, H:2 * H] + gh[:, H:2 * H])
            n = jnp.tanh(gi[:, 2 * H:] + r * gh[:, 2 * H:])
            h_new = (1.0 - z) * n + z * h
            h = m * h_new + (1.0 - m) * h
            outs[t] = h
        return jnp.stack(outs, axis=1)                         # (B, T, H)

    hf = gru_dir(p["w_ih_f"], p["w_hh_f"], p["b_ih_f"], p["b_hh_f"], False)
    hb = gru_dir(p["w_ih_b"], p["w_hh_b"], p["b_ih_b"], p["b_hh_b"], True)
    hcat = jnp.concatenate([hf, hb], axis=-1)                  # (B, T, 2H)
    mu = hcat.mean(-1, keepdims=True)
    var = ((hcat - mu) ** 2).mean(-1, keepdims=True)
    normed = (hcat - mu) / jnp.sqrt(var + 1e-5) * p["ln_gamma"] + p["ln_beta"]
    a = jnp.tanh(normed @ p["w_att"].T + p["b_att"])
    s = jnp.sum(a * p["cv"], axis=-1, keepdims=True)           # (B, T, 1)
    mask = (jnp.arange(T)[None, :] < lengths[:, None]).astype(jnp.float32)[:, :, None]
    e = jnp.exp(s) * mask
    w = e / e.sum(axis=1, keepdims=True)
    sent = (hcat * w).sum(axis=1)
    return sent, w[:, :, 0]


if __name__ == "__main__":
    vocab_size, embed_dim, hidden = 50, 32, 32
    B, T = 4, 8

    key = jax.random.PRNGKey(0)
    kp, kt = jax.random.split(key)
    params = init_params(kp, vocab_size, embed_dim, hidden)
    sents = jax.random.randint(kt, (B, T), 0, vocab_size, dtype=jnp.int32)
    lengths = jnp.array([8, 5, 3, 6], dtype=jnp.int32)   # max length == T

    sent_emb, att_w = word_attention_forward(sents, lengths, params)
    jax.block_until_ready((sent_emb, att_w))

    ref_sent, ref_w = reference_forward(sents, lengths, params)
    assert sent_emb.shape == (B, 2 * hidden) and att_w.shape == (B, T)
    assert np.allclose(np.asarray(sent_emb), np.asarray(ref_sent), atol=5e-3, rtol=5e-3)
    assert np.allclose(np.asarray(att_w), np.asarray(ref_w), atol=5e-3, rtol=5e-3)
    print("KERNEL_OK")
</pallas_src>

<mosaic_0001>
module attributes {stable_mosaic.version = 11 : i64} {
  func.func @word_attention_kernel(%arg0: i32, %arg1: memref<8x8x32xf32, #tpu.memory_space<vmem>>, %arg2: memref<8x1xi32, #tpu.memory_space<vmem>>, %arg3: memref<32x192xf32, #tpu.memory_space<vmem>>, %arg4: memref<32x96xf32, #tpu.memory_space<vmem>>, %arg5: memref<32x96xf32, #tpu.memory_space<vmem>>, %arg6: memref<1x192xf32, #tpu.memory_space<vmem>>, %arg7: memref<1x32xf32, #tpu.memory_space<vmem>>, %arg8: memref<1x32xf32, #tpu.memory_space<vmem>>, %arg9: memref<1x32xf32, #tpu.memory_space<vmem>>, %arg10: memref<1x32xf32, #tpu.memory_space<vmem>>, %arg11: memref<1x32xf32, #tpu.memory_space<vmem>>, %arg12: memref<1x32xf32, #tpu.memory_space<vmem>>, %arg13: memref<32x64xf32, #tpu.memory_space<vmem>>, %arg14: memref<32x64xf32, #tpu.memory_space<vmem>>, %arg15: memref<1x64xf32, #tpu.memory_space<vmem>>, %arg16: memref<1x64xf32, #tpu.memory_space<vmem>>, %arg17: memref<8x64xf32, #tpu.memory_space<vmem>>, %arg18: memref<8x8xf32, #tpu.memory_space<vmem>>, %arg19: memref<8x8x32xf32, #tpu.memory_space<vmem>>, %arg20: memref<8x8x32xf32, #tpu.memory_space<vmem>>, %arg21: memref<8x8x96xf32, #tpu.memory_space<vmem>>, %arg22: memref<8x8x96xf32, #tpu.memory_space<vmem>>) attributes {dimension_semantics = [#tpu.dimension_semantics<parallel>], iteration_bounds = array<i64: 1>, scalar_prefetch = 0 : i64, scratch_operands = 4 : i64, tpu.core_type = #tpu.core_type<tc>, window_params = [{transform_indices = @transform_0, window_bounds = array<i64: 8, 8, 32>}, {transform_indices = @transform_1, window_bounds = array<i64: 8, 1>}, {pipeline_mode = #tpu.pipeline_mode<synchronous>, transform_indices = @transform_2, window_bounds = array<i64: 32, 192>}, {pipeline_mode = #tpu.pipeline_mode<synchronous>, transform_indices = @transform_3, window_bounds = array<i64: 32, 96>}, {pipeline_mode = #tpu.pipeline_mode<synchronous>, transform_indices = @transform_4, window_bounds = array<i64: 32, 96>}, {pipeline_mode = #tpu.pipeline_mode<synchronous>, transform_indices = @transform_5, window_bounds = array<i64: 1, 192>}, {pipeline_mode = #tpu.pipeline_mode<synchronous>, transform_indices = @transform_6, window_bounds = array<i64: 1, 32>}, {pipeline_mode = #tpu.pipeline_mode<synchronous>, transform_indices = @transform_7, window_bounds = array<i64: 1, 32>}, {pipeline_mode = #tpu.pipeline_mode<synchronous>, transform_indices = @transform_8, window_bounds = array<i64: 1, 32>}, {pipeline_mode = #tpu.pipeline_mode<synchronous>, transform_indices = @transform_9, window_bounds = array<i64: 1, 32>}, {pipeline_mode = #tpu.pipeline_mode<synchronous>, transform_indices = @transform_10, window_bounds = array<i64: 1, 32>}, {pipeline_mode = #tpu.pipeline_mode<synchronous>, transform_indices = @transform_11, window_bounds = array<i64: 1, 32>}, {pipeline_mode = #tpu.pipeline_mode<synchronous>, transform_indices = @transform_12, window_bounds = array<i64: 32, 64>}, {pipeline_mode = #tpu.pipeline_mode<synchronous>, transform_indices = @transform_13, window_bounds = array<i64: 32, 64>}, {pipeline_mode = #tpu.pipeline_mode<synchronous>, transform_indices = @transform_14, window_bounds = array<i64: 1, 64>}, {pipeline_mode = #tpu.pipeline_mode<synchronous>, transform_indices = @transform_15, window_bounds = array<i64: 1, 64>}, {transform_indices = @transform_16, window_bounds = array<i64: 8, 64>}, {transform_indices = @transform_17, window_bounds = array<i64: 8, 8>}]} {
    %c0 = arith.constant 0 : index
    %c0_0 = arith.constant 0 : index
    %0 = vector.load %arg2[%c0, %c0_0] : memref<8x1xi32, #tpu.memory_space<vmem>>, vector<8x1xi32>
    %c0_1 = arith.constant 0 : index
    %c0_2 = arith.constant 0 : index
    %1 = vector.load %arg4[%c0_1, %c0_2] : memref<32x96xf32, #tpu.memory_space<vmem>>, vector<32x96xf32>
    %c0_3 = arith.constant 0 : index
    %c0_4 = arith.constant 0 : index
    %2 = vector.load %arg5[%c0_3, %c0_4] : memref<32x96xf32, #tpu.memory_space<vmem>>, vector<32x96xf32>
    %c0_5 = arith.constant 0 : index
    %c0_6 = arith.constant 0 : index
    %3 = vector.load %arg7[%c0_5, %c0_6] : memref<1x32xf32, #tpu.memory_space<vmem>>, vector<1x32xf32>
    %c0_7 = arith.constant 0 : index
    %c0_8 = arith.constant 0 : index
    %4 = vector.load %arg8[%c0_7, %c0_8] : memref<1x32xf32, #tpu.memory_space<vmem>>, vector<1x32xf32>
    %c0_9 = arith.constant 0 : index
    %c0_10 = arith.constant 0 : index
    %c0_11 = arith.constant 0 : index
    %5 = vector.load %arg1[%c0_9, %c0_10, %c0_11] : memref<8x8x32xf32, #tpu.memory_space<vmem>>, vector<8x8x32xf32>
    %6 = vector.shape_cast %5 : vector<8x8x32xf32> to vector<64x32xf32>
    %c0_12 = arith.constant 0 : index
    %c0_13 = arith.constant 0 : index
    %7 = vector.load %arg3[%c0_12, %c0_13] : memref<32x192xf32, #tpu.memory_space<vmem>>, vector<32x192xf32>
    %cst = arith.constant dense<0.000000e+00> : vector<64x192xf32>
    %8 = tpu.matmul %6, %7, %cst {dimension_numbers = #tpu.dot_dimension_numbers<[1], [0], [0], [1], [0, 0, 1, 1], [], []>} : vector<64x32xf32>, vector<32x192xf32>, vector<64x192xf32> -> vector<64x192xf32>
    %c0_14 = arith.constant 0 : index
    %c0_15 = arith.constant 0 : index
    %9 = vector.load %arg6[%c0_14, %c0_15] : memref<1x192xf32, #tpu.memory_space<vmem>>, vector<1x192xf32>
    %10 = vector.broadcast %9 : vector<1x192xf32> to vector<64x192xf32>
    %11 = arith.addf %8, %10 : vector<64x192xf32>
    %12 = vector.extract_strided_slice %11 {offsets = [0, 0], sizes = [64, 96], strides = [1, 1]} : vector<64x192xf32> to vector<64x96xf32>
    %13 = vector.shape_cast %12 : vector<64x96xf32> to vector<8x8x96xf32>
    %c0_16 = arith.constant 0 : index
    %c0_17 = arith.constant 0 : index
    %c0_18 = arith.constant 0 : index
    %14 = vector.load %arg21[%c0_16, %c0_17, %c0_18] : memref<8x8x96xf32, #tpu.memory_space<vmem>>, vector<8x8x96xf32>
    tpu.vector_store %arg21[%c0_16, %c0_17, %c0_18], %13 {strides = array<i32>} : memref<8x8x96xf32, #tpu.memory_space<vmem>>, vector<8x8x96xf32>,
    %15 = vector.extract_strided_slice %11 {offsets = [0, 96], sizes = [64, 96], strides = [1, 1]} : vector<64x192xf32> to vector<64x96xf32>
    %16 = vector.shape_cast %15 : vector<64x96xf32> to vector<8x8x96xf32>
    %c0_19 = arith.constant 0 : index
    %c0_20 = arith.constant 0 : index
    %c0_21 = arith.constant 0 : index
    %17 = vector.load %arg22[%c0_19, %c0_20, %c0_21] : memref<8x8x96xf32, #tpu.memory_space<vmem>>, vector<8x8x96xf32>
    tpu.vector_store %arg22[%c0_19, %c0_20, %c0_21], %16 {strides = array<i32>} : memref<8x8x96xf32, #tpu.memory_space<vmem>>, vector<8x8x96xf32>,
    %cst_22 = arith.constant 0.000000e+00 : f32
    %18 = vector.broadcast %cst_22 : f32 to vector<8x32xf32>
    %c0_i32 = arith.constant 0 : i32
    %c7_i32 = arith.constant 7 : i32
    %19 = arith.subi %c7_i32, %c0_i32 : i32
    %20 = arith.index_cast %c0_i32 : i32 to index
    %c0_23 = arith.constant 0 : index
    %c0_24 = arith.constant 0 : index
    %21 = vector.load %arg21[%20, %c0_23, %c0_24] : memref<8x8x96xf32, #tpu.memory_space<vmem>>, vector<1x8x96xf32>
    %22 = vector.shape_cast %21 : vector<1x8x96xf32> to vector<8x96xf32>
    %cst_25 = arith.constant dense<0.000000e+00> : vector<8x96xf32>
    %23 = tpu.matmul %18, %1, %cst_25 {dimension_numbers = #tpu.dot_dimension_numbers<[1], [0], [0], [1], [0, 0, 1, 1], [], []>} : vector<8x32xf32>, vector<32x96xf32>, vector<8x96xf32> -> vector<8x96xf32>
    %24 = vector.extract_strided_slice %22 {offsets = [0, 0], sizes = [8, 32], strides = [1, 1]} : vector<8x96xf32> to vector<8x32xf32>
    %25 = vector.extract_strided_slice %23 {offsets = [0, 0], sizes = [8, 32], strides = [1, 1]} : vector<8x96xf32> to vector<8x32xf32>
    %26 = arith.addf %24, %25 : vector<8x32xf32>
    %27 = arith.negf %26 : vector<8x32xf32>
    %28 = math.exp %27 : vector<8x32xf32>
    %cst_26 = arith.constant 1.000000e+00 : f32
    %29 = vector.broadcast %cst_26 : f32 to vector<8x32xf32>
    %30 = arith.addf %29, %28 : vector<8x32xf32>
    %31 = arith.divf %29, %30 : vector<8x32xf32>
    %32 = vector.extract_strided_slice %22 {offsets = [0, 32], sizes = [8, 32], strides = [1, 1]} : vector<8x96xf32> to vector<8x32xf32>
    %33 = vector.extract_strided_slice %23 {offsets = [0, 32], sizes = [8, 32], strides = [1, 1]} : vector<8x96xf32> to vector<8x32xf32>
    %34 = arith.addf %32, %33 : vector<8x32xf32>
    %35 = arith.negf %34 : vector<8x32xf32>
    %36 = math.exp %35 : vector<8x32xf32>
    %cst_27 = arith.constant 1.000000e+00 : f32
    %37 = vector.broadcast %cst_27 : f32 to vector<8x32xf32>
    %38 = arith.addf %37, %36 : vector<8x32xf32>
    %39 = arith.divf %37, %38 : vector<8x32xf32>
    %40 = vector.extract_strided_slice %22 {offsets = [0, 64], sizes = [8, 32], strides = [1, 1]} : vector<8x96xf32> to vector<8x32xf32>
    %41 = vector.extract_strided_slice %23 {offsets = [0, 64], sizes = [8, 32], strides = [1, 1]} : vector<8x96xf32> to vector<8x32xf32>
    %42 = vector.broadcast %3 : vector<1x32xf32> to vector<8x32xf32>
    %43 = arith.addf %41, %42 : vector<8x32xf32>
    %44 = arith.mulf %31, %43 : vector<8x32xf32>
    %45 = arith.addf %40, %44 : vector<8x32xf32>
    %46 = math.tanh %45 : vector<8x32xf32>
    %cst_28 = arith.constant 1.000000e+00 : f32
    %47 = vector.broadcast %cst_28 : f32 to vector<8x32xf32>
    %48 = arith.subf %47, %39 : vector<8x32xf32>
    %49 = arith.mulf %48, %46 : vector<8x32xf32>
    %50 = arith.mulf %39, %18 : vector<8x32xf32>
    %51 = arith.addf %49, %50 : vector<8x32xf32>
    %52 = arith.index_cast %19 : i32 to index
    %c0_29 = arith.constant 0 : index
    %c0_30 = arith.constant 0 : index
    %53 = vector.load %arg22[%52, %c0_29, %c0_30] : memref<8x8x96xf32, #tpu.memory_space<vmem>>, vector<1x8x96xf32>
    %54 = vector.shape_cast %53 : vector<1x8x96xf32> to vector<8x96xf32>
    %cst_31 = arith.constant dense<0.000000e+00> : vector<8x96xf32>
    %55 = tpu.matmul %18, %2, %cst_31 {dimension_numbers = #tpu.dot_dimension_numbers<[1], [0], [0], [1], [0, 0, 1, 1], [], []>} : vector<8x32xf32>, vector<32x96xf32>, vector<8x96xf32> -> vector<8x96xf32>
    %56 = vector.extract_strided_slice %54 {offsets = [0, 0], sizes = [8, 32], strides = [1, 1]} : vector<8x96xf32> to vector<8x32xf32>
    %57 = vector.extract_strided_slice %55 {offsets = [0, 0], sizes = [8, 32], strides = [1, 1]} : vector<8x96xf32> to vector<8x32xf32>
    %58 = arith.addf %56, %57 : vector<8x32xf32>
    %59 = arith.negf %58 : vector<8x32xf32>
    %60 = math.exp %59 : vector<8x32xf32>
    %cst_32 = arith.constant 1.000000e+00 : f32
    %61 = vector.broadcast %cst_32 : f32 to vector<8x32xf32>
    %62 = arith.addf %61, %60 : vector<8x32xf32>
    %63 = arith.divf %61, %62 : vector<8x32xf32>
    %64 = vector.extract_strided_slice %54 {offsets = [0, 32], sizes = [8, 32], strides = [1, 1]} : vector<8x96xf32> to vector<8x32xf32>
    %65 = vector.extract_strided_slice %55 {offsets = [0, 32], sizes = [8, 32], strides = [1, 1]} : vector<8x96xf32> to vector<8x32xf32>
    %66 = arith.addf %64, %65 : vector<8x32xf32>
    %67 = arith.negf %66 : vector<8x32xf32>
    %68 = math.exp %67 : vector<8x32xf32>
    %cst_33 = arith.constant 1.000000e+00 : f32
    %69 = vector.broadcast %cst_33 : f32 to vector<8x32xf32>
    %70 = arith.addf %69, %68 : vector<8x32xf32>
    %71 = arith.divf %69, %70 : vector<8x32xf32>
    %72 = vector.extract_strided_slice %54 {offsets = [0, 64], sizes = [8, 32], strides = [1, 1]} : vector<8x96xf32> to vector<8x32xf32>
    %73 = vector.extract_strided_slice %55 {offsets = [0, 64], sizes = [8, 32], strides = [1, 1]} : vector<8x96xf32> to vector<8x32xf32>
    %74 = vector.broadcast %4 : vector<1x32xf32> to vector<8x32xf32>
    %75 = arith.addf %73, %74 : vector<8x32xf32>
    %76 = arith.mulf %63, %75 : vector<8x32xf32>
    %77 = arith.addf %72, %76 : vector<8x32xf32>
    %78 = math.tanh %77 : vector<8x32xf32>
    %cst_34 = arith.constant 1.000000e+00 : f32
    %79 = vector.broadcast %cst_34 : f32 to vector<8x32xf32>
    %80 = arith.subf %79, %71 : vector<8x32xf32>
    %81 = arith.mulf %80, %78 : vector<8x32xf32>
    %82 = arith.mulf %71, %18 : vector<8x32xf32>
    %83 = arith.addf %81, %82 : vector<8x32xf32>
    %84 = vector.broadcast %c0_i32 : i32 to vector<8x1xi32>
    %85 = arith.cmpi sgt, %0, %84 : vector<8x1xi32>
    %86 = vector.shape_cast %85 : vector<8x1xi1> to vector<8x1xi1>
    %87 = vector.broadcast %86 : vector<8x1xi1> to vector<8x32xi1>
    %88 = arith.select %87, %51, %18 : vector<8x32xi1>, vector<8x32xf32>
    %89 = vector.broadcast %19 : i32 to vector<8x1xi32>
    %90 = arith.cmpi sgt, %0, %89 : vector<8x1xi32>
    %91 = vector.shape_cast %90 : vector<8x1xi1> to vector<8x1xi1>
    %92 = vector.broadcast %91 : vector<8x1xi1> to vector<8x32xi1>
    %93 = arith.select %92, %83, %18 : vector<8x32xi1>, vector<8x32xf32>
    %94 = arith.index_cast %c0_i32 : i32 to index
    %c0_35 = arith.constant 0 : index
    %c0_36 = arith.constant 0 : index
    %95 = vector.load %arg19[%94, %c0_35, %c0_36] : memref<8x8x32xf32, #tpu.memory_space<vmem>>, vector<1x8x32xf32>
    %96 = vector.shape_cast %95 : vector<1x8x32xf32> to vector<8x32xf32>
    %97 = vector.shape_cast %88 : vector<8x32xf32> to vector<1x8x32xf32>
    tpu.vector_store %arg19[%94, %c0_35, %c0_36], %97 {strides = array<i32>} : memref<8x8x32xf32, #tpu.memory_space<vmem>>, vector<1x8x32xf32>,
    %98 = arith.index_cast %19 : i32 to index
    %c0_37 = arith.constant 0 : index
    %c0_38 = arith.constant 0 : index
    %99 = vector.load %arg20[%98, %c0_37, %c0_38] : memref<8x8x32xf32, #tpu.memory_space<vmem>>, vector<1x8x32xf32>
    %100 = vector.shape_cast %99 : vector<1x8x32xf32> to vector<8x32xf32>
    %101 = vector.shape_cast %93 : vector<8x32xf32> to vector<1x8x32xf32>
    tpu.vector_store %arg20[%98, %c0_37, %c0_38], %101 {strides = array<i32>} : memref<8x8x32xf32, #tpu.memory_space<vmem>>, vector<1x8x32xf32>,
    %c1_i32 = arith.constant 1 : i32
    %c7_i32_39 = arith.constant 7 : i32
    %102 = arith.subi %c7_i32_39, %c1_i32 : i32
    %103 = arith.index_cast %c1_i32 : i32 to index
    %c0_40 = arith.constant 0 : index
    %c0_41 = arith.constant 0 : index
    %104 = vector.load %arg21[%103, %c0_40, %c0_41] : memref<8x8x96xf32, #tpu.memory_space<vmem>>, vector<1x8x96xf32>
    %105 = vector.shape_cast %104 : vector<1x8x96xf32> to vector<8x96xf32>
    %cst_42 = arith.constant dense<0.000000e+00> : vector<8x96xf32>
    %106 = tpu.matmul %88, %1, %cst_42 {dimension_numbers = #tpu.dot_dimension_numbers<[1], [0], [0], [1], [0, 0, 1, 1], [], []>} : vector<8x32xf32>, vector<32x96xf32>, vector<8x96xf32> -> vector<8x96xf32>
    %107 = vector.extract_strided_slice %105 {offsets = [0, 0], sizes = [8, 32], strides = [1, 1]} : vector<8x96xf32> to vector<8x32xf32>
    %108 = vector.extract_strided_slice %106 {offsets = [0, 0], sizes = [8, 32], strides = [1, 1]} : vector<8x96xf32> to vector<8x32xf32>
    %109 = arith.addf %107, %108 : vector<8x32xf32>
    %110 = arith.negf %109 : vector<8x32xf32>
    %111 = math.exp %110 : vector<8x32xf32>
    %cst_43 = arith.constant 1.000000e+00 : f32
    %112 = vector.broadcast %cst_43 : f32 to vector<8x32xf32>
    %113 = arith.addf %112, %111 : vector<8x32xf32>
    %114 = arith.divf %112, %113 : vector<8x32xf32>
    %115 = vector.extract_strided_slice %105 {offsets = [0, 32], sizes = [8, 32], strides = [1, 1]} : vector<8x96xf32> to vector<8x32xf32>
    %116 = vector.extract_strided_slice %106 {offsets = [0, 32], sizes = [8, 32], strides = [1, 1]} : vector<8x96xf32> to vector<8x32xf32>
    %117 = arith.addf %115, %116 : vector<8x32xf32>
    %118 = arith.negf %117 : vector<8x32xf32>
    %119 = math.exp %118 : vector<8x32xf32>
    %cst_44 = arith.constant 1.000000e+00 : f32
    %120 = vector.broadcast %cst_44 : f32 to vector<8x32xf32>
    %121 = arith.addf %120, %119 : vector<8x32xf32>
    %122 = arith.divf %120, %121 : vector<8x32xf32>
    %123 = vector.extract_strided_slice %105 {offsets = [0, 64], sizes = [8, 32], strides = [1, 1]} : vector<8x96xf32> to vector<8x32xf32>
    %124 = vector.extract_strided_slice %106 {offsets = [0, 64], sizes = [8, 32], strides = [1, 1]} : vector<8x96xf32> to vector<8x32xf32>
    %125 = vector.broadcast %3 : vector<1x32xf32> to vector<8x32xf32>
    %126 = arith.addf %124, %125 : vector<8x32xf32>
    %127 = arith.mulf %114, %126 : vector<8x32xf32>
    %128 = arith.addf %123, %127 : vector<8x32xf32>
    %129 = math.tanh %128 : vector<8x32xf32>
    %cst_45 = arith.constant 1.000000e+00 : f32
    %130 = vector.broadcast %cst_45 : f32 to vector<8x32xf32>
    %131 = arith.subf %130, %122 : vector<8x32xf32>
    %132 = arith.mulf %131, %129 : vector<8x32xf32>
    %133 = arith.mulf %122, %88 : vector<8x32xf32>
    %134 = arith.addf %132, %133 : vector<8x32xf32>
    %135 = arith.index_cast %102 : i32 to index
    %c0_46 = arith.constant 0 : index
    %c0_47 = arith.constant 0 : index
    %136 = vector.load %arg22[%135, %c0_46, %c0_47] : memref<8x8x96xf32, #tpu.memory_space<vmem>>, vector<1x8x96xf32>
    %137 = vector.shape_cast %136 : vector<1x8x96xf32> to vector<8x96xf32>
    %cst_48 = arith.constant dense<0.000000e+00> : vector<8x96xf32>
    %138 = tpu.matmul %93, %2, %cst_48 {dimension_numbers = #tpu.dot_dimension_numbers<[1], [0], [0], [1], [0, 0, 1, 1], [], []>} : vector<8x32xf32>, vector<32x96xf32>, vector<8x96xf32> -> vector<8x96xf32>
    %139 = vector.extract_strided_slice %137 {offsets = [0, 0], sizes = [8, 32], strides = [1, 1]} : vector<8x96xf32> to vector<8x32xf32>
    %140 = vector.extract_strided_slice %138 {offsets = [0, 0], sizes = [8, 32], strides = [1, 1]} : vector<8x96xf32> to vector<8x32xf32>
    %141 = arith.addf %139, %140 : vector<8x32xf32>
    %142 = arith.negf %141 : vector<8x32xf32>
    %143 = math.exp %142 : vector<8x32xf32>
    %cst_49 = arith.constant 1.000000e+00 : f32
    %144 = vector.broadcast %cst_49 : f32 to vector<8x32xf32>
    %145 = arith.addf %144, %143 : vector<8x32xf32>
    %146 = arith.divf %144, %145 : vector<8x32xf32>
    %147 = vector.extract_strided_slice %137 {offsets = [0, 32], sizes = [8, 32], strides = [1, 1]} : vector<8x96xf32> to vector<8x32xf32>
    %148 = vector.extract_strided_slice %138 {offsets = [0, 32], sizes = [8, 32], strides = [1, 1]} : vector<8x96xf32> to vector<8x32xf32>
    %149 = arith.addf %147, %148 : vector<8x32xf32>
    %150 = arith.negf %149 : vector<8x32xf32>
    %151 = math.exp %150 : vector<8x32xf32>
    %cst_50 = arith.constant 1.000000e+00 : f32
    %152 = vector.broadcast %cst_50 : f32 to vector<8x32xf32>
    %153 = arith.addf %152, %151 : vector<8x32xf32>
    %154 = arith.divf %152, %153 : vector<8x32xf32>
    %155 = vector.extract_strided_slice %137 {offsets = [0, 64], sizes = [8, 32], strides = [1, 1]} : vector<8x96xf32> to vector<8x32xf32>
    %156 = vector.extract_strided_slice %138 {offsets = [0, 64], sizes = [8, 32], strides = [1, 1]} : vector<8x96xf32> to vector<8x32xf32>
    %157 = vector.broadcast %4 : vector<1x32xf32> to vector<8x32xf32>
    %158 = arith.addf %156, %157 : vector<8x32xf32>
    %159 = arith.mulf %146, %158 : vector<8x32xf32>
    %160 = arith.addf %155, %159 : vector<8x32xf32>
    %161 = math.tanh %160 : vector<8x32xf32>
    %cst_51 = arith.constant 1.000000e+00 : f32
    %162 = vector.broadcast %cst_51 : f32 to vector<8x32xf32>
    %163 = arith.subf %162, %154 : vector<8x32xf32>
    %164 = arith.mulf %163, %161 : vector<8x32xf32>
    %165 = arith.mulf %154, %93 : vector<8x32xf32>
    %166 = arith.addf %164, %165 : vector<8x32xf32>
    %167 = vector.broadcast %c1_i32 : i32 to vector<8x1xi32>
    %168 = arith.cmpi sgt, %0, %167 : vector<8x1xi32>
    %169 = vector.shape_cast %168 : vector<8x1xi1> to vector<8x1xi1>
    %170 = vector.broadcast %169 : vector<8x1xi1> to vector<8x32xi1>
    %171 = arith.select %170, %134, %88 : vector<8x32xi1>, vector<8x32xf32>
    %172 = vector.broadcast %102 : i32 to vector<8x1xi32>
    %173 = arith.cmpi sgt, %0, %172 : vector<8x1xi32>
    %174 = vector.shape_cast %173 : vector<8x1xi1> to vector<8x1xi1>
    %175 = vector.broadcast %174 : vector<8x1xi1> to vector<8x32xi1>
    %176 = arith.select %175, %166, %93 : vector<8x32xi1>, vector<8x32xf32>
    %177 = arith.index_cast %c1_i32 : i32 to index
    %c0_52 = arith.constant 0 : index
    %c0_53 = arith.constant 0 : index
    %178 = vector.load %arg19[%177, %c0_52, %c0_53] : memref<8x8x32xf32, #tpu.memory_space<vmem>>, vector<1x8x32xf32>
    %179 = vector.shape_cast %178 : vector<1x8x32xf32> to vector<8x32xf32>
    %180 = vector.shape_cast %171 : vector<8x32xf32> to vector<1x8x32xf32>
    tpu.vector_store %arg19[%177, %c0_52, %c0_53], %180 {strides = array<i32>} : memref<8x8x32xf32, #tpu.memory_space<vmem>>, vector<1x8x32xf32>,
    %181 = arith.index_cast %102 : i32 to index
    %c0_54 = arith.constant 0 : index
    %c0_55 = arith.constant 0 : index
    %182 = vector.load %arg20[%181, %c0_54, %c0_55] : memref<8x8x32xf32, #tpu.memory_space<vmem>>, vector<1x8x32xf32>
    %183 = vector.shape_cast %182 : vector<1x8x32xf32> to vector<8x32xf32>
    %184 = vector.shape_cast %176 : vector<8x32xf32> to vector<1x8x32xf32>
    tpu.vector_store %arg20[%181, %c0_54, %c0_55], %184 {strides = array<i32>} : memref<8x8x32xf32, #tpu.memory_space<vmem>>, vector<1x8x32xf32>,
    %c2_i32 = arith.constant 2 : i32
    %c7_i32_56 = arith.constant 7 : i32
    %185 = arith.subi %c7_i32_56, %c2_i32 : i32
    %186 = arith.index_cast %c2_i32 : i32 to index
    %c0_57 = arith.constant 0 : index
    %c0_58 = arith.constant 0 : index
    %187 = vector.load %arg21[%186, %c0_57, %c0_58] : memref<8x8x96xf32, #tpu.memory_space<vmem>>, vector<1x8x96xf32>
    %188 = vector.shape_cast %187 : vector<1x8x96xf32> to vector<8x96xf32>
    %cst_59 = arith.constant dense<0.000000e+00> : vector<8x96xf32>
    %189 = tpu.matmul %171, %1, %cst_59 {dimension_numbers = #tpu.dot_dimension_numbers<[1], [0], [0], [1], [0, 0, 1, 1], [], []>} : vector<8x32xf32>, vector<32x96xf32>, vector<8x96xf32> -> vector<8x96xf32>
    %190 = vector.extract_strided_slice %188 {offsets = [0, 0], sizes = [8, 32], strides = [1, 1]} : vector<8x96xf32> to vector<8x32xf32>
    %191 = vector.extract_strided_slice %189 {offsets = [0, 0], sizes = [8, 32], strides = [1, 1]} : vector<8x96xf32> to vector<8x32xf32>
    %192 = arith.addf %190, %191 : vector<8x32xf32>
    %193 = arith.negf %192 : vector<8x32xf32>
    %194 = math.exp %193 : vector<8x32xf32>
    %cst_60 = arith.constant 1.000000e+00 : f32
    %195 = vector.broadcast %cst_60 : f32 to vector<8x32xf32>
    %196 = arith.addf %195, %194 : vector<8x32xf32>
    %197 = arith.divf %195, %196 : vector<8x32xf32>
    %198 = vector.extract_strided_slice %188 {offsets = [0, 32], sizes = [8, 32], strides = [1, 1]} : vector<8x96xf32> to vector<8x32xf32>
    %199 = vector.extract_strided_slice %189 {offsets = [0, 32], sizes = [8, 32], strides = [1, 1]} : vector<8x96xf32> to vector<8x32xf32>
    %200 = arith.addf %198, %199 : vector<8x32xf32>
    %201 = arith.negf %200 : vector<8x32xf32>
    %202 = math.exp %201 : vector<8x32xf32>
    %cst_61 = arith.constant 1.000000e+00 : f32
    %203 = vector.broadcast %cst_61 : f32 to vector<8x32xf32>
    %204 = arith.addf %203, %202 : vector<8x32xf32>
    %205 = arith.divf %203, %204 : vector<8x32xf32>
    %206 = vector.extract_strided_slice %188 {offsets = [0, 64], sizes = [8, 32], strides = [1, 1]} : vector<8x96xf32> to vector<8x32xf32>
    %207 = vector.extract_strided_slice %189 {offsets = [0, 64], sizes = [8, 32], strides = [1, 1]} : vector<8x96xf32> to vector<8x32xf32>
    %208 = vector.broadcast %3 : vector<1x32xf32> to vector<8x32xf32>
    %209 = arith.addf %207, %208 : vector<8x32xf32>
    %210 = arith.mulf %197, %209 : vector<8x32xf32>
    %211 = arith.addf %206, %210 : vector<8x32xf32>
    %212 = math.tanh %211 : vector<8x32xf32>
    %cst_62 = arith.constant 1.000000e+00 : f32
    %213 = vector.broadcast %cst_62 : f32 to vector<8x32xf32>
    %214 = arith.subf %213, %205 : vector<8x32xf32>
    %215 = arith.mulf %214, %212 : vector<8x32xf32>
    %216 = arith.mulf %205, %171 : vector<8x32xf32>
    %217 = arith.addf %215, %216 : vector<8x32xf32>
    %218 = arith.index_cast %185 : i32 to index
    %c0_63 = arith.constant 0 : index
    %c0_64 = arith.constant 0 : index
    %219 = vector.load %arg22[%218, %c0_63, %c0_64] : memref<8x8x96xf32, #tpu.memory_space<vmem>>, vector<1x8x96xf32>
    %220 = vector.shape_cast %219 : vector<1x8x96xf32> to vector<8x96xf32>
    %cst_65 = arith.constant dense<0.000000e+00> : vector<8x96xf32>
    %221 = tpu.matmul %176, %2, %cst_65 {dimension_numbers = #tpu.dot_dimension_numbers<[1], [0], [0], [1], [0, 0, 1, 1], [], []>} : vector<8x32xf32>, vector<32x96xf32>, vector<8x96xf32> -> vector<8x96xf32>
    %222 = vector.extract_strided_slice %220 {offsets = [0, 0], sizes = [8, 32], strides = [1, 1]} : vector<8x96xf32> to vector<8x32xf32>
    %223 = vector.extract_strided_slice %221 {offsets = [0, 0], sizes = [8, 32], strides = [1, 1]} : vector<8x96xf32> to vector<8x32xf32>
    %224 = arith.addf %222, %223 : vector<8x32xf32>
    %225 = arith.negf %224 : vector<8x32xf32>
    %226 = math.exp %225 : vector<8x32xf32>
    %cst_66 = arith.constant 1.000000e+00 : f32
    %227 = vector.broadcast %cst_66 : f32 to vector<8x32xf32>
    %228 = arith.addf %227, %226 : vector<8x32xf32>
    %229 = arith.divf %227, %228 : vector<8x32xf32>
    %230 = vector.extract_strided_slice %220 {offsets = [0, 32], sizes = [8, 32], strides = [1, 1]} : vector<8x96xf32> to vector<8x32xf32>
    %231 = vector.extract_strided_slice %221 {offsets = [0, 32], sizes = [8, 32], strides = [1, 1]} : vector<8x96xf32> to vector<8x32xf32>
    %232 = arith.addf %230, %231 : vector<8x32xf32>
    %233 = arith.negf %232 : vector<8x32xf32>
    %234 = math.exp %233 : vector<8x32xf32>
    %cst_67 = arith.constant 1.000000e+00 : f32
    %235 = vector.broadcast %cst_67 : f32 to vector<8x32xf32>
    %236 = arith.addf %235, %234 : vector<8x32xf32>
    %237 = arith.divf %235, %236 : vector<8x32xf32>
    %238 = vector.extract_strided_slice %220 {offsets = [0, 64], sizes = [8, 32], strides = [1, 1]} : vector<8x96xf32> to vector<8x32xf32>
    %239 = vector.extract_strided_slice %221 {offsets = [0, 64], sizes = [8, 32], strides = [1, 1]} : vector<8x96xf32> to vector<8x32xf32>
    %240 = vector.broadcast %4 : vector<1x32xf32> to vector<8x32xf32>
    %241 = arith.addf %239, %240 : vector<8x32xf32>
    %242 = arith.mulf %229, %241 : vector<8x32xf32>
    %243 = arith.addf %238, %242 : vector<8x32xf32>
    %244 = math.tanh %243 : vector<8x32xf32>
    %cst_68 = arith.constant 1.000000e+00 : f32
    %245 = vector.broadcast %cst_68 : f32 to vector<8x32xf32>
    %246 = arith.subf %245, %237 : vector<8x32xf32>
    %247 = arith.mulf %246, %244 : vector<8x32xf32>
    %248 = arith.mulf %237, %176 : vector<8x32xf32>
    %249 = arith.addf %247, %248 : vector<8x32xf32>
    %250 = vector.broadcast %c2_i32 : i32 to vector<8x1xi32>
    %251 = arith.cmpi sgt, %0, %250 : vector<8x1xi32>
    %252 = vector.shape_cast %251 : vector<8x1xi1> to vector<8x1xi1>
    %253 = vector.broadcast %252 : vector<8x1xi1> to vector<8x32xi1>
    %254 = arith.select %253, %217, %171 : vector<8x32xi1>, vector<8x32xf32>
    %255 = vector.broadcast %185 : i32 to vector<8x1xi32>
    %256 = arith.cmpi sgt, %0, %255 : vector<8x1xi32>
    %257 = vector.shape_cast %256 : vector<8x1xi1> to vector<8x1xi1>
    %258 = vector.broadcast %257 : vector<8x1xi1> to vector<8x32xi1>
    %259 = arith.select %258, %249, %176 : vector<8x32xi1>, vector<8x32xf32>
    %260 = arith.index_cast %c2_i32 : i32 to index
    %c0_69 = arith.constant 0 : index
    %c0_70 = arith.constant 0 : index
    %261 = vector.load %arg19[%260, %c0_69, %c0_70] : memref<8x8x32xf32, #tpu.memory_space<vmem>>, vector<1x8x32xf32>
    %262 = vector.shape_cast %261 : vector<1x8x32xf32> to vector<8x32xf32>
    %263 = vector.shape_cast %254 : vector<8x32xf32> to vector<1x8x32xf32>
    tpu.vector_store %arg19[%260, %c0_69, %c0_70], %263 {strides = array<i32>} : memref<8x8x32xf32, #tpu.memory_space<vmem>>, vector<1x8x32xf32>,
    %264 = arith.index_cast %185 : i32 to index
    %c0_71 = arith.constant 0 : index
    %c0_72 = arith.constant 0 : index
    %265 = vector.load %arg20[%264, %c0_71, %c0_72] : memref<8x8x32xf32, #tpu.memory_space<vmem>>, vector<1x8x32xf32>
    %266 = vector.shape_cast %265 : vector<1x8x32xf32> to vector<8x32xf32>
    %267 = vector.shape_cast %259 : vector<8x32xf32> to vector<1x8x32xf32>
    tpu.vector_store %arg20[%264, %c0_71, %c0_72], %267 {strides = array<i32>} : memref<8x8x32xf32, #tpu.memory_space<vmem>>, vector<1x8x32xf32>,
    %c3_i32 = arith.constant 3 : i32
    %c7_i32_73 = arith.constant 7 : i32
    %268 = arith.subi %c7_i32_73, %c3_i32 : i32
    %269 = arith.index_cast %c3_i32 : i32 to index
    %c0_74 = arith.constant 0 : index
    %c0_75 = arith.constant 0 : index
    %270 = vector.load %arg21[%269, %c0_74, %c0_75] : memref<8x8x96xf32, #tpu.memory_space<vmem>>, vector<1x8x96xf32>
    %271 = vector.shape_cast %270 : vector<1x8x96xf32> to vector<8x96xf32>
    %cst_76 = arith.constant dense<0.000000e+00> : vector<8x96xf32>
    %272 = tpu.matmul %254, %1, %cst_76 {dimension_numbers = #tpu.dot_dimension_numbers<[1], [0], [0], [1], [0, 0, 1, 1], [], []>} : vector<8x32xf32>, vector<32x96xf32>, vector<8x96xf32> -> vector<8x96xf32>
    %273 = vector.extract_strided_slice %271 {offsets = [0, 0], sizes = [8, 32], strides = [1, 1]} : vector<8x96xf32> to vector<8x32xf32>
    %274 = vector.extract_strided_slice %272 {offsets = [0, 0], sizes = [8, 32], strides = [1, 1]} : vector<8x96xf32> to vector<8x32xf32>
    %275 = arith.addf %273, %274 : vector<8x32xf32>
    %276 = arith.negf %275 : vector<8x32xf32>
    %277 = math.exp %276 : vector<8x32xf32>
    %cst_77 = arith.constant 1.000000e+00 : f32
    %278 = vector.broadcast %cst_77 : f32 to vector<8x32xf32>
    %279 = arith.addf %278, %277 : vector<8x32xf32>
    %280 = arith.divf %278, %279 : vector<8x32xf32>
    %281 = vector.extract_strided_slice %271 {offsets = [0, 32], sizes = [8, 32], strides = [1, 1]} : vector<8x96xf32> to vector<8x32xf32>
    %282 = vector.extract_strided_slice %272 {offsets = [0, 32], sizes = [8, 32], strides = [1, 1]} : vector<8x96xf32> to vector<8x32xf32>
    %283 = arith.addf %281, %282 : vector<8x32xf32>
    %284 = arith.negf %283 : vector<8x32xf32>
    %285 = math.exp %284 : vector<8x32xf32>
    %cst_78 = arith.constant 1.000000e+00 : f32
    %286 = vector.broadcast %cst_78 : f32 to vector<8x32xf32>
    %287 = arith.addf %286, %285 : vector<8x32xf32>
    %288 = arith.divf %286, %287 : vector<8x32xf32>
    %289 = vector.extract_strided_slice %271 {offsets = [0, 64], sizes = [8, 32], strides = [1, 1]} : vector<8x96xf32> to vector<8x32xf32>
    %290 = vector.extract_strided_slice %272 {offsets = [0, 64], sizes = [8, 32], strides = [1, 1]} : vector<8x96xf32> to vector<8x32xf32>
    %291 = vector.broadcast %3 : vector<1x32xf32> to vector<8x32xf32>
    %292 = arith.addf %290, %291 : vector<8x32xf32>
    %293 = arith.mulf %280, %292 : vector<8x32xf32>
    %294 = arith.addf %289, %293 : vector<8x32xf32>
    %295 = math.tanh %294 : vector<8x32xf32>
    %cst_79 = arith.constant 1.000000e+00 : f32
    %296 = vector.broadcast %cst_79 : f32 to vector<8x32xf32>
    %297 = arith.subf %296, %288 : vector<8x32xf32>
    %298 = arith.mulf %297, %295 : vector<8x32xf32>
    %299 = arith.mulf %288, %254 : vector<8x32xf32>
    %300 = arith.addf %298, %299 : vector<8x32xf32>
    %301 = arith.index_cast %268 : i32 to index
    %c0_80 = arith.constant 0 : index
    %c0_81 = arith.constant 0 : index
    %302 = vector.load %arg22[%301, %c0_80, %c0_81] : memref<8x8x96xf32, #tpu.memory_space<vmem>>, vector<1x8x96xf32>
    %303 = vector.shape_cast %302 : vector<1x8x96xf32> to vector<8x96xf32>
    %cst_82 = arith.constant dense<0.000000e+00> : vector<8x96xf32>
    %304 = tpu.matmul %259, %2, %cst_82 {dimension_numbers = #tpu.dot_dimension_numbers<[1], [0], [0], [1], [0, 0, 1, 1], [], []>} : vector<8x32xf32>, vector<32x96xf32>, vector<8x96xf32> -> vector<8x96xf32>
    %305 = vector.extract_strided_slice %303 {offsets = [0, 0], sizes = [8, 32], strides = [1, 1]} : vector<8x96xf32> to vector<8x32xf32>
    %306 = vector.extract_strided_slice %304 {offsets = [0, 0], sizes = [8, 32], strides = [1, 1]} : vector<8x96xf32> to vector<8x32xf32>
    %307 = arith.addf %305, %306 : vector<8x32xf32>
    %308 = arith.negf %307 : vector<8x32xf32>
    %309 = math.exp %308 : vector<8x32xf32>
    %cst_83 = arith.constant 1.000000e+00 : f32
    %310 = vector.broadcast %cst_83 : f32 to vector<8x32xf32>
    %311 = arith.addf %310, %309 : vector<8x32xf32>
    %312 = arith.divf %310, %311 : vector<8x32xf32>
    %313 = vector.extract_strided_slice %303 {offsets = [0, 32], sizes = [8, 32], strides = [1, 1]} : vector<8x96xf32> to vector<8x32xf32>
    %314 = vector.extract_strided_slice %304 {offsets = [0, 32], sizes = [8, 32], strides = [1, 1]} : vector<8x96xf32> to vector<8x32xf32>
    %315 = arith.addf %313, %314 : vector<8x32xf32>
    %316 = arith.negf %315 : vector<8x32xf32>
    %317 = math.exp %316 : vector<8x32xf32>
    %cst_84 = arith.constant 1.000000e+00 : f32
    %318 = vector.broadcast %cst_84 : f32 to vector<8x32xf32>
    %319 = arith.addf %318, %317 : vector<8x32xf32>
    %320 = arith.divf %318, %319 : vector<8x32xf32>
    %321 = vector.extract_strided_slice %303 {offsets = [0, 64], sizes = [8, 32], strides = [1, 1]} : vector<8x96xf32> to vector<8x32xf32>
    %322 = vector.extract_strided_slice %304 {offsets = [0, 64], sizes = [8, 32], strides = [1, 1]} : vector<8x96xf32> to vector<8x32xf32>
    %323 = vector.broadcast %4 : vector<1x32xf32> to vector<8x32xf32>
    %324 = arith.addf %322, %323 : vector<8x32xf32>
    %325 = arith.mulf %312, %324 : vector<8x32xf32>
    %326 = arith.addf %321, %325 : vector<8x32xf32>
    %327 = math.tanh %326 : vector<8x32xf32>
    %cst_85 = arith.constant 1.000000e+00 : f32
    %328 = vector.broadcast %cst_85 : f32 to vector<8x32xf32>
    %329 = arith.subf %328, %320 : vector<8x32xf32>
    %330 = arith.mulf %329, %327 : vector<8x32xf32>
    %331 = arith.mulf %320, %259 : vector<8x32xf32>
    %332 = arith.addf %330, %331 : vector<8x32xf32>
    %333 = vector.broadcast %c3_i32 : i32 to vector<8x1xi32>
    %334 = arith.cmpi sgt, %0, %333 : vector<8x1xi32>
    %335 = vector.shape_cast %334 : vector<8x1xi1> to vector<8x1xi1>
    %336 = vector.broadcast %335 : vector<8x1xi1> to vector<8x32xi1>
    %337 = arith.select %336, %300, %254 : vector<8x32xi1>, vector<8x32xf32>
    %338 = vector.broadcast %268 : i32 to vector<8x1xi32>
    %339 = arith.cmpi sgt, %0, %338 : vector<8x1xi32>
    %340 = vector.shape_cast %339 : vector<8x1xi1> to vector<8x1xi1>
    %341 = vector.broadcast %340 : vector<8x1xi1> to vector<8x32xi1>
    %342 = arith.select %341, %332, %259 : vector<8x32xi1>, vector<8x32xf32>
    %343 = arith.index_cast %c3_i32 : i32 to index
    %c0_86 = arith.constant 0 : index
    %c0_87 = arith.constant 0 : index
    %344 = vector.load %arg19[%343, %c0_86, %c0_87] : memref<8x8x32xf32, #tpu.memory_space<vmem>>, vector<1x8x32xf32>
    %345 = vector.shape_cast %344 : vector<1x8x32xf32> to vector<8x32xf32>
    %346 = vector.shape_cast %337 : vector<8x32xf32> to vector<1x8x32xf32>
    tpu.vector_store %arg19[%343, %c0_86, %c0_87], %346 {strides = array<i32>} : memref<8x8x32xf32, #tpu.memory_space<vmem>>, vector<1x8x32xf32>,
    %347 = arith.index_cast %268 : i32 to index
    %c0_88 = arith.constant 0 : index
    %c0_89 = arith.constant 0 : index
    %348 = vector.load %arg20[%347, %c0_88, %c0_89] : memref<8x8x32xf32, #tpu.memory_space<vmem>>, vector<1x8x32xf32>
    %349 = vector.shape_cast %348 : vector<1x8x32xf32> to vector<8x32xf32>
    %350 = vector.shape_cast %342 : vector<8x32xf32> to vector<1x8x32xf32>
    tpu.vector_store %arg20[%347, %c0_88, %c0_89], %350 {strides = array<i32>} : memref<8x8x32xf32, #tpu.memory_space<vmem>>, vector<1x8x32xf32>,
    %c4_i32 = arith.constant 4 : i32
    %c7_i32_90 = arith.constant 7 : i32
    %351 = arith.subi %c7_i32_90, %c4_i32 : i32
    %352 = arith.index_cast %c4_i32 : i32 to index
    %c0_91 = arith.constant 0 : index
    %c0_92 = arith.constant 0 : index
    %353 = vector.load %arg21[%352, %c0_91, %c0_92] : memref<8x8x96xf32, #tpu.memory_space<vmem>>, vector<1x8x96xf32>
    %354 = vector.shape_cast %353 : vector<1x8x96xf32> to vector<8x96xf32>
    %cst_93 = arith.constant dense<0.000000e+00> : vector<8x96xf32>
    %355 = tpu.matmul %337, %1, %cst_93 {dimension_numbers = #tpu.dot_dimension_numbers<[1], [0], [0], [1], [0, 0, 1, 1], [], []>} : vector<8x32xf32>, vector<32x96xf32>, vector<8x96xf32> -> vector<8x96xf32>
    %356 = vector.extract_strided_slice %354 {offsets = [0, 0], sizes = [8, 32], strides = [1, 1]} : vector<8x96xf32> to vector<8x32xf32>
    %357 = vector.extract_strided_slice %355 {offsets = [0, 0], sizes = [8, 32], strides = [1, 1]} : vector<8x96xf32> to vector<8x32xf32>
    %358 = arith.addf %356, %357 : vector<8x32xf32>
    %359 = arith.negf %358 : vector<8x32xf32>
    %360 = math.exp %359 : vector<8x32xf32>
    %cst_94 = arith.constant 1.000000e+00 : f32
    %361 = vector.broadcast %cst_94 : f32 to vector<8x32xf32>
    %362 = arith.addf %361, %360 : vector<8x32xf32>
    %363 = arith.divf %361, %362 : vector<8x32xf32>
    %364 = vector.extract_strided_slice %354 {offsets = [0, 32], sizes = [8, 32], strides = [1, 1]} : vector<8x96xf32> to vector<8x32xf32>
    %365 = vector.extract_strided_slice %355 {offsets = [0, 32], sizes = [8, 32], strides = [1, 1]} : vector<8x96xf32> to vector<8x32xf32>
    %366 = arith.addf %364, %365 : vector<8x32xf32>
    %367 = arith.negf %366 : vector<8x32xf32>
    %368 = math.exp %367 : vector<8x32xf32>
    %cst_95 = arith.constant 1.000000e+00 : f32
    %369 = vector.broadcast %cst_95 : f32 to vector<8x32xf32>
    %370 = arith.addf %369, %368 : vector<8x32xf32>
    %371 = arith.divf %369, %370 : vector<8x32xf32>
    %372 = vector.extract_strided_slice %354 {offsets = [0, 64], sizes = [8, 32], strides = [1, 1]} : vector<8x96xf32> to vector<8x32xf32>
    %373 = vector.extract_strided_slice %355 {offsets = [0, 64], sizes = [8, 32], strides = [1, 1]} : vector<8x96xf32> to vector<8x32xf32>
    %374 = vector.broadcast %3 : vector<1x32xf32> to vector<8x32xf32>
    %375 = arith.addf %373, %374 : vector<8x32xf32>
    %376 = arith.mulf %363, %375 : vector<8x32xf32>
    %377 = arith.addf %372, %376 : vector<8x32xf32>
    %378 = math.tanh %377 : vector<8x32xf32>
    %cst_96 = arith.constant 1.000000e+00 : f32
    %379 = vector.broadcast %cst_96 : f32 to vector<8x32xf32>
    %380 = arith.subf %379, %371 : vector<8x32xf32>
    %381 = arith.mulf %380, %378 : vector<8x32xf32>
    %382 = arith.mulf %371, %337 : vector<8x32xf32>
    %383 = arith.addf %381, %382 : vector<8x32xf32>
    %384 = arith.index_cast %351 : i32 to index
    %c0_97 = arith.constant 0 : index
    %c0_98 = arith.constant 0 : index
    %385 = vector.load %arg22[%384, %c0_97, %c0_98] : memref<8x8x96xf32, #tpu.memory_space<vmem>>, vector<1x8x96xf32>
    %386 = vector.shape_cast %385 : vector<1x8x96xf32> to vector<8x96xf32>
    %cst_99 = arith.constant dense<0.000000e+00> : vector<8x96xf32>
    %387 = tpu.matmul %342, %2, %cst_99 {dimension_numbers = #tpu.dot_dimension_numbers<[1], [0], [0], [1], [0, 0, 1, 1], [], []>} : vector<8x32xf32>, vector<32x96xf32>, vector<8x96xf32> -> vector<8x96xf32>
    %388 = vector.extract_strided_slice %386 {offsets = [0, 0], sizes = [8, 32], strides = [1, 1]} : vector<8x96xf32> to vector<8x32xf32>
    %389 = vector.extract_strided_slice %387 {offsets = [0, 0], sizes = [8, 32], strides = [1, 1]} : vector<8x96xf32> to vector<8x32xf32>
    %390 = arith.addf %388, %389 : vector<8x32xf32>
    %391 = arith.negf %390 : vector<8x32xf32>
    %392 = math.exp %391 : vector<8x32xf32>
    %cst_100 = arith.constant 1.000000e+00 : f32
    %393 = vector.broadcast %cst_100 : f32 to vector<8x32xf32>
    %394 = arith.addf %393, %392 : vector<8x32xf32>
    %395 = arith.divf %393, %394 : vector<8x32xf32>
    %396 = vector.extract_strided_slice %386 {offsets = [0, 32], sizes = [8, 32], strides = [1, 1]} : vector<8x96xf32> to vector<8x32xf32>
    %397 = vector.extract_strided_slice %387 {offsets = [0, 32], sizes = [8, 32], strides = [1, 1]} : vector<8x96xf32> to vector<8x32xf32>
    %398 = arith.addf %396, %397 : vector<8x32xf32>
    %399 = arith.negf %398 : vector<8x32xf32>
    %400 = math.exp %399 : vector<8x32xf32>
    %cst_101 = arith.constant 1.000000e+00 : f32
    %401 = vector.broadcast %cst_101 : f32 to vector<8x32xf32>
    %402 = arith.addf %401, %400 : vector<8x32xf32>
    %403 = arith.divf %401, %402 : vector<8x32xf32>
    %404 = vector.extract_strided_slice %386 {offsets = [0, 64], sizes = [8, 32], strides = [1, 1]} : vector<8x96xf32> to vector<8x32xf32>
    %405 = vector.extract_strided_slice %387 {offsets = [0, 64], sizes = [8, 32], strides = [1, 1]} : vector<8x96xf32> to vector<8x32xf32>
    %406 = vector.broadcast %4 : vector<1x32xf32> to vector<8x32xf32>
    %407 = arith.addf %405, %406 : vector<8x32xf32>
    %408 = arith.mulf %395, %407 : vector<8x32xf32>
    %409 = arith.addf %404, %408 : vector<8x32xf32>
    %410 = math.tanh %409 : vector<8x32xf32>
    %cst_102 = arith.constant 1.000000e+00 : f32
    %411 = vector.broadcast %cst_102 : f32 to vector<8x32xf32>
    %412 = arith.subf %411, %403 : vector<8x32xf32>
    %413 = arith.mulf %412, %410 : vector<8x32xf32>
    %414 = arith.mulf %403, %342 : vector<8x32xf32>
    %415 = arith.addf %413, %414 : vector<8x32xf32>
    %416 = vector.broadcast %c4_i32 : i32 to vector<8x1xi32>
    %417 = arith.cmpi sgt, %0, %416 : vector<8x1xi32>
    %418 = vector.shape_cast %417 : vector<8x1xi1> to vector<8x1xi1>
    %419 = vector.broadcast %418 : vector<8x1xi1> to vector<8x32xi1>
    %420 = arith.select %419, %383, %337 : vector<8x32xi1>, vector<8x32xf32>
    %421 = vector.broadcast %351 : i32 to vector<8x1xi32>
    %422 = arith.cmpi sgt, %0, %421 : vector<8x1xi32>
    %423 = vector.shape_cast %422 : vector<8x1xi1> to vector<8x1xi1>
    %424 = vector.broadcast %423 : vector<8x1xi1> to vector<8x32xi1>
    %425 = arith.select %424, %415, %342 : vector<8x32xi1>, vector<8x32xf32>
    %426 = arith.index_cast %c4_i32 : i32 to index
    %c0_103 = arith.constant 0 : index
    %c0_104 = arith.constant 0 : index
    %427 = vector.load %arg19[%426, %c0_103, %c0_104] : memref<8x8x32xf32, #tpu.memory_space<vmem>>, vector<1x8x32xf32>
    %428 = vector.shape_cast %427 : vector<1x8x32xf32> to vector<8x32xf32>
    %429 = vector.shape_cast %420 : vector<8x32xf32> to vector<1x8x32xf32>
    tpu.vector_store %arg19[%426, %c0_103, %c0_104], %429 {strides = array<i32>} : memref<8x8x32xf32, #tpu.memory_space<vmem>>, vector<1x8x32xf32>,
    %430 = arith.index_cast %351 : i32 to index
    %c0_105 = arith.constant 0 : index
    %c0_106 = arith.constant 0 : index
    %431 = vector.load %arg20[%430, %c0_105, %c0_106] : memref<8x8x32xf32, #tpu.memory_space<vmem>>, vector<1x8x32xf32>
    %432 = vector.shape_cast %431 : vector<1x8x32xf32> to vector<8x32xf32>
    %433 = vector.shape_cast %425 : vector<8x32xf32> to vector<1x8x32xf32>
    tpu.vector_store %arg20[%430, %c0_105, %c0_106], %433 {strides = array<i32>} : memref<8x8x32xf32, #tpu.memory_space<vmem>>, vector<1x8x32xf32>,
    %c5_i32 = arith.constant 5 : i32
    %c7_i32_107 = arith.constant 7 : i32
    %434 = arith.subi %c7_i32_107, %c5_i32 : i32
    %435 = arith.index_cast %c5_i32 : i32 to index
    %c0_108 = arith.constant 0 : index
    %c0_109 = arith.constant 0 : index
    %436 = vector.load %arg21[%435, %c0_108, %c0_109] : memref<8x8x96xf32, #tpu.memory_space<vmem>>, vector<1x8x96xf32>
    %437 = vector.shape_cast %436 : vector<1x8x96xf32> to vector<8x96xf32>
    %cst_110 = arith.constant dense<0.000000e+00> : vector<8x96xf32>
    %438 = tpu.matmul %420, %1, %cst_110 {dimension_numbers = #tpu.dot_dimension_numbers<[1], [0], [0], [1], [0, 0, 1, 1], [], []>} : vector<8x32xf32>, vector<32x96xf32>, vector<8x96xf32> -> vector<8x96xf32>
    %439 = vector.extract_strided_slice %437 {offsets = [0, 0], sizes = [8, 32], strides = [1, 1]} : vector<8x96xf32> to vector<8x32xf32>
    %440 = vector.extract_strided_slice %438 {offsets = [0, 0], sizes = [8, 32], strides = [1, 1]} : vector<8x96xf32> to vector<8x32xf32>
    %441 = arith.addf %439, %440 : vector<8x32xf32>
    %442 = arith.negf %441 : vector<8x32xf32>
    %443 = math.exp %442 : vector<8x32xf32>
    %cst_111 = arith.constant 1.000000e+00 : f32
    %444 = vector.broadcast %cst_111 : f32 to vector<8x32xf32>
    %445 = arith.addf %444, %443 : vector<8x32xf32>
    %446 = arith.divf %444, %445 : vector<8x32xf32>
    %447 = vector.extract_strided_slice %437 {offsets = [0, 32], sizes = [8, 32], strides = [1, 1]} : vector<8x96xf32> to vector<8x32xf32>
    %448 = vector.extract_strided_slice %438 {offsets = [0, 32], sizes = [8, 32], strides = [1, 1]} : vector<8x96xf32> to vector<8x32xf32>
    %449 = arith.addf %447, %448 : vector<8x32xf32>
    %450 = arith.negf %449 : vector<8x32xf32>
    %451 = math.exp %450 : vector<8x32xf32>
    %cst_112 = arith.constant 1.000000e+00 : f32
    %452 = vector.broadcast %cst_112 : f32 to vector<8x32xf32>
    %453 = arith.addf %452, %451 : vector<8x32xf32>
    %454 = arith.divf %452, %453 : vector<8x32xf32>
    %455 = vector.extract_strided_slice %437 {offsets = [0, 64], sizes = [8, 32], strides = [1, 1]} : vector<8x96xf32> to vector<8x32xf32>
    %456 = vector.extract_strided_slice %438 {offsets = [0, 64], sizes = [8, 32], strides = [1, 1]} : vector<8x96xf32> to vector<8x32xf32>
    %457 = vector.broadcast %3 : vector<1x32xf32> to vector<8x32xf32>
    %458 = arith.addf %456, %457 : vector<8x32xf32>
    %459 = arith.mulf %446, %458 : vector<8x32xf32>
    %460 = arith.addf %455, %459 : vector<8x32xf32>
    %461 = math.tanh %460 : vector<8x32xf32>
    %cst_113 = arith.constant 1.000000e+00 : f32
    %462 = vector.broadcast %cst_113 : f32 to vector<8x32xf32>
    %463 = arith.subf %462, %454 : vector<8x32xf32>
    %464 = arith.mulf %463, %461 : vector<8x32xf32>
    %465 = arith.mulf %454, %420 : vector<8x32xf32>
    %466 = arith.addf %464, %465 : vector<8x32xf32>
    %467 = arith.index_cast %434 : i32 to index
    %c0_114 = arith.constant 0 : index
    %c0_115 = arith.constant 0 : index
    %468 = vector.load %arg22[%467, %c0_114, %c0_115] : memref<8x8x96xf32, #tpu.memory_space<vmem>>, vector<1x8x96xf32>
    %469 = vector.shape_cast %468 : vector<1x8x96xf32> to vector<8x96xf32>
    %cst_116 = arith.constant dense<0.000000e+00> : vector<8x96xf32>
    %470 = tpu.matmul %425, %2, %cst_116 {dimension_numbers = #tpu.dot_dimension_numbers<[1], [0], [0], [1], [0, 0, 1, 1], [], []>} : vector<8x32xf32>, vector<32x96xf32>, vector<8x96xf32> -> vector<8x96xf32>
    %471 = vector.extract_strided_slice %469 {offsets = [0, 0], sizes = [8, 32], strides = [1, 1]} : vector<8x96xf32> to vector<8x32xf32>
    %472 = vector.extract_strided_slice %470 {offsets = [0, 0], sizes = [8, 32], strides = [1, 1]} : vector<8x96xf32> to vector<8x32xf32>
    %473 = arith.addf %471, %472 : vector<8x32xf32>
    %474 = arith.negf %473 : vector<8x32xf32>
    %475 = math.exp %474 : vector<8x32xf32>
    %cst_117 = arith.constant 1.000000e+00 : f32
    %476 = vector.broadcast %cst_117 : f32 to vector<8x32xf32>
    %477 = arith.addf %476, %475 : vector<8x32xf32>
    %478 = arith.divf %476, %477 : vector<8x32xf32>
    %479 = vector.extract_strided_slice %469 {offsets = [0, 32], sizes = [8, 32], strides = [1, 1]} : vector<8x96xf32> to vector<8x32xf32>
    %480 = vector.extract_strided_slice %470 {offsets = [0, 32], sizes = [8, 32], strides = [1, 1]} : vector<8x96xf32> to vector<8x32xf32>
    %481 = arith.addf %479, %480 : vector<8x32xf32>
    %482 = arith.negf %481 : vector<8x32xf32>
    %483 = math.exp %482 : vector<8x32xf32>
    %cst_118 = arith.constant 1.000000e+00 : f32
    %484 = vector.broadcast %cst_118 : f32 to vector<8x32xf32>
    %485 = arith.addf %484, %483 : vector<8x32xf32>
    %486 = arith.divf %484, %485 : vector<8x32xf32>
    %487 = vector.extract_strided_slice %469 {offsets = [0, 64], sizes = [8, 32], strides = [1, 1]} : vector<8x96xf32> to vector<8x32xf32>
    %488 = vector.extract_strided_slice %470 {offsets = [0, 64], sizes = [8, 32], strides = [1, 1]} : vector<8x96xf32> to vector<8x32xf32>
    %489 = vector.broadcast %4 : vector<1x32xf32> to vector<8x32xf32>
    %490 = arith.addf %488, %489 : vector<8x32xf32>
    %491 = arith.mulf %478, %490 : vector<8x32xf32>
    %492 = arith.addf %487, %491 : vector<8x32xf32>
    %493 = math.tanh %492 : vector<8x32xf32>
    %cst_119 = arith.constant 1.000000e+00 : f32
    %494 = vector.broadcast %cst_119 : f32 to vector<8x32xf32>
    %495 = arith.subf %494, %486 : vector<8x32xf32>
    %496 = arith.mulf %495, %493 : vector<8x32xf32>
    %497 = arith.mulf %486, %425 : vector<8x32xf32>
    %498 = arith.addf %496, %497 : vector<8x32xf32>
    %499 = vector.broadcast %c5_i32 : i32 to vector<8x1xi32>
    %500 = arith.cmpi sgt, %0, %499 : vector<8x1xi32>
    %501 = vector.shape_cast %500 : vector<8x1xi1> to vector<8x1xi1>
    %502 = vector.broadcast %501 : vector<8x1xi1> to vector<8x32xi1>
    %503 = arith.select %502, %466, %420 : vector<8x32xi1>, vector<8x32xf32>
    %504 = vector.broadcast %434 : i32 to vector<8x1xi32>
    %505 = arith.cmpi sgt, %0, %504 : vector<8x1xi32>
    %506 = vector.shape_cast %505 : vector<8x1xi1> to vector<8x1xi1>
    %507 = vector.broadcast %506 : vector<8x1xi1> to vector<8x32xi1>
    %508 = arith.select %507, %498, %425 : vector<8x32xi1>, vector<8x32xf32>
    %509 = arith.index_cast %c5_i32 : i32 to index
    %c0_120 = arith.constant 0 : index
    %c0_121 = arith.constant 0 : index
    %510 = vector.load %arg19[%509, %c0_120, %c0_121] : memref<8x8x32xf32, #tpu.memory_space<vmem>>, vector<1x8x32xf32>
    %511 = vector.shape_cast %510 : vector<1x8x32xf32> to vector<8x32xf32>
    %512 = vector.shape_cast %503 : vector<8x32xf32> to vector<1x8x32xf32>
    tpu.vector_store %arg19[%509, %c0_120, %c0_121], %512 {strides = array<i32>} : memref<8x8x32xf32, #tpu.memory_space<vmem>>, vector<1x8x32xf32>,
    %513 = arith.index_cast %434 : i32 to index
    %c0_122 = arith.constant 0 : index
    %c0_123 = arith.constant 0 : index
    %514 = vector.load %arg20[%513, %c0_122, %c0_123] : memref<8x8x32xf32, #tpu.memory_space<vmem>>, vector<1x8x32xf32>
    %515 = vector.shape_cast %514 : vector<1x8x32xf32> to vector<8x32xf32>
    %516 = vector.shape_cast %508 : vector<8x32xf32> to vector<1x8x32xf32>
    tpu.vector_store %arg20[%513, %c0_122, %c0_123], %516 {strides = array<i32>} : memref<8x8x32xf32, #tpu.memory_space<vmem>>, vector<1x8x32xf32>,
    %c6_i32 = arith.constant 6 : i32
    %c7_i32_124 = arith.constant 7 : i32
    %517 = arith.subi %c7_i32_124, %c6_i32 : i32
    %518 = arith.index_cast %c6_i32 : i32 to index
    %c0_125 = arith.constant 0 : index
    %c0_126 = arith.constant 0 : index
    %519 = vector.load %arg21[%518, %c0_125, %c0_126] : memref<8x8x96xf32, #tpu.memory_space<vmem>>, vector<1x8x96xf32>
    %520 = vector.shape_cast %519 : vector<1x8x96xf32> to vector<8x96xf32>
    %cst_127 = arith.constant dense<0.000000e+00> : vector<8x96xf32>
    %521 = tpu.matmul %503, %1, %cst_127 {dimension_numbers = #tpu.dot_dimension_numbers<[1], [0], [0], [1], [0, 0, 1, 1], [], []>} : vector<8x32xf32>, vector<32x96xf32>, vector<8x96xf32> -> vector<8x96xf32>
    %522 = vector.extract_strided_slice %520 {offsets = [0, 0], sizes = [8, 32], strides = [1, 1]} : vector<8x96xf32> to vector<8x32xf32>
    %523 = vector.extract_strided_slice %521 {offsets = [0, 0], sizes = [8, 32], strides = [1, 1]} : vector<8x96xf32> to vector<8x32xf32>
    %524 = arith.addf %522, %523 : vector<8x32xf32>
    %525 = arith.negf %524 : vector<8x32xf32>
    %526 = math.exp %525 : vector<8x32xf32>
    %cst_128 = arith.constant 1.000000e+00 : f32
    %527 = vector.broadcast %cst_128 : f32 to vector<8x32xf32>
    %528 = arith.addf %527, %526 : vector<8x32xf32>
    %529 = arith.divf %527, %528 : vector<8x32xf32>
    %530 = vector.extract_strided_slice %520 {offsets = [0, 32], sizes = [8, 32], strides = [1, 1]} : vector<8x96xf32> to vector<8x32xf32>
    %531 = vector.extract_strided_slice %521 {offsets = [0, 32], sizes = [8, 32], strides = [1, 1]} : vector<8x96xf32> to vector<8x32xf32>
    %532 = arith.addf %530, %531 : vector<8x32xf32>
    %533 = arith.negf %532 : vector<8x32xf32>
    %534 = math.exp %533 : vector<8x32xf32>
    %cst_129 = arith.constant 1.000000e+00 : f32
    %535 = vector.broadcast %cst_129 : f32 to vector<8x32xf32>
    %536 = arith.addf %535, %534 : vector<8x32xf32>
    %537 = arith.divf %535, %536 : vector<8x32xf32>
    %538 = vector.extract_strided_slice %520 {offsets = [0, 64], sizes = [8, 32], strides = [1, 1]} : vector<8x96xf32> to vector<8x32xf32>
    %539 = vector.extract_strided_slice %521 {offsets = [0, 64], sizes = [8, 32], strides = [1, 1]} : vector<8x96xf32> to vector<8x32xf32>
    %540 = vector.broadcast %3 : vector<1x32xf32> to vector<8x32xf32>
    %541 = arith.addf %539, %540 : vector<8x32xf32>
    %542 = arith.mulf %529, %541 : vector<8x32xf32>
    %543 = arith.addf %538, %542 : vector<8x32xf32>
    %544 = math.tanh %543 : vector<8x32xf32>
    %cst_130 = arith.constant 1.000000e+00 : f32
    %545 = vector.broadcast %cst_130 : f32 to vector<8x32xf32>
    %546 = arith.subf %545, %537 : vector<8x32xf32>
    %547 = arith.mulf %546, %544 : vector<8x32xf32>
    %548 = arith.mulf %537, %503 : vector<8x32xf32>
    %549 = arith.addf %547, %548 : vector<8x32xf32>
    %550 = arith.index_cast %517 : i32 to index
    %c0_131 = arith.constant 0 : index
    %c0_132 = arith.constant 0 : index
    %551 = vector.load %arg22[%550, %c0_131, %c0_132] : memref<8x8x96xf32, #tpu.memory_space<vmem>>, vector<1x8x96xf32>
    %552 = vector.shape_cast %551 : vector<1x8x96xf32> to vector<8x96xf32>
    %cst_133 = arith.constant dense<0.000000e+00> : vector<8x96xf32>
    %553 = tpu.matmul %508, %2, %cst_133 {dimension_numbers = #tpu.dot_dimension_numbers<[1], [0], [0], [1], [0, 0, 1, 1], [], []>} : vector<8x32xf32>, vector<32x96xf32>, vector<8x96xf32> -> vector<8x96xf32>
    %554 = vector.extract_strided_slice %552 {offsets = [0, 0], sizes = [8, 32], strides = [1, 1]} : vector<8x96xf32> to vector<8x32xf32>
    %555 = vector.extract_strided_slice %553 {offsets = [0, 0], sizes = [8, 32], strides = [1, 1]} : vector<8x96xf32> to vector<8x32xf32>
    %556 = arith.addf %554, %555 : vector<8x32xf32>
    %557 = arith.negf %556 : vector<8x32xf32>
    %558 = math.exp %557 : vector<8x32xf32>
    %cst_134 = arith.constant 1.000000e+00 : f32
    %559 = vector.broadcast %cst_134 : f32 to vector<8x32xf32>
    %560 = arith.addf %559, %558 : vector<8x32xf32>
    %561 = arith.divf %559, %560 : vector<8x32xf32>
    %562 = vector.extract_strided_slice %552 {offsets = [0, 32], sizes = [8, 32], strides = [1, 1]} : vector<8x96xf32> to vector<8x32xf32>
    %563 = vector.extract_strided_slice %553 {offsets = [0, 32], sizes = [8, 32], strides = [1, 1]} : vector<8x96xf32> to vector<8x32xf32>
    %564 = arith.addf %562, %563 : vector<8x32xf32>
    %565 = arith.negf %564 : vector<8x32xf32>
    %566 = math.exp %565 : vector<8x32xf32>
    %cst_135 = arith.constant 1.000000e+00 : f32
    %567 = vector.broadcast %cst_135 : f32 to vector<8x32xf32>
    %568 = arith.addf %567, %566 : vector<8x32xf32>
    %569 = arith.divf %567, %568 : vector<8x32xf32>
    %570 = vector.extract_strided_slice %552 {offsets = [0, 64], sizes = [8, 32], strides = [1, 1]} : vector<8x96xf32> to vector<8x32xf32>
    %571 = vector.extract_strided_slice %553 {offsets = [0, 64], sizes = [8, 32], strides = [1, 1]} : vector<8x96xf32> to vector<8x32xf32>
    %572 = vector.broadcast %4 : vector<1x32xf32> to vector<8x32xf32>
    %573 = arith.addf %571, %572 : vector<8x32xf32>
    %574 = arith.mulf %561, %573 : vector<8x32xf32>
    %575 = arith.addf %570, %574 : vector<8x32xf32>
    %576 = math.tanh %575 : vector<8x32xf32>
    %cst_136 = arith.constant 1.000000e+00 : f32
    %577 = vector.broadcast %cst_136 : f32 to vector<8x32xf32>
    %578 = arith.subf %577, %569 : vector<8x32xf32>
    %579 = arith.mulf %578, %576 : vector<8x32xf32>
    %580 = arith.mulf %569, %508 : vector<8x32xf32>
    %581 = arith.addf %579, %580 : vector<8x32xf32>
    %582 = vector.broadcast %c6_i32 : i32 to vector<8x1xi32>
    %583 = arith.cmpi sgt, %0, %582 : vector<8x1xi32>
    %584 = vector.shape_cast %583 : vector<8x1xi1> to vector<8x1xi1>
    %585 = vector.broadcast %584 : vector<8x1xi1> to vector<8x32xi1>
    %586 = arith.select %585, %549, %503 : vector<8x32xi1>, vector<8x32xf32>
    %587 = vector.broadcast %517 : i32 to vector<8x1xi32>
    %588 = arith.cmpi sgt, %0, %587 : vector<8x1xi32>
    %589 = vector.shape_cast %588 : vector<8x1xi1> to vector<8x1xi1>
    %590 = vector.broadcast %589 : vector<8x1xi1> to vector<8x32xi1>
    %591 = arith.select %590, %581, %508 : vector<8x32xi1>, vector<8x32xf32>
    %592 = arith.index_cast %c6_i32 : i32 to index
    %c0_137 = arith.constant 0 : index
    %c0_138 = arith.constant 0 : index
    %593 = vector.load %arg19[%592, %c0_137, %c0_138] : memref<8x8x32xf32, #tpu.memory_space<vmem>>, vector<1x8x32xf32>
    %594 = vector.shape_cast %593 : vector<1x8x32xf32> to vector<8x32xf32>
    %595 = vector.shape_cast %586 : vector<8x32xf32> to vector<1x8x32xf32>
    tpu.vector_store %arg19[%592, %c0_137, %c0_138], %595 {strides = array<i32>} : memref<8x8x32xf32, #tpu.memory_space<vmem>>, vector<1x8x32xf32>,
    %596 = arith.index_cast %517 : i32 to index
    %c0_139 = arith.constant 0 : index
    %c0_140 = arith.constant 0 : index
    %597 = vector.load %arg20[%596, %c0_139, %c0_140] : memref<8x8x32xf32, #tpu.memory_space<vmem>>, vector<1x8x32xf32>
    %598 = vector.shape_cast %597 : vector<1x8x32xf32> to vector<8x32xf32>
    %599 = vector.shape_cast %591 : vector<8x32xf32> to vector<1x8x32xf32>
    tpu.vector_store %arg20[%596, %c0_139, %c0_140], %599 {strides = array<i32>} : memref<8x8x32xf32, #tpu.memory_space<vmem>>, vector<1x8x32xf32>,
    %c7_i32_141 = arith.constant 7 : i32
    %c7_i32_142 = arith.constant 7 : i32
    %600 = arith.subi %c7_i32_142, %c7_i32_141 : i32
    %601 = arith.index_cast %c7_i32_141 : i32 to index
    %c0_143 = arith.constant 0 : index
    %c0_144 = arith.constant 0 : index
    %602 = vector.load %arg21[%601, %c0_143, %c0_144] : memref<8x8x96xf32, #tpu.memory_space<vmem>>, vector<1x8x96xf32>
    %603 = vector.shape_cast %602 : vector<1x8x96xf32> to vector<8x96xf32>
    %cst_145 = arith.constant dense<0.000000e+00> : vector<8x96xf32>
    %604 = tpu.matmul %586, %1, %cst_145 {dimension_numbers = #tpu.dot_dimension_numbers<[1], [0], [0], [1], [0, 0, 1, 1], [], []>} : vector<8x32xf32>, vector<32x96xf32>, vector<8x96xf32> -> vector<8x96xf32>
    %605 = vector.extract_strided_slice %603 {offsets = [0, 0], sizes = [8, 32], strides = [1, 1]} : vector<8x96xf32> to vector<8x32xf32>
    %606 = vector.extract_strided_slice %604 {offsets = [0, 0], sizes = [8, 32], strides = [1, 1]} : vector<8x96xf32> to vector<8x32xf32>
    %607 = arith.addf %605, %606 : vector<8x32xf32>
    %608 = arith.negf %607 : vector<8x32xf32>
    %609 = math.exp %608 : vector<8x32xf32>
    %cst_146 = arith.constant 1.000000e+00 : f32
    %610 = vector.broadcast %cst_146 : f32 to vector<8x32xf32>
    %611 = arith.addf %610, %609 : vector<8x32xf32>
    %612 = arith.divf %610, %611 : vector<8x32xf32>
    %613 = vector.extract_strided_slice %603 {offsets = [0, 32], sizes = [8, 32], strides = [1, 1]} : vector<8x96xf32> to vector<8x32xf32>
    %614 = vector.extract_strided_slice %604 {offsets = [0, 32], sizes = [8, 32], strides = [1, 1]} : vector<8x96xf32> to vector<8x32xf32>
    %615 = arith.addf %613, %614 : vector<8x32xf32>
    %616 = arith.negf %615 : vector<8x32xf32>
    %617 = math.exp %616 : vector<8x32xf32>
    %cst_147 = arith.constant 1.000000e+00 : f32
    %618 = vector.broadcast %cst_147 : f32 to vector<8x32xf32>
    %619 = arith.addf %618, %617 : vector<8x32xf32>
    %620 = arith.divf %618, %619 : vector<8x32xf32>
    %621 = vector.extract_strided_slice %603 {offsets = [0, 64], sizes = [8, 32], strides = [1, 1]} : vector<8x96xf32> to vector<8x32xf32>
    %622 = vector.extract_strided_slice %604 {offsets = [0, 64], sizes = [8, 32], strides = [1, 1]} : vector<8x96xf32> to vector<8x32xf32>
    %623 = vector.broadcast %3 : vector<1x32xf32> to vector<8x32xf32>
    %624 = arith.addf %622, %623 : vector<8x32xf32>
    %625 = arith.mulf %612, %624 : vector<8x32xf32>
    %626 = arith.addf %621, %625 : vector<8x32xf32>
    %627 = math.tanh %626 : vector<8x32xf32>
    %cst_148 = arith.constant 1.000000e+00 : f32
    %628 = vector.broadcast %cst_148 : f32 to vector<8x32xf32>
    %629 = arith.subf %628, %620 : vector<8x32xf32>
    %630 = arith.mulf %629, %627 : vector<8x32xf32>
    %631 = arith.mulf %620, %586 : vector<8x32xf32>
    %632 = arith.addf %630, %631 : vector<8x32xf32>
    %633 = arith.index_cast %600 : i32 to index
    %c0_149 = arith.constant 0 : index
    %c0_150 = arith.constant 0 : index
    %634 = vector.load %arg22[%633, %c0_149, %c0_150] : memref<8x8x96xf32, #tpu.memory_space<vmem>>, vector<1x8x96xf32>
    %635 = vector.shape_cast %634 : vector<1x8x96xf32> to vector<8x96xf32>
    %cst_151 = arith.constant dense<0.000000e+00> : vector<8x96xf32>
    %636 = tpu.matmul %591, %2, %cst_151 {dimension_numbers = #tpu.dot_dimension_numbers<[1], [0], [0], [1], [0, 0, 1, 1], [], []>} : vector<8x32xf32>, vector<32x96xf32>, vector<8x96xf32> -> vector<8x96xf32>
    %637 = vector.extract_strided_slice %635 {offsets = [0, 0], sizes = [8, 32], strides = [1, 1]} : vector<8x96xf32> to vector<8x32xf32>
    %638 = vector.extract_strided_slice %636 {offsets = [0, 0], sizes = [8, 32], strides = [1, 1]} : vector<8x96xf32> to vector<8x32xf32>
    %639 = arith.addf %637, %638 : vector<8x32xf32>
    %640 = arith.negf %639 : vector<8x32xf32>
    %641 = math.exp %640 : vector<8x32xf32>
    %cst_152 = arith.constant 1.000000e+00 : f32
    %642 = vector.broadcast %cst_152 : f32 to vector<8x32xf32>
    %643 = arith.addf %642, %641 : vector<8x32xf32>
    %644 = arith.divf %642, %643 : vector<8x32xf32>
    %645 = vector.extract_strided_slice %635 {offsets = [0, 32], sizes = [8, 32], strides = [1, 1]} : vector<8x96xf32> to vector<8x32xf32>
    %646 = vector.extract_strided_slice %636 {offsets = [0, 32], sizes = [8, 32], strides = [1, 1]} : vector<8x96xf32> to vector<8x32xf32>
    %647 = arith.addf %645, %646 : vector<8x32xf32>
    %648 = arith.negf %647 : vector<8x32xf32>
    %649 = math.exp %648 : vector<8x32xf32>
    %cst_153 = arith.constant 1.000000e+00 : f32
    %650 = vector.broadcast %cst_153 : f32 to vector<8x32xf32>
    %651 = arith.addf %650, %649 : vector<8x32xf32>
    %652 = arith.divf %650, %651 : vector<8x32xf32>
    %653 = vector.extract_strided_slice %635 {offsets = [0, 64], sizes = [8, 32], strides = [1, 1]} : vector<8x96xf32> to vector<8x32xf32>
    %654 = vector.extract_strided_slice %636 {offsets = [0, 64], sizes = [8, 32], strides = [1, 1]} : vector<8x96xf32> to vector<8x32xf32>
    %655 = vector.broadcast %4 : vector<1x32xf32> to vector<8x32xf32>
    %656 = arith.addf %654, %655 : vector<8x32xf32>
    %657 = arith.mulf %644, %656 : vector<8x32xf32>
    %658 = arith.addf %653, %657 : vector<8x32xf32>
    %659 = math.tanh %658 : vector<8x32xf32>
    %cst_154 = arith.constant 1.000000e+00 : f32
    %660 = vector.broadcast %cst_154 : f32 to vector<8x32xf32>
    %661 = arith.subf %660, %652 : vector<8x32xf32>
    %662 = arith.mulf %661, %659 : vector<8x32xf32>
    %663 = arith.mulf %652, %591 : vector<8x32xf32>
    %664 = arith.addf %662, %663 : vector<8x32xf32>
    %665 = vector.broadcast %c7_i32_141 : i32 to vector<8x1xi32>
    %666 = arith.cmpi sgt, %0, %665 : vector<8x1xi32>
    %667 = vector.shape_cast %666 : vector<8x1xi1> to vector<8x1xi1>
    %668 = vector.broadcast %667 : vector<8x1xi1> to vector<8x32xi1>
    %669 = arith.select %668, %632, %586 : vector<8x32xi1>, vector<8x32xf32>
    %670 = vector.broadcast %600 : i32 to vector<8x1xi32>
    %671 = arith.cmpi sgt, %0, %670 : vector<8x1xi32>
    %672 = vector.shape_cast %671 : vector<8x1xi1> to vector<8x1xi1>
    %673 = vector.broadcast %672 : vector<8x1xi1> to vector<8x32xi1>
    %674 = arith.select %673, %664, %591 : vector<8x32xi1>, vector<8x32xf32>
    %675 = arith.index_cast %c7_i32_141 : i32 to index
    %c0_155 = arith.constant 0 : index
    %c0_156 = arith.constant 0 : index
    %676 = vector.load %arg19[%675, %c0_155, %c0_156] : memref<8x8x32xf32, #tpu.memory_space<vmem>>, vector<1x8x32xf32>
    %677 = vector.shape_cast %676 : vector<1x8x32xf32> to vector<8x32xf32>
    %678 = vector.shape_cast %669 : vector<8x32xf32> to vector<1x8x32xf32>
    tpu.vector_store %arg19[%675, %c0_155, %c0_156], %678 {strides = array<i32>} : memref<8x8x32xf32, #tpu.memory_space<vmem>>, vector<1x8x32xf32>,
    %679 = arith.index_cast %600 : i32 to index
    %c0_157 = arith.constant 0 : index
    %c0_158 = arith.constant 0 : index
    %680 = vector.load %arg20[%679, %c0_157, %c0_158] : memref<8x8x32xf32, #tpu.memory_space<vmem>>, vector<1x8x32xf32>
    %681 = vector.shape_cast %680 : vector<1x8x32xf32> to vector<8x32xf32>
    %682 = vector.shape_cast %674 : vector<8x32xf32> to vector<1x8x32xf32>
    tpu.vector_store %arg20[%679, %c0_157, %c0_158], %682 {strides = array<i32>} : memref<8x8x32xf32, #tpu.memory_space<vmem>>, vector<1x8x32xf32>,
    %c8_i32 = arith.constant 8 : i32
    %c0_159 = arith.constant 0 : index
    %c0_160 = arith.constant 0 : index
    %c0_161 = arith.constant 0 : index
    %683 = vector.load %arg19[%c0_159, %c0_160, %c0_161] : memref<8x8x32xf32, #tpu.memory_space<vmem>>, vector<8x8x32xf32>
    %684 = vector.shape_cast %683 : vector<8x8x32xf32> to vector<64x32xf32>
    %c0_162 = arith.constant 0 : index
    %c0_163 = arith.constant 0 : index
    %c0_164 = arith.constant 0 : index
    %685 = vector.load %arg20[%c0_162, %c0_163, %c0_164] : memref<8x8x32xf32, #tpu.memory_space<vmem>>, vector<8x8x32xf32>
    %686 = vector.shape_cast %685 : vector<8x8x32xf32> to vector<64x32xf32>
    %cst_165 = arith.constant dense<0.000000e+00> : vector<64xf32>
    %687 = vector.multi_reduction <add>, %684, %cst_165 [1] : vector<64x32xf32> to vector<64xf32>
    %688 = vector.shape_cast %687 : vector<64xf32> to vector<64x1xf32>
    %cst_166 = arith.constant dense<0.000000e+00> : vector<64xf32>
    %689 = vector.multi_reduction <add>, %686, %cst_166 [1] : vector<64x32xf32> to vector<64xf32>
    %690 = vector.shape_cast %689 : vector<64xf32> to vector<64x1xf32>
    %691 = arith.addf %688, %690 : vector<64x1xf32>
    %cst_167 = arith.constant 1.562500e-02 : f32
    %692 = vector.broadcast %cst_167 : f32 to vector<64x1xf32>
    %693 = arith.mulf %691, %692 : vector<64x1xf32>
    %694 = vector.broadcast %693 : vector<64x1xf32> to vector<64x32xf32>
    %695 = arith.subf %684, %694 : vector<64x32xf32>
    %696 = vector.broadcast %693 : vector<64x1xf32> to vector<64x32xf32>
    %697 = arith.subf %686, %696 : vector<64x32xf32>
    %698 = arith.mulf %695, %695 : vector<64x32xf32>
    %cst_168 = arith.constant dense<0.000000e+00> : vector<64xf32>
    %699 = vector.multi_reduction <add>, %698, %cst_168 [1] : vector<64x32xf32> to vector<64xf32>
    %700 = vector.shape_cast %699 : vector<64xf32> to vector<64x1xf32>
    %701 = arith.mulf %697, %697 : vector<64x32xf32>
    %cst_169 = arith.constant dense<0.000000e+00> : vector<64xf32>
    %702 = vector.multi_reduction <add>, %701, %cst_169 [1] : vector<64x32xf32> to vector<64xf32>
    %703 = vector.shape_cast %702 : vector<64xf32> to vector<64x1xf32>
    %704 = arith.addf %700, %703 : vector<64x1xf32>
    %cst_170 = arith.constant 1.562500e-02 : f32
    %705 = vector.broadcast %cst_170 : f32 to vector<64x1xf32>
    %706 = arith.mulf %704, %705 : vector<64x1xf32>
    %cst_171 = arith.constant 9.99999974E-6 : f32
    %707 = vector.broadcast %cst_171 : f32 to vector<64x1xf32>
    %708 = arith.addf %706, %707 : vector<64x1xf32>
    %709 = math.rsqrt %708 : vector<64x1xf32>
    %710 = vector.broadcast %709 : vector<64x1xf32> to vector<64x32xf32>
    %711 = arith.mulf %695, %710 : vector<64x32xf32>
    %c0_172 = arith.constant 0 : index
    %c0_173 = arith.constant 0 : index
    %712 = vector.load %arg9[%c0_172, %c0_173] : memref<1x32xf32, #tpu.memory_space<vmem>>, vector<1x32xf32>
    %713 = vector.broadcast %712 : vector<1x32xf32> to vector<64x32xf32>
    %714 = arith.mulf %711, %713 : vector<64x32xf32>
    %c0_174 = arith.constant 0 : index
    %c0_175 = arith.constant 0 : index
    %715 = vector.load %arg11[%c0_174, %c0_175] : memref<1x32xf32, #tpu.memory_space<vmem>>, vector<1x32xf32>
    %716 = vector.broadcast %715 : vector<1x32xf32> to vector<64x32xf32>
    %717 = arith.addf %714, %716 : vector<64x32xf32>
    %718 = vector.broadcast %709 : vector<64x1xf32> to vector<64x32xf32>
    %719 = arith.mulf %697, %718 : vector<64x32xf32>
    %c0_176 = arith.constant 0 : index
    %c0_177 = arith.constant 0 : index
    %720 = vector.load %arg10[%c0_176, %c0_177] : memref<1x32xf32, #tpu.memory_space<vmem>>, vector<1x32xf32>
    %721 = vector.broadcast %720 : vector<1x32xf32> to vector<64x32xf32>
    %722 = arith.mulf %719, %721 : vector<64x32xf32>
    %c0_178 = arith.constant 0 : index
    %c0_179 = arith.constant 0 : index
    %723 = vector.load %arg12[%c0_178, %c0_179] : memref<1x32xf32, #tpu.memory_space<vmem>>, vector<1x32xf32>
    %724 = vector.broadcast %723 : vector<1x32xf32> to vector<64x32xf32>
    %725 = arith.addf %722, %724 : vector<64x32xf32>
    %c0_180 = arith.constant 0 : index
    %c0_181 = arith.constant 0 : index
    %726 = vector.load %arg13[%c0_180, %c0_181] : memref<32x64xf32, #tpu.memory_space<vmem>>, vector<32x64xf32>
    %cst_182 = arith.constant dense<0.000000e+00> : vector<64x64xf32>
    %727 = tpu.matmul %717, %726, %cst_182 {dimension_numbers = #tpu.dot_dimension_numbers<[1], [0], [0], [1], [0, 0, 1, 1], [], []>} : vector<64x32xf32>, vector<32x64xf32>, vector<64x64xf32> -> vector<64x64xf32>
    %c0_183 = arith.constant 0 : index
    %c0_184 = arith.constant 0 : index
    %728 = vector.load %arg14[%c0_183, %c0_184] : memref<32x64xf32, #tpu.memory_space<vmem>>, vector<32x64xf32>
    %cst_185 = arith.constant dense<0.000000e+00> : vector<64x64xf32>
    %729 = tpu.matmul %725, %728, %cst_185 {dimension_numbers = #tpu.dot_dimension_numbers<[1], [0], [0], [1], [0, 0, 1, 1], [], []>} : vector<64x32xf32>, vector<32x64xf32>, vector<64x64xf32> -> vector<64x64xf32>
    %730 = arith.addf %727, %729 : vector<64x64xf32>
    %c0_186 = arith.constant 0 : index
    %c0_187 = arith.constant 0 : index
    %731 = vector.load %arg15[%c0_186, %c0_187] : memref<1x64xf32, #tpu.memory_space<vmem>>, vector<1x64xf32>
    %732 = vector.broadcast %731 : vector<1x64xf32> to vector<64x64xf32>
    %733 = arith.addf %730, %732 : vector<64x64xf32>
    %734 = math.tanh %733 : vector<64x64xf32>
    %c0_188 = arith.constant 0 : index
    %c0_189 = arith.constant 0 : index
    %735 = vector.load %arg16[%c0_188, %c0_189] : memref<1x64xf32, #tpu.memory_space<vmem>>, vector<1x64xf32>
    %736 = vector.broadcast %735 : vector<1x64xf32> to vector<64x64xf32>
    %737 = arith.mulf %734, %736 : vector<64x64xf32>
    %738 = vector.shape_cast %737 : vector<64x64xf32> to vector<8x8x64xf32>
    %cst_190 = arith.constant dense<0.000000e+00> : vector<8x8xf32>
    %739 = vector.multi_reduction <add>, %738, %cst_190 [2] : vector<8x8x64xf32> to vector<8x8xf32>
    %740 = tpu.transpose %739, [1, 0] : vector<8x8xf32> -> vector<8x8xf32>
    %741 = tpu.iota {dimensions = array<i32: 1>} : vector<8x8xi32>
    %742 = vector.broadcast %0 : vector<8x1xi32> to vector<8x8xi32>
    %743 = arith.cmpi slt, %741, %742 : vector<8x8xi32>
    %744 = arith.extui %743 : vector<8x8xi1> to vector<8x8xi32>
    %745 = arith.sitofp %744 : vector<8x8xi32> to vector<8x8xf32>
    %cst_191 = arith.constant dense<0xFF800000> : vector<8xf32>
    %746 = vector.multi_reduction <maximumf>, %740, %cst_191 [1] : vector<8x8xf32> to vector<8xf32>
    %747 = vector.shape_cast %746 : vector<8xf32> to vector<8x1xf32>
    %748 = vector.broadcast %747 : vector<8x1xf32> to vector<8x8xf32>
    %749 = arith.subf %740, %748 : vector<8x8xf32>
    %750 = math.exp %749 : vector<8x8xf32>
    %751 = arith.mulf %750, %745 : vector<8x8xf32>
    %cst_192 = arith.constant dense<0.000000e+00> : vector<8xf32>
    %752 = vector.multi_reduction <add>, %751, %cst_192 [1] : vector<8x8xf32> to vector<8xf32>
    %753 = vector.shape_cast %752 : vector<8xf32> to vector<8x1xf32>
    %cst_193 = arith.constant 1.000000e-30 : f32
    %754 = vector.broadcast %cst_193 : f32 to vector<8x1xf32>
    %755 = arith.maximumf %753, %754 : vector<8x1xf32>
    %756 = vector.broadcast %755 : vector<8x1xf32> to vector<8x8xf32>
    %757 = arith.divf %751, %756 : vector<8x8xf32>
    %c0_194 = arith.constant 0 : index
    %c0_195 = arith.constant 0 : index
    %758 = vector.load %arg18[%c0_194, %c0_195] : memref<8x8xf32, #tpu.memory_space<vmem>>, vector<8x8xf32>
    tpu.vector_store %arg18[%c0_194, %c0_195], %757 {strides = array<i32>} : memref<8x8xf32, #tpu.memory_space<vmem>>, vector<8x8xf32>,
    %759 = tpu.transpose %757, [1, 0] : vector<8x8xf32> -> vector<8x8xf32>
    %760 = vector.shape_cast %759 : vector<8x8xf32> to vector<8x8x1xf32>
    %c0_196 = arith.constant 0 : index
    %c0_197 = arith.constant 0 : index
    %c0_198 = arith.constant 0 : index
    %761 = vector.load %arg19[%c0_196, %c0_197, %c0_198] : memref<8x8x32xf32, #tpu.memory_space<vmem>>, vector<8x8x32xf32>
    %762 = vector.broadcast %760 : vector<8x8x1xf32> to vector<8x8x32xf32>
    %763 = arith.mulf %762, %761 : vector<8x8x32xf32>
    %cst_199 = arith.constant dense<0.000000e+00> : vector<8x32xf32>
    %764 = vector.multi_reduction <add>, %763, %cst_199 [0] : vector<8x8x32xf32> to vector<8x32xf32>
    %c0_200 = arith.constant 0 : index
    %c0_201 = arith.constant 0 : index
    %765 = vector.load %arg17[%c0_200, %c0_201] : memref<8x64xf32, #tpu.memory_space<vmem>>, vector<8x32xf32>
    tpu.vector_store %arg17[%c0_200, %c0_201], %764 {strides = array<i32>} : memref<8x64xf32, #tpu.memory_space<vmem>>, vector<8x32xf32>,
    %c0_202 = arith.constant 0 : index
    %c0_203 = arith.constant 0 : index
    %c0_204 = arith.constant 0 : index
    %766 = vector.load %arg20[%c0_202, %c0_203, %c0_204] : memref<8x8x32xf32, #tpu.memory_space<vmem>>, vector<8x8x32xf32>
    %767 = vector.broadcast %760 : vector<8x8x1xf32> to vector<8x8x32xf32>
    %768 = arith.mulf %767, %766 : vector<8x8x32xf32>
    %cst_205 = arith.constant dense<0.000000e+00> : vector<8x32xf32>
    %769 = vector.multi_reduction <add>, %768, %cst_205 [0] : vector<8x8x32xf32> to vector<8x32xf32>
    %c0_206 = arith.constant 0 : index
    %c32 = arith.constant 32 : index
    %770 = vector.load %arg17[%c0_206, %c32] : memref<8x64xf32, #tpu.memory_space<vmem>>, vector<8x32xf32>
    tpu.vector_store %arg17[%c0_206, %c32], %769 {strides = array<i32>} : memref<8x64xf32, #tpu.memory_space<vmem>>, vector<8x32xf32>,
    return
  }
  func.func @transform_0(%arg0: i32) -> (i32, i32, i32) {
    %c0_i32 = arith.constant 0 : i32
    %c0_i32_0 = arith.constant 0 : i32
    %c0_i32_1 = arith.constant 0 : i32
    return %c0_i32, %arg0, %c0_i32_0 : i32, i32, i32
  }
  func.func @transform_1(%arg0: i32) -> (i32, i32) {
    %c0_i32 = arith.constant 0 : i32
    %c0_i32_0 = arith.constant 0 : i32
    return %arg0, %c0_i32 : i32, i32
  }
  func.func @transform_2(%arg0: i32) -> (i32, i32) {
    %c0_i32 = arith.constant 0 : i32
    %c0_i32_0 = arith.constant 0 : i32
    %c0_i32_1 = arith.constant 0 : i32
    return %c0_i32, %c0_i32_0 : i32, i32
  }
  func.func @transform_3(%arg0: i32) -> (i32, i32) {
    %c0_i32 = arith.constant 0 : i32
    %c0_i32_0 = arith.constant 0 : i32
    %c0_i32_1 = arith.constant 0 : i32
    return %c0_i32, %c0_i32_0 : i32, i32
  }
  func.func @transform_4(%arg0: i32) -> (i32, i32) {
    %c0_i32 = arith.constant 0 : i32
    %c0_i32_0 = arith.constant 0 : i32
    %c0_i32_1 = arith.constant 0 : i32
    return %c0_i32, %c0_i32_0 : i32, i32
  }
  func.func @transform_5(%arg0: i32) -> (i32, i32) {
    %c0_i32 = arith.constant 0 : i32
    %c0_i32_0 = arith.constant 0 : i32
    %c0_i32_1 = arith.constant 0 : i32
    return %c0_i32, %c0_i32_0 : i32, i32
  }
  func.func @transform_6(%arg0: i32) -> (i32, i32) {
    %c0_i32 = arith.constant 0 : i32
    %c0_i32_0 = arith.constant 0 : i32
    %c0_i32_1 = arith.constant 0 : i32
    return %c0_i32, %c0_i32_0 : i32, i32
  }
  func.func @transform_7(%arg0: i32) -> (i32, i32) {
    %c0_i32 = arith.constant 0 : i32
    %c0_i32_0 = arith.constant 0 : i32
    %c0_i32_1 = arith.constant 0 : i32
    return %c0_i32, %c0_i32_0 : i32, i32
  }
  func.func @transform_8(%arg0: i32) -> (i32, i32) {
    %c0_i32 = arith.constant 0 : i32
    %c0_i32_0 = arith.constant 0 : i32
    %c0_i32_1 = arith.constant 0 : i32
    return %c0_i32, %c0_i32_0 : i32, i32
  }
  func.func @transform_9(%arg0: i32) -> (i32, i32) {
    %c0_i32 = arith.constant 0 : i32
    %c0_i32_0 = arith.constant 0 : i32
    %c0_i32_1 = arith.constant 0 : i32
    return %c0_i32, %c0_i32_0 : i32, i32
  }
  func.func @transform_10(%arg0: i32) -> (i32, i32) {
    %c0_i32 = arith.constant 0 : i32
    %c0_i32_0 = arith.constant 0 : i32
    %c0_i32_1 = arith.constant 0 : i32
    return %c0_i32, %c0_i32_0 : i32, i32
  }
  func.func @transform_11(%arg0: i32) -> (i32, i32) {
    %c0_i32 = arith.constant 0 : i32
    %c0_i32_0 = arith.constant 0 : i32
    %c0_i32_1 = arith.constant 0 : i32
    return %c0_i32, %c0_i32_0 : i32, i32
  }
  func.func @transform_12(%arg0: i32) -> (i32, i32) {
    %c0_i32 = arith.constant 0 : i32
    %c0_i32_0 = arith.constant 0 : i32
    %c0_i32_1 = arith.constant 0 : i32
    return %c0_i32, %c0_i32_0 : i32, i32
  }
  func.func @transform_13(%arg0: i32) -> (i32, i32) {
    %c0_i32 = arith.constant 0 : i32
    %c0_i32_0 = arith.constant 0 : i32
    %c0_i32_1 = arith.constant 0 : i32
    return %c0_i32, %c0_i32_0 : i32, i32
  }
  func.func @transform_14(%arg0: i32) -> (i32, i32) {
    %c0_i32 = arith.constant 0 : i32
    %c0_i32_0 = arith.constant 0 : i32
    %c0_i32_1 = arith.constant 0 : i32
    return %c0_i32, %c0_i32_0 : i32, i32
  }
  func.func @transform_15(%arg0: i32) -> (i32, i32) {
    %c0_i32 = arith.constant 0 : i32
    %c0_i32_0 = arith.constant 0 : i32
    %c0_i32_1 = arith.constant 0 : i32
    return %c0_i32, %c0_i32_0 : i32, i32
  }
  func.func @transform_16(%arg0: i32) -> (i32, i32) {
    %c0_i32 = arith.constant 0 : i32
    %c0_i32_0 = arith.constant 0 : i32
    return %arg0, %c0_i32 : i32, i32
  }
  func.func @transform_17(%arg0: i32) -> (i32, i32) {
    %c0_i32 = arith.constant 0 : i32
    %c0_i32_0 = arith.constant 0 : i32
    return %arg0, %c0_i32 : i32, i32
  }
}

</mosaic_0001>

<bundles_post_ra>
// kernel: tpu_custom_call.1
= control target key start
LH: loop header
LB: loop body
LE: loop exit
PB: predicated region body
PF: predicated region fallthrough
CT: control target
= control target key end

     0   :  { %s5030_s0 = inlined_call_operand.hbm [shape: f32[8,8,32], index: 0, kind: input, shape index: {}]   ;;  %s5031_s1 = inlined_call_operand.vmem [shape: s32[8,1], index: 1, kind: input, shape index: {}]   ;;  %s5032_s2 = inlined_call_operand.hbm [shape: f32[32,192], index: 2, kind: input, shape index: {}]   ;;  %s5033_s3 = inlined_call_operand.hbm [shape: f32[32,96], index: 3, kind: input, shape index: {}]   ;;  %s5034_s4 = inlined_call_operand.hbm [shape: f32[32,96], index: 4, kind: input, shape index: {}]   ;;  %s5035_s5 = inlined_call_operand.hbm [shape: f32[1,192], index: 5, kind: input, shape index: {}]   ;;  %s5036_s6 = inlined_call_operand.hbm [shape: f32[1,32], index: 6, kind: input, shape index: {}]   ;;  %s5037_s7 = inlined_call_operand.hbm [shape: f32[1,32], index: 7, kind: input, shape index: {}]   ;;  %s5038_s8 = inlined_call_operand.hbm [shape: f32[1,32], index: 8, kind: input, shape index: {}]   ;;  %s5039_s9 = inlined_call_operand.hbm [shape: f32[1,32], index: 9, kind: input, shape index: {}]   ;;  %s5040_s10 = inlined_call_operand.hbm [shape: f32[1,32], index: 10, kind: input, shape index: {}]   ;;  %s5041_s11 = inlined_call_operand.hbm [shape: f32[1,32], index: 11, kind: input, shape index: {}]   ;;  %s5042_s12 = inlined_call_operand.hbm [shape: f32[32,64], index: 12, kind: input, shape index: {}]   ;;  %s5043_s13 = inlined_call_operand.vmem [shape: f32[32,64], index: 13, kind: input, shape index: {}]   ;;  %s5044_s14 = inlined_call_operand.vmem [shape: f32[1,64], index: 14, kind: input, shape index: {}]   ;;  %s5045_s15 = inlined_call_operand.vmem [shape: f32[1,64], index: 15, kind: input, shape index: {}]   ;;  %s5046_s16 = inlined_call_operand.hbm [shape: f32[8,64], index: 16, kind: output, shape index: {0}]   ;;  %s5047_s17 = inlined_call_operand.hbm [shape: f32[8,8], index: 17, kind: output, shape index: {1}]  }
   0x1   :  { %5049 = sst [smem:[#allocation38_spill]] %s5030_s0 }
   0x2   :  { %5050 = sst [smem:[#allocation39_spill]] %s5031_s1 }
   0x3   :  { %23 = vsyncpa [#allocation7], 0 }
   0x4   :  { %24 = vsyncpa [#allocation10], 0 }
   0x5   :  { %25 = vsyncpa [#allocation13], 0 }
   0x6   :  { %26 = vsyncpa [#allocation16], 0 }
   0x7   :  { %27 = vsyncpa [#allocation19], 0 }
   0x8   :  { %28 = vsyncpa [#allocation22], 0 }
   0x9   :  { %29 = vsyncpa [#allocation25], 0 }
   0xa   :  { %30 = vsyncpa [#allocation8], 0 }
   0xb   :  { %31 = vsyncpa [#allocation28], 0  ;;  %s3998_s24 = smov [#allocation9]  }
   0xc   :  { %s51_s25 = sshll.u32 %s3998_s24, 4  ;;  %s52_s25 = int_to_ptr.vmem [resolvable:$true] %s51_s25 }
   0xd   :  { %s3708_s26 = scalar_lea.vmem %s52_s25, 1024  ;;  %p3713_p1 = scmp.lt.s32.totalorder %s52_s25, %s52_s25 }
   0xe   :  { %p3709_p0 = scmp.ne.s32.totalorder %s52_s25, %s3708_s26  ;;  %p3714_p2 = scmp.lt.s32.totalorder %s3708_s26, %s3708_s26 }
  0x10   :  { %p3715_p3 = por %p3714_p2, %p3713_p1 }
  0x12   :  { %p3716_p4 = pnand %p3715_p3, %p3709_p0 }
  0x14   :  { %3719 = shalt.err (!%p3716_p4)
}
  0x15   :  { %s3999_s27 = smov 256   ;;  %s4000_s28 = smov 16  }
  0x16   :  { %57 = dma.hbm_to_vmem [thread:$0]  %s5032_s2, 1024, %s52_s25, [#allocation10], %s3999_s27, %s3999_s27, %s4000_s28  }
  0x17   :  { %s4001_s30 = smov [#allocation12]   ;;  %s4002_s19 = smov [#allocation15]  }
  0x18   :  { %s75_s18 = sshll.u32 %s4001_s30, 4  ;;  %s98_s1 = sshll.u32 %s4002_s19, 4  ;;  %s76_s18 = int_to_ptr.vmem [resolvable:$true] %s75_s18  ;;  %s99_s1 = int_to_ptr.vmem [resolvable:$true] %s98_s1 }
  0x19   :  { %s3728_s20 = scalar_lea.vmem %s76_s18, 512  ;;  %p3733_p6 = scmp.lt.s32.totalorder %s76_s18, %s76_s18 }
  0x1a   :  { %p3729_p5 = scmp.ne.s32.totalorder %s76_s18, %s3728_s20  ;;  %p3734_p7 = scmp.lt.s32.totalorder %s3728_s20, %s3728_s20 }
  0x1c   :  { %p3735_p8 = por %p3734_p7, %p3733_p6 }
  0x1e   :  { %p3736_p9 = pnand %p3735_p8, %p3729_p5 }
  0x20   :  { %3739 = shalt.err (!%p3736_p9)
}
  0x21   :  { %s4003_s21 = smov 128   ;;  %s4004_s22 = smov 8  }
  0x22   :  { %81 = dma.hbm_to_vmem [thread:$0]  %s5034_s4, 512, %s76_s18, [#allocation13], %s4003_s21, %s4003_s21, %s4004_s22  }
  0x23   :  { %s3748_s2 = scalar_lea.vmem %s99_s1, 16  ;;  %s3752_s25 = scalar_lea.vmem %s99_s1, 32 }
  0x24   :  { %p3749_p10 = scmp.ne.s32.totalorder %s99_s1, %s3748_s2  ;;  %p3753_p11 = scmp.lt.s32.totalorder %s99_s1, %s99_s1 }
  0x25   :  { %p3754_p12 = scmp.lt.s32.totalorder %s3752_s25, %s3748_s2 }
  0x27   :  { %p3755_p13 = por %p3754_p12, %p3753_p11 }
  0x29   :  { %p3756_p0 = pnand %p3755_p13, %p3749_p10 }
  0x2b   :  { %3759 = shalt.err (!%p3756_p0)
}
  0x2c   :  { %101 = dma.hbm_to_vmem [thread:$0]  %s5036_s6, 16, %s99_s1, [#allocation16]  }
  0x2d   :  { %s4005_s28 = smov [#allocation18]   ;;  %s4006_s0 = smov [#allocation21]  }
  0x2e   :  { %s118_s29 = sshll.u32 %s4005_s28, 4  ;;  %s138_s30 = sshll.u32 %s4006_s0, 4  ;;  %s119_s29 = int_to_ptr.vmem [resolvable:$true] %s118_s29  ;;  %s139_s30 = int_to_ptr.vmem [resolvable:$true] %s138_s30 }
  0x2f   :  { %s3768_s19 = scalar_lea.vmem %s119_s29, 16  ;;  %s3772_s4 = scalar_lea.vmem %s119_s29, 32 }
  0x30   :  { %p3769_p1 = scmp.ne.s32.totalorder %s119_s29, %s3768_s19  ;;  %p3773_p2 = scmp.lt.s32.totalorder %s119_s29, %s119_s29 }
  0x31   :  { %p3774_p3 = scmp.lt.s32.totalorder %s3772_s4, %s3768_s19 }
  0x33   :  { %p3775_p4 = por %p3774_p3, %p3773_p2 }
  0x35   :  { %p3776_p5 = pnand %p3775_p4, %p3769_p1 }
  0x37   :  { %3779 = shalt.err (!%p3776_p5)
}
  0x38   :  { %121 = dma.hbm_to_vmem [thread:$0]  %s5038_s8, 16, %s119_s29, [#allocation19]  }
  0x39   :  { %s3788_s23 = scalar_lea.vmem %s139_s30, 16  ;;  %s3792_s6 = scalar_lea.vmem %s139_s30, 32 }
  0x3a   :  { %p3789_p6 = scmp.ne.s32.totalorder %s139_s30, %s3788_s23  ;;  %p3793_p7 = scmp.lt.s32.totalorder %s139_s30, %s139_s30 }
  0x3b   :  { %p3794_p8 = scmp.lt.s32.totalorder %s3792_s6, %s3788_s23 }
  0x3d   :  { %p3795_p9 = por %p3794_p8, %p3793_p7 }
  0x3f   :  { %p3796_p10 = pnand %p3795_p9, %p3789_p6 }
  0x41   :  { %3799 = shalt.err (!%p3796_p10)
}
  0x42   :  { %141 = dma.hbm_to_vmem [thread:$0]  %s5040_s10, 16, %s139_s30, [#allocation22]  }
  0x43   :  { %s4007_s2 = smov [#allocation6]   ;;  %s4008_s26 = smov [#allocation11]  }
  0x44   :  { %s37_s25 = sshll.u32 %s4007_s2, 4  ;;  %s63_s27 = sshll.u32 %s4008_s26, 4  ;;  %s38_s25 = int_to_ptr.vmem [resolvable:$true] %s37_s25  ;;  %s64_s27 = int_to_ptr.vmem [resolvable:$true] %s63_s27 }
  0x45   :  { %s3808_s28 = scalar_lea.vmem %s38_s25, 1024  ;;  %p3813_p12 = scmp.lt.s32.totalorder %s38_s25, %s38_s25 }
  0x46   :  { %p3809_p11 = scmp.ne.s32.totalorder %s38_s25, %s3808_s28  ;;  %p3814_p13 = scmp.lt.s32.totalorder %s3808_s28, %s3808_s28 }
  0x48   :  { %p3815_p0 = por %p3814_p13, %p3813_p12 }
  0x4a   :  { %p3816_p1 = pnand %p3815_p0, %p3809_p11 }
  0x4c   :  { %3819 = shalt.err (!%p3816_p1)
}
  0x4d   :  { %s5051_s0 = sld [smem:[#allocation38_spill]]  ;;  %s3828_s10 = scalar_lea.vmem %s64_s27, 512 }
  0x4e   :  { %p3829_p2 = scmp.ne.s32.totalorder %s64_s27, %s3828_s10  ;;  %p3833_p3 = scmp.lt.s32.totalorder %s64_s27, %s64_s27 }
  0x4f   :  { %p3834_p4 = scmp.lt.s32.totalorder %s3828_s10, %s3828_s10 }
  0x51   :  { %p3835_p5 = por %p3834_p4, %p3833_p3 }
  0x53   :  { %43 = dma.hbm_to_vmem [thread:$0]  %s5051_s0, 1024, %s38_s25, [#allocation7], %s4003_s21, %s4003_s21, %s4004_s22  }
  0x54   :  { %p3836_p6 = pnand %p3835_p5, %p3829_p2 }
  0x56   :  { %3839 = shalt.err (!%p3836_p6)
}
  0x57   :  { %69 = dma.hbm_to_vmem [thread:$0]  %s5033_s3, 512, %s64_s27, [#allocation10], %s4003_s21, %s4003_s21, %s4004_s22  }
  0x58   :  { %s4009_s4 = smov [#allocation14]   ;;  %s4010_s20 = smov [#allocation17]  }
  0x59   :  { %s88_s18 = sshll.u32 %s4009_s4, 4  ;;  %s108_s23 = sshll.u32 %s4010_s20, 4  ;;  %s89_s18 = int_to_ptr.vmem [resolvable:$true] %s88_s18  ;;  %s109_s23 = int_to_ptr.vmem [resolvable:$true] %s108_s23 }
  0x5a   :  { %s3848_s6 = scalar_lea.vmem %s89_s18, 32  ;;  %p3853_p8 = scmp.lt.s32.totalorder %s89_s18, %s89_s18 }
  0x5b   :  { %p3849_p7 = scmp.ne.s32.totalorder %s89_s18, %s3848_s6  ;;  %p3854_p9 = scmp.lt.s32.totalorder %s3848_s6, %s3848_s6 }
  0x5d   :  { %p3855_p10 = por %p3854_p9, %p3853_p8 }
  0x5f   :  { %p3856_p11 = pnand %p3855_p10, %p3849_p7 }
  0x61   :  { %3859 = shalt.err (!%p3856_p11)
}
  0x62   :  { %91 = dma.hbm_to_vmem [thread:$0]  %s5035_s5, 32, %s89_s18, [#allocation13]  }
  0x63   :  { %s3868_s2 = scalar_lea.vmem %s109_s23, 16  ;;  %s3872_s3 = scalar_lea.vmem %s109_s23, 32 }
  0x64   :  { %p3869_p12 = scmp.ne.s32.totalorder %s109_s23, %s3868_s2  ;;  %p3873_p13 = scmp.lt.s32.totalorder %s109_s23, %s109_s23 }
  0x65   :  { %p3874_p0 = scmp.lt.s32.totalorder %s3872_s3, %s3868_s2 }
  0x67   :  { %p3875_p1 = por %p3874_p0, %p3873_p13 }
  0x69   :  { %p3876_p2 = pnand %p3875_p1, %p3869_p12 }
  0x6b   :  { %3879 = shalt.err (!%p3876_p2)
}
  0x6c   :  { %111 = dma.hbm_to_vmem [thread:$0]  %s5037_s7, 16, %s109_s23, [#allocation16]  }
  0x6d   :  { %s4011_s27 = smov [#allocation20]   ;;  %s4012_s8 = smov [#allocation23]  }
  0x6e   :  { %s128_s28 = sshll.u32 %s4011_s27, 4  ;;  %s148_s29 = sshll.u32 %s4012_s8, 4  ;;  %s129_s28 = int_to_ptr.vmem [resolvable:$true] %s128_s28  ;;  %s149_s29 = int_to_ptr.vmem [resolvable:$true] %s148_s29 }
  0x6f   :  { %s3888_s0 = scalar_lea.vmem %s129_s28, 16  ;;  %s3892_s5 = scalar_lea.vmem %s129_s28, 32 }
  0x70   :  { %p3889_p3 = scmp.ne.s32.totalorder %s129_s28, %s3888_s0  ;;  %p3893_p4 = scmp.lt.s32.totalorder %s129_s28, %s129_s28 }
  0x71   :  { %p3894_p5 = scmp.lt.s32.totalorder %s3892_s5, %s3888_s0 }
  0x73   :  { %p3895_p6 = por %p3894_p5, %p3893_p4 }
  0x75   :  { %p3896_p7 = pnand %p3895_p6, %p3889_p3 }
  0x77   :  { %3899 = shalt.err (!%p3896_p7)
}
  0x78   :  { %131 = dma.hbm_to_vmem [thread:$0]  %s5039_s9, 16, %s129_s28, [#allocation19]  }
  0x79   :  { %s3908_s19 = scalar_lea.vmem %s149_s29, 16  ;;  %s3912_s7 = scalar_lea.vmem %s149_s29, 32 }
  0x7a   :  { %p3909_p8 = scmp.ne.s32.totalorder %s149_s29, %s3908_s19  ;;  %p3913_p9 = scmp.lt.s32.totalorder %s149_s29, %s149_s29 }
  0x7b   :  { %p3914_p10 = scmp.lt.s32.totalorder %s3912_s7, %s3908_s19 }
  0x7d   :  { %p3915_p11 = por %p3914_p10, %p3913_p9 }
  0x7f   :  { %p3916_p12 = pnand %p3915_p11, %p3909_p8 }
  0x81   :  { %3919 = shalt.err (!%p3916_p12)
}
  0x82   :  { %151 = dma.hbm_to_vmem [thread:$0]  %s5041_s11, 16, %s149_s29, [#allocation22]  }
  0x83   :  { %s4013_s20 = smov [#allocation24]  }
  0x84   :  { %s157_s23 = sshll.u32 %s4013_s20, 4  ;;  %s158_s23 = int_to_ptr.vmem [resolvable:$true] %s157_s23 }
  0x85   :  { %s3928_s6 = scalar_lea.vmem %s158_s23, 512  ;;  %p3933_p0 = scmp.lt.s32.totalorder %s158_s23, %s158_s23 }
  0x86   :  { %p3929_p13 = scmp.ne.s32.totalorder %s158_s23, %s3928_s6  ;;  %p3934_p1 = scmp.lt.s32.totalorder %s3928_s6, %s3928_s6 }
  0x88   :  { %p3935_p2 = por %p3934_p1, %p3933_p0 }
  0x8a   :  { %p3936_p3 = pnand %p3935_p2, %p3929_p13 }
  0x8c   :  { %3939 = shalt.err (!%p3936_p3)
}
  0x8d   :  { %163 = dma.hbm_to_vmem [thread:$0]  %s5042_s12, 512, %s158_s23, [#allocation25], %s4003_s21, %s4003_s21, %s4004_s22  }
  0x8e   :  { %3980 = dma.done.wait [#allocation7], 1024  }
  0x8f   :  { %3981 = vsyncadd [#allocation7], 4294966272 }
  0x90   :  { %3982 = dma.done.wait [#allocation10], 1536  }
  0x91   :  { %3983 = vsyncadd [#allocation10], 4294965760 }
  0x92   :  { %3984 = dma.done.wait [#allocation13], 544  }
  0x93   :  { %3985 = vsyncadd [#allocation13], 4294966752 }
  0x94   :  { %3986 = dma.done.wait [#allocation16], 32  }
  0x95   :  { %3987 = vsyncadd [#allocation16], 4294967264 }
  0x96   :  { %3988 = dma.done.wait [#allocation19], 32  }
  0x97   :  { %3989 = vsyncadd [#allocation19], 4294967264 }
  0x98   :  { %3990 = dma.done.wait [#allocation22], 32  }
  0x99   :  { %3991 = vsyncadd [#allocation22], 4294967264 }
  0x9a   :  { %3992 = dma.done.wait [#allocation25], 512  }
  0x9b   :  { %3993 = vsyncadd [#allocation25], 4294966784  ;;  %v4014_v0 = vmov 0.0   ;;  %vm4015_vm0 = vmmov 0   ;;  %v232_v1 = vld [vmem:[#allocation9 + $0x38] sm:$0xff]  ;;  %v231_v3 = vld [vmem:[#allocation9 + $0x30] sm:$0xff]  ;;  %v235_v27 = vlaneseq }
  0x9c   :  { %3317 = vmatprep.subr.mxu1 %v4014_v0  ;;  %3325 = vmatprep.mubr.msk.f32.mxu1 %vm4015_vm0, %v4014_v0  ;;  %v4164_v2 = vld [vmem:[#allocation11 + $0x18] sm:$0xff]  ;;  %v230_v4 = vld [vmem:[#allocation9 + $0x28] sm:$0xff]  ;;  %v4167_v5 = vld [vmem:[#allocation11 + $0x10] sm:$0xff]  ;;  %vm245_vm1 = vcmask 261120   ;;  %s4016_s11 = smov 64   ;;  %vm383_vm2 = vcmask 785408  }
  0x9d   :  { %334 = vmatprep.mubr.f32.mxu0 %v4014_v0  ;;  %294 = vmatprep.subr.mxu0 %v232_v1  ;;  %v229_v6 = vld [vmem:[#allocation9 + $0x20] sm:$0xff]  ;;  %v228_v7 = vld [vmem:[#allocation9 + $0x18] sm:$0xff]  ;;  %v4170_v8 = vld [vmem:[#allocation11 + $0x8] sm:$0xff]  ;;  %v4239_v28 = vshrl.u32 %v235_v27, 7  ;;  %s4017_s12 = smov 32   ;;  %s5052_s24 = sld [smem:[#allocation39_spill]] }
  0x9e   :  { %3318 = vmatpush3.msra.mxu1 %v4164_v2  ;;  %295 = vmatpush1.msra.mxu0 %v231_v3  ;;  %v227_v9 = vld [vmem:[#allocation9 + $0x10] sm:$0xff]  ;;  %v226_v10 = vld [vmem:[#allocation9 + $0x8] sm:$0xff]  ;;  %v4174_v11 = vld [vmem:[#allocation11] sm:$0xff]  ;;  %s4019_s2 = smov 96   ;;  %s4020_s19 = smov [#allocation27]  }
  0x9f   :  { %3319 = vmatprep.subr.mxu1 %v4014_v0  ;;  %296 = vmatprep.subr.mxu0 %v230_v4  ;;  %v225_v12 = vld [vmem:[#allocation9] sm:$0xff]  ;;  %v4179_v14 = vld [vmem:[#allocation12 + $0x18] sm:$0xff]  ;;  %v4184_v15 = vld [vmem:[#allocation12 + $0x10] sm:$0xff]  ;;  %v237_v29 = vsub.s32 0, %v4239_v28  ;;  %v241_v31 = vsub.s32 1, %v4239_v28  ;;  %s3131_s7 = sshll.u32 %s4020_s19, 4  ;;  %s3132_s7 = int_to_ptr.vmem [resolvable:$true] %s3131_s7 }
  0xa0   :  { %3320 = vmatpush3.msra.mxu1 %v4167_v5  ;;  %297 = vmatpush1.msra.mxu0 %v229_v6  ;;  %v217_v13 = vld [vmem:[#allocation6] sm:$0xff]  ;;  %v218_v17 = vld [vmem:[#allocation6 + $0x8] sm:$0xff]  ;;  %v219_v21 = vld [vmem:[#allocation6 + $0x10] sm:$0xff]  ;;  %s3940_s4 = scalar_lea.vmem %s3132_s7, 128  ;;  %p3945_p5 = scmp.lt.s32.totalorder %s3132_s7, %s3132_s7 }
  0xa1   :  { %3321 = vmatprep.subr.mxu1 %v4014_v0  ;;  %298 = vmatprep.subr.mxu0 %v228_v7  ;;  %v3159_v16 = vld [vmem:[#allocation15] ss:$0 sm:$0xff]  ;;  %v4189_v18 = vld [vmem:[#allocation12 + $0x8] sm:$0xff]  ;;  %v3161_v20 = vld [vmem:[#allocation17] ss:$0 sm:$0xff]  ;;  %p3941_p4 = scmp.ne.s32.totalorder %s3132_s7, %s3940_s4  ;;  %p3946_p6 = scmp.lt.s32.totalorder %s3940_s4, %s3940_s4 }
  0xa2   :  { %3322 = vmatpush3.msra.mxu1 %v4170_v8  ;;  %299 = vmatpush1.msra.mxu0 %v227_v9  ;;  %v4197_v19 = vld [vmem:[#allocation12] sm:$0xff]  ;;  %v220_v22 = vld [vmem:[#allocation6 + $0x18] sm:$0xff]  ;;  %v222_v24 = vld [vmem:[#allocation6 + $0x28] sm:$0xff] }
  0xa3   :  { %3323 = vmatprep.subr.mxu1 %v4014_v0  ;;  %300 = vmatprep.subr.mxu0 %v226_v10  ;;  %v221_v23 = vld [vmem:[#allocation6 + $0x20] sm:$0xff]  ;;  %v223_v25 = vld [vmem:[#allocation6 + $0x30] sm:$0xff]  ;;  %v224_v26 = vld [vmem:[#allocation6 + $0x38] sm:$0xff]  ;;  %p3947_p7 = por %p3946_p6, %p3945_p5 }
  0xa4   :  { %3324 = vmatpush3.msra.mxu1 %v4174_v11  ;;  %301 = vmatpush1.msra.mxu0 %v225_v12  ;;  %v233_v30 = vld [vmem:[#allocation14] sm:$0x3] }
  0xa5   :  { %3326 = vmatmul.mubr.f32.vlgmr.msra.gmra.mxu1 %v4014_v0  ;;  %3150 = vmatmul.mubr.msk.f32.vlgmr.msra.gmra.mxu0 %vm245_vm1, %v217_v13  ;;  %v238_v33 = vrot.slane %v233_v30, %v237_v29  ;;  %v242_v35 = vrot.slane %v233_v30, %v241_v31  ;;  %p3948_p8 = pnand %p3947_p7, %p3941_p4 }
  0xa6   :  { %3328 = vmatprep.subr.mxu1 %v4014_v0  ;;  %340 = vmatprep.mubr.f32.mxu0 %v4014_v0 }
  0xa7   :  { %3329 = vmatpush3.msra.mxu1 %v4179_v14  ;;  %3336 = vmatprep.mubr.msk.f32.mxu1 %vm4015_vm0, %v4014_v0 }
  0xa8   :  { %3330 = vmatprep.subr.mxu1 %v4014_v0  ;;  %550 = vrot.lane.b32.xlu0 %v3159_v16, %s4016_s11 }
  0xa9   :  { %3331 = vmatpush3.msra.mxu1 %v4184_v15  ;;  %3151 = vmatmul.mubr.msk.f32.gmra.mxu0 %vm245_vm1, %v218_v17 }
  0xaa   :  { %3332 = vmatprep.subr.mxu1 %v4014_v0  ;;  %346 = vmatprep.mubr.f32.mxu0 %v4014_v0 }
  0xab   :  { %3333 = vmatpush3.msra.mxu1 %v4189_v18  ;;  %3361 = vmatprep.subr.mxu0 %v4014_v0 }
  0xac   :  { %3334 = vmatprep.subr.mxu1 %v4014_v0  ;;  %657 = vrot.lane.b32.xlu0 %v3161_v20, %s4016_s11 }
  0xad   :  { %3335 = vmatpush3.msra.mxu1 %v4197_v19  ;;  %3152 = vmatmul.mubr.msk.f32.gmra.mxu0 %vm245_vm1, %v219_v21 }
  0xae   :  { %3337 = vmatmul.mubr.f32.vlgmr.msra.gmra.mxu1 %v4014_v0  ;;  %352 = vmatprep.mubr.f32.mxu0 %v4014_v0 }
  0xaf   :  { %3339 = vmatprep.subr.mxu1 %v4014_v0  ;;  %3347 = vmatprep.mubr.msk.f32.mxu1 %vm4015_vm0, %v4014_v0 }
  0xb0   :  { %3340 = vmatpush3.msra.mxu1 %v4164_v2  ;;  %3362 = vmatpush3.msra.mxu0 %v4164_v2 }
  0xb1   :  { %3341 = vmatprep.subr.mxu1 %v4014_v0  ;;  %3153 = vmatmul.mubr.msk.f32.gmra.mxu0 %vm245_vm1, %v220_v22 }
  0xb2   :  { %3342 = vmatpush3.msra.mxu1 %v4167_v5  ;;  %358 = vmatprep.mubr.f32.mxu0 %v4014_v0 }
  0xb3   :  { %3343 = vmatprep.subr.mxu1 %v4014_v0  ;;  %3363 = vmatprep.subr.mxu0 %v4014_v0 }
  0xb4   :  { %3344 = vmatpush3.msra.mxu1 %v4170_v8  ;;  %3364 = vmatpush3.msra.mxu0 %v4167_v5 }
  0xb5   :  { %3345 = vmatprep.subr.mxu1 %v4014_v0  ;;  %3154 = vmatmul.mubr.msk.f32.gmra.mxu0 %vm245_vm1, %v221_v23 }
  0xb6   :  { %3346 = vmatpush3.msra.mxu1 %v4174_v11  ;;  %364 = vmatprep.mubr.f32.mxu0 %v4014_v0 }
  0xb7   :  { %3350 = vmatprep.subr.mxu1 %v4014_v0  ;;  %3365 = vmatprep.subr.mxu0 %v4014_v0 }
  0xb8   :  { %3366 = vmatpush3.msra.mxu0 %v4170_v8 }
  0xb9   :  { %3155 = vmatmul.mubr.msk.f32.gmra.mxu0 %vm245_vm1, %v222_v24  ;;  %3367 = vmatprep.subr.mxu0 %v4014_v0  ;;  %v4018_v24 = vmov 0  }
  0xba   :  { %370 = vmatprep.mubr.f32.mxu0 %v4014_v0  ;;  %3368 = vmatpush3.msra.mxu0 %v4174_v11 }
  0xbb   :  { %3383 = vmatprep.subr.mxu0 %v4014_v0  ;;  %3557 = vset.pattern.permute.xlu0 %v4018_v24 }
  0xbc   :  { %3558 = vset.pattern.permute.xlu1 %v4018_v24 }
  0xbd   :  { %3156 = vmatmul.mubr.msk.f32.gmra.mxu0 %vm245_vm1, %v223_v25  ;;  %v4305_v25 = vld [vmem:[%s5052_s24] sm:$0xff] }
  0xbe   :  { %376 = vmatprep.mubr.f32.mxu0 %v4014_v0  ;;  %vm680_vm3 = vcmp.gt.s32.totalorder %v4305_v25, 0  ;;  %vm687_vm4 = vcmp.gt.s32.totalorder %v4305_v25, 7  ;;  %vm914_vm7 = vcmp.gt.s32.totalorder %v4305_v25, 6  ;;  %vm907_vm8 = vcmp.gt.s32.totalorder %v4305_v25, 1 }
  0xbf   :  { %vm1142_vm11 = vcmp.gt.s32.totalorder %v4305_v25, 5  ;;  %vm1135_vm12 = vcmp.gt.s32.totalorder %v4305_v25, 2  ;;  %vm1370_vm15 = vcmp.gt.s32.totalorder %v4305_v25, 4 }
  0xc1   :  { %3157 = vmatmul.mubr.msk.f32.gmra.mxu0 %vm245_vm1, %v224_v26 }
  0xc2   :  { %3369 = vmatprep.mubr.msk.f32.mxu0 %vm4015_vm0, %v4014_v0 }
 0x11a   :  { %v4243_v32 = vpop.permute.xlu0 %550 }
 0x11e   :  { %v4295_v12 = vpop.permute.xlu0 %657 }
 0x165   :  { %v534_v34 = vpop.f32.mrf.mxu1  ;;  %v336_v37 = vpop.f32.mrf.mxu0 }
 0x166   :  { %v553_v36 = vadd.f32 %v4243_v32, %v534_v34  ;;  %v4250_v38 = vadd.f32 %v336_v37, %v238_v33 }
 0x167   :  { %v3327_v39 = vpop.f32.mrf.mxu1  ;;  %v338_v40 = vpop.f32.mrf.mxu0 }
 0x168   :  { %555 = vrot.lane.b32.xlu0 %v553_v36, %s4016_s11  ;;  %384 = vst.msk [vmem:[#allocation4] sm:$0xff] %vm383_vm2, %v4250_v38  ;;  %v4255_v41 = vadd.f32 %v338_v40, %v242_v35 }
 0x169   :  { %v342_v42 = vpop.f32.mrf.mxu0 }
 0x16a   :  { %v4257_v43 = vadd.f32 %v342_v42, %v238_v33 }
 0x16b   :  { %v344_v44 = vpop.f32.mrf.mxu0 }
 0x16c   :  { %385 = vst.msk [vmem:[#allocation4 + $0x8] sm:$0xff] %vm383_vm2, %v4257_v43  ;;  %v4261_v45 = vadd.f32 %v344_v44, %v242_v35 }
 0x16d   :  { %v348_v46 = vpop.f32.mrf.mxu0 }
 0x16e   :  { %v641_v47 = vpop.f32.mrf.mxu1  ;;  %v4263_v48 = vadd.f32 %v348_v46, %v238_v33 }
 0x16f   :  { %v350_v49 = vpop.f32.mrf.mxu0  ;;  %v660_v16 = vadd.f32 %v4295_v12, %v641_v47  ;;  %v464_v17 = vld [vmem:[#allocation4] sm:$0xff] }
 0x170   :  { %v3338_v50 = vpop.f32.mrf.mxu1  ;;  %386 = vst.msk [vmem:[#allocation4 + $0x10] sm:$0xff] %vm383_vm2, %v4263_v48  ;;  %v4267_v51 = vadd.f32 %v350_v49, %v242_v35  ;;  %v538_v20 = vadd.f32 %v534_v34, %v464_v17  ;;  %v681_v34 = vsel %vm680_vm3, 1, %v4018_v24  ;;  %vm1363_vm3 = vcmp.gt.s32.totalorder %v4305_v25, 3 }
 0x171   :  { %v354_v52 = vpop.f32.mrf.mxu0 }
 0x172   :  { %v4269_v53 = vadd.f32 %v354_v52, %v238_v33  ;;  %v3158_v21 = vmul.f32 -1.442695, %v538_v20 }
 0x173   :  { %v356_v54 = vpop.f32.mrf.mxu0 }
 0x174   :  { %387 = vst.msk [vmem:[#allocation4 + $0x18] sm:$0xff] %vm383_vm2, %v4269_v53  ;;  %v4273_v55 = vadd.f32 %v356_v54, %v242_v35  ;;  %3559 = vpow2.f32 %v3158_v21 }
 0x175   :  { %v360_v56 = vpop.f32.mrf.mxu0 }
 0x176   :  { %v4275_v57 = vadd.f32 %v360_v56, %v238_v33 }
 0x177   :  { %v362_v58 = vpop.f32.mrf.mxu0 }
 0x178   :  { %388 = vst.msk [vmem:[#allocation4 + $0x20] sm:$0xff] %vm383_vm2, %v4275_v57  ;;  %v4279_v59 = vadd.f32 %v362_v58, %v242_v35 }
 0x179   :  { %v366_v60 = vpop.f32.mrf.mxu0 }
 0x17a   :  { %v4281_v61 = vadd.f32 %v366_v60, %v238_v33 }
 0x17b   :  { %v368_v62 = vpop.f32.mrf.mxu0 }
 0x17c   :  { %389 = vst.msk [vmem:[#allocation4 + $0x28] sm:$0xff] %vm383_vm2, %v4281_v61  ;;  %v4285_v63 = vadd.f32 %v368_v62, %v242_v35 }
 0x17d   :  { %v372_v1 = vpop.f32.mrf.mxu0 }
 0x17e   :  { %v4287_v3 = vadd.f32 %v372_v1, %v238_v33 }
 0x17f   :  { %v374_v4 = vpop.f32.mrf.mxu0 }
 0x180   :  { %390 = vst.msk [vmem:[#allocation4 + $0x30] sm:$0xff] %vm383_vm2, %v4287_v3  ;;  %v4291_v6 = vadd.f32 %v374_v4, %v242_v35 }
 0x181   :  { %v378_v7 = vpop.f32.mrf.mxu0  ;;  %v3560_v22 = vpop.eup %3559 }
 0x182   :  { %v379_v9 = vadd.f32 %v378_v7, %v238_v33  ;;  %v542_v23 = vadd.f32 1.0, %v3560_v22 }
 0x183   :  { %v380_v10 = vpop.f32.mrf.mxu0 }
 0x184   :  { %391 = vst.msk [vmem:[#allocation4 + $0x38] sm:$0xff] %vm383_vm2, %v379_v9  ;;  %436 = vrot.lane.b32.xlu1 %v379_v9, %s4017_s12  ;;  %v381_v13 = vadd.f32 %v380_v10, %v242_v35  ;;  %3561 = vrcp.f32 %v542_v23 }
 0x188   :  { %438 = vrot.lane.b32.xlu1 %v381_v13, %s4017_s12 }
 0x18c   :  { %662 = vrot.lane.b32.xlu1 %v660_v16, %s4016_s11 }
 0x191   :  { %v3562_v26 = vpop.eup %3561 }
 0x192   :  { %v565_v4 = vsub.f32 1.0, %v3562_v26  ;;  %v571_v13 = vmul.f32 0.0, %v3562_v26 }
 0x1da   :  { %v556_v30 = vpop.permute.xlu0 %555 }
 0x1db   :  { %v558_v33 = vmul.f32 %v3562_v26, %v556_v30 }
 0x1dd   :  { %560 = vrot.lane.b32.xlu0 %v558_v33, %s4016_s11 }
 0x1e1   :  { %683 = vperm.xlu0 %3557, %v681_v34  }
 0x1f6   :  { %v437_v35 = vpop.permute.xlu1 %436 }
 0x1fa   :  { %v439_v36 = vpop.permute.xlu1 %438 }
 0x1fb   :  { %v447_v37 = vsel %vm245_vm1, %v437_v35, %v439_v36 }
 0x1fc   :  { %463 = vst.msk [vmem:[#allocation5 + $0x38] sm:$0xff] %vm383_vm2, %v447_v37 }
 0x1fe   :  { %v663_v49 = vpop.permute.xlu1 %662 }
 0x203   :  { %v574_v39 = vld [vmem:[#allocation5 + $0x38] sm:$0xff] }
 0x204   :  { %v645_v40 = vadd.f32 %v641_v47, %v574_v39  ;;  %v688_v47 = vsel %vm687_vm4, 1, %v4018_v24 }
 0x206   :  { %v3160_v42 = vmul.f32 -1.442695, %v645_v40 }
 0x208   :  { %3563 = vpow2.f32 %v3160_v42  ;;  %v706_v42 = vld [vmem:[#allocation4 + $0x8] sm:$0xff] }
 0x215   :  { %v3564_v44 = vpop.eup %3563 }
 0x216   :  { %v649_v46 = vadd.f32 1.0, %v3564_v44 }
 0x218   :  { %3565 = vrcp.f32 %v649_v46 }
 0x225   :  { %v3566_v50 = vpop.eup %3565 }
 0x226   :  { %v665_v52 = vmul.f32 %v3566_v50, %v663_v49  ;;  %v672_v20 = vsub.f32 1.0, %v3566_v50  ;;  %v678_v30 = vmul.f32 0.0, %v3566_v50 }
 0x228   :  { %667 = vrot.lane.b32.xlu1 %v665_v52, %s4016_s11 }
 0x24f   :  { %v561_v54 = vpop.permute.xlu0 %560 }
 0x250   :  { %v563_v56 = vadd.f32 %v561_v54, %v464_v17 }
 0x252   :  { %3567 = vtanh.f32 %v563_v56 }
 0x25c   :  { %v4317_v7 = vpop.permute.xlu0 %683 }
 0x25d   :  { %vm685_vm5 = vcmp.eq.s32.totalorder %v4317_v7, 1 }
 0x25f   :  { %v3568_v58 = vpop.eup %3567 }
 0x260   :  { %567 = vrot.lane.b32.xlu1 %v3568_v58, %s4019_s2 }
 0x264   :  { %690 = vperm.xlu1 %3558, %v688_v47  }
 0x29a   :  { %v668_v60 = vpop.permute.xlu1 %667 }
 0x29b   :  { %v670_v62 = vadd.f32 %v668_v60, %v574_v39 }
 0x29d   :  { %3569 = vtanh.f32 %v670_v62 }
 0x2aa   :  { %v3570_v1 = vpop.eup %3569 }
 0x2ab   :  { %674 = vrot.lane.b32.xlu0 %v3570_v1, %s4019_s2 }
 0x2d2   :  { %v568_v9 = vpop.permute.xlu1 %567 }
 0x2d3   :  { %v570_v10 = vmul.f32 %v568_v9, %v565_v4 }
 0x2d5   :  { %v572_v16 = vadd.f32 %v571_v13, %v570_v10 }
 0x2d7   :  { %v4322_v17 = vsel %vm685_vm5, %v572_v16, 0.0 }
 0x2d8   :  { %695 = vrot.lane.b32.xlu1 %v4322_v17, %s4019_s2 }
 0x2dc   :  { %432 = vrot.lane.b32.xlu1 %v4287_v3, %s4017_s12 }
 0x2df   :  { %v4328_v21 = vpop.permute.xlu1 %690 }
 0x2e0   :  { %vm692_vm6 = vcmp.eq.s32.totalorder %v4328_v21, 1 }
 0x31d   :  { %v675_v22 = vpop.permute.xlu0 %674 }
 0x31e   :  { %v677_v23 = vmul.f32 %v675_v22, %v672_v20  ;;  %v915_v22 = vsel %vm914_vm7, 1, %v4018_v24 }
 0x320   :  { %v679_v26 = vadd.f32 %v678_v30, %v677_v23  ;;  %v908_v23 = vsel %vm907_vm8, 1, %v4018_v24  ;;  %vm2896_vm8 = vcmask 1044484  }
 0x322   :  { %v4333_v33 = vsel %vm692_vm6, %v679_v26, 0.0 }
 0x323   :  { %700 = vrot.lane.b32.xlu0 %v4333_v33, %s4019_s2 }
 0x327   :  { %434 = vrot.lane.b32.xlu0 %v4291_v6, %s4017_s12 }
 0x34a   :  { %v696_v3 = vpop.permute.xlu1 %695 }
 0x34b   :  { %698 = vst.msk [vmem:[#allocation2] sm:$0xff] %vm245_vm1, %v696_v3  ;;  %3348 = vmatmul.mubr.msk.f32.vlgmr.msra.gmra.mxu1 %vm245_vm1, %v696_v3 }
 0x34c   :  { %3351 = vmatpush3.msra.mxu1 %v4179_v14  ;;  %3358 = vmatprep.mubr.msk.f32.mxu1 %vm4015_vm0, %v4014_v0 }
 0x34d   :  { %3352 = vmatprep.subr.mxu1 %v4014_v0 }
 0x34e   :  { %3353 = vmatpush3.msra.mxu1 %v4184_v15  ;;  %v433_v34 = vpop.permute.xlu1 %432 }
 0x34f   :  { %3354 = vmatprep.subr.mxu1 %v4014_v0 }
 0x350   :  { %3355 = vmatpush3.msra.mxu1 %v4189_v18 }
 0x351   :  { %3356 = vmatprep.subr.mxu1 %v4014_v0 }
 0x352   :  { %3357 = vmatpush3.msra.mxu1 %v4197_v19 }
 0x353   :  { %3372 = vmatprep.subr.mxu1 %v4014_v0 }
 0x395   :  { %v701_v6 = vpop.permute.xlu0 %700 }
 0x396   :  { %704 = vst.msk [vmem:[#allocation3 + $0x38] sm:$0xff] %vm245_vm1, %v701_v6  ;;  %3359 = vmatmul.mubr.msk.f32.vlgmr.msra.gmra.mxu1 %vm245_vm1, %v701_v6 }
 0x397   :  { %3373 = vmatpush3.msra.mxu1 %v4179_v14  ;;  %3380 = vmatprep.mubr.msk.f32.mxu1 %vm4015_vm0, %v4014_v0 }
 0x398   :  { %3374 = vmatprep.subr.mxu1 %v4014_v0 }
 0x399   :  { %v435_v35 = vpop.permute.xlu0 %434  ;;  %3375 = vmatpush3.msra.mxu1 %v4184_v15 }
 0x39a   :  { %v446_v36 = vsel %vm245_vm1, %v433_v34, %v435_v35  ;;  %3376 = vmatprep.subr.mxu1 %v4014_v0 }
 0x39b   :  { %462 = vst.msk [vmem:[#allocation5 + $0x30] sm:$0xff] %vm383_vm2, %v446_v36  ;;  %3377 = vmatpush3.msra.mxu1 %v4189_v18 }
 0x39c   :  { %3378 = vmatprep.subr.mxu1 %v4014_v0 }
 0x39d   :  { %3379 = vmatpush3.msra.mxu1 %v4197_v19 }
 0x39e   :  { %3394 = vmatprep.subr.mxu1 %v4014_v0 }
 0x3a2   :  { %v807_v62 = vld [vmem:[#allocation5 + $0x30] sm:$0xff] }
 0x40b   :  { %v775_v37 = vpop.f32.mrf.mxu1 }
 0x40c   :  { %v786_v39 = vadd.f32 %v775_v37, %v4243_v32  ;;  %v779_v44 = vadd.f32 %v775_v37, %v706_v42 }
 0x40d   :  { %v3349_v40 = vpop.f32.mrf.mxu1 }
 0x40e   :  { %788 = vrot.lane.b32.xlu0 %v786_v39, %s4016_s11  ;;  %v3163_v52 = vmul.f32 -1.442695, %v779_v44 }
 0x410   :  { %3571 = vpow2.f32 %v3163_v52 }
 0x41d   :  { %v3572_v54 = vpop.eup %3571 }
 0x41e   :  { %v783_v56 = vadd.f32 1.0, %v3572_v54 }
 0x420   :  { %3573 = vrcp.f32 %v783_v56 }
 0x42d   :  { %v3574_v58 = vpop.eup %3573 }
 0x42e   :  { %v804_v52 = vmul.f32 %v3574_v58, %v4322_v17 }
 0x456   :  { %v876_v46 = vpop.f32.mrf.mxu1 }
 0x457   :  { %v887_v49 = vadd.f32 %v876_v46, %v4295_v12  ;;  %v880_v1 = vadd.f32 %v876_v46, %v807_v62 }
 0x458   :  { %v3360_v50 = vpop.f32.mrf.mxu1 }
 0x459   :  { %889 = vrot.lane.b32.xlu1 %v887_v49, %s4016_s11  ;;  %v3165_v4 = vmul.f32 -1.442695, %v880_v1  ;;  %v798_v49 = vsub.f32 1.0, %v3574_v58 }
 0x45b   :  { %3575 = vpow2.f32 %v3165_v4 }
 0x468   :  { %v3576_v9 = vpop.eup %3575 }
 0x469   :  { %v884_v10 = vadd.f32 1.0, %v3576_v9 }
 0x46b   :  { %3577 = vrcp.f32 %v884_v10 }
 0x478   :  { %v3578_v13 = vpop.eup %3577 }
 0x479   :  { %v899_v37 = vsub.f32 1.0, %v3578_v13  ;;  %v905_v40 = vmul.f32 %v3578_v13, %v4333_v33 }
 0x480   :  { %v789_v47 = vpop.permute.xlu0 %788 }
 0x481   :  { %v791_v60 = vmul.f32 %v3574_v58, %v789_v47 }
 0x483   :  { %793 = vrot.lane.b32.xlu0 %v791_v60, %s4016_s11 }
 0x4cb   :  { %v890_v16 = vpop.permute.xlu1 %889 }
 0x4cc   :  { %v892_v20 = vmul.f32 %v3578_v13, %v890_v16 }
 0x4ce   :  { %894 = vrot.lane.b32.xlu1 %v892_v20, %s4016_s11 }
 0x4d2   :  { %917 = vperm.xlu1 %3558, %v915_v22   ;;  %v934_v22 = vld [vmem:[#allocation4 + $0x10] sm:$0xff] }
 0x4d6   :  { %910 = vperm.xlu1 %3558, %v908_v23  }
 0x4f5   :  { %v794_v30 = vpop.permute.xlu0 %793 }
 0x4f6   :  { %v796_v6 = vadd.f32 %v794_v30, %v706_v42 }
 0x540   :  { %v895_v26 = vpop.permute.xlu1 %894 }
 0x541   :  { %v897_v3 = vadd.f32 %v895_v26, %v807_v62 }
 0x543   :  { %3579 = vtanh.f32 %v897_v3 }
 0x544   :  { %3581 = vtanh.f32 %v796_v6 }
 0x54d   :  { %v4377_v36 = vpop.permute.xlu1 %917 }
 0x54e   :  { %vm919_vm9 = vcmp.eq.s32.totalorder %v4377_v36, 1 }
 0x550   :  { %v3580_v34 = vpop.eup %3579 }
 0x551   :  { %901 = vrot.lane.b32.xlu0 %v3580_v34, %s4019_s2  ;;  %v3582_v35 = vpop.eup %3581  ;;  %v4381_v50 = vpop.permute.xlu1 %910 }
 0x552   :  { %vm912_vm10 = vcmp.eq.s32.totalorder %v4381_v50, 1 }
 0x555   :  { %800 = vrot.lane.b32.xlu0 %v3582_v35, %s4019_s2 }
 0x5c3   :  { %v902_v39 = vpop.permute.xlu0 %901 }
 0x5c4   :  { %v904_v44 = vmul.f32 %v902_v39, %v899_v37 }
 0x5c6   :  { %v906_v46 = vadd.f32 %v905_v40, %v904_v44 }
 0x5c7   :  { %v801_v42 = vpop.permute.xlu0 %800 }
 0x5c8   :  { %v803_v54 = vmul.f32 %v801_v42, %v798_v49  ;;  %v4387_v56 = vsel %vm919_vm9, %v906_v46, %v4333_v33  ;;  %v1143_v49 = vsel %vm1142_vm11, 1, %v4018_v24  ;;  %vm2902_vm11 = vcmask 1047559  }
 0x5c9   :  { %928 = vrot.lane.b32.xlu1 %v4387_v56, %s4019_s2 }
 0x5ca   :  { %v805_v47 = vadd.f32 %v804_v52, %v803_v54  ;;  %v1136_v52 = vsel %vm1135_vm12, 1, %v4018_v24  ;;  %vm2943_vm12 = vcmask 64512  }
 0x5cc   :  { %v4395_v60 = vsel %vm912_vm10, %v805_v47, %v4322_v17 }
 0x5cd   :  { %428 = vrot.lane.b32.xlu1 %v4281_v61, %s4017_s12  ;;  %922 = vrot.lane.b32.xlu0 %v4395_v60, %s4019_s2 }
 0x5d1   :  { %430 = vrot.lane.b32.xlu0 %v4285_v63, %s4017_s12 }
 0x63b   :  { %v929_v33 = vpop.permute.xlu1 %928 }
 0x63c   :  { %932 = vst.msk [vmem:[#allocation3 + $0x30] sm:$0xff] %vm245_vm1, %v929_v33  ;;  %3381 = vmatmul.mubr.msk.f32.vlgmr.msra.gmra.mxu1 %vm245_vm1, %v929_v33 }
 0x63d   :  { %3395 = vmatpush3.msra.mxu1 %v4179_v14  ;;  %3402 = vmatprep.mubr.msk.f32.mxu1 %vm4015_vm0, %v4014_v0 }
 0x63e   :  { %3396 = vmatprep.subr.mxu1 %v4014_v0 }
 0x63f   :  { %v923_v17 = vpop.permute.xlu0 %922  ;;  %3397 = vmatpush3.msra.mxu1 %v4184_v15  ;;  %v429_v61 = vpop.permute.xlu1 %428 }
 0x640   :  { %926 = vst.msk [vmem:[#allocation2 + $0x8] sm:$0xff] %vm245_vm1, %v923_v17  ;;  %3370 = vmatmul.mubr.msk.f32.vlgmr.msra.gmra.mxu0 %vm245_vm1, %v923_v17  ;;  %3398 = vmatprep.subr.mxu1 %v4014_v0 }
 0x641   :  { %3384 = vmatpush3.msra.mxu0 %v4164_v2  ;;  %3399 = vmatpush3.msra.mxu1 %v4189_v18 }
 0x642   :  { %3385 = vmatprep.subr.mxu0 %v4014_v0  ;;  %3400 = vmatprep.subr.mxu1 %v4014_v0 }
 0x643   :  { %v431_v63 = vpop.permute.xlu0 %430  ;;  %3386 = vmatpush3.msra.mxu0 %v4167_v5  ;;  %3401 = vmatpush3.msra.mxu1 %v4197_v19 }
 0x644   :  { %v445_v58 = vsel %vm245_vm1, %v429_v61, %v431_v63  ;;  %3387 = vmatprep.subr.mxu0 %v4014_v0  ;;  %3391 = vmatprep.mubr.msk.f32.mxu0 %vm4015_vm0, %v4014_v0 }
 0x645   :  { %461 = vst.msk [vmem:[#allocation5 + $0x28] sm:$0xff] %vm383_vm2, %v445_v58  ;;  %3388 = vmatpush3.msra.mxu0 %v4170_v8  ;;  %3416 = vmatprep.subr.mxu1 %v4014_v0 }
 0x646   :  { %3389 = vmatprep.subr.mxu0 %v4014_v0 }
 0x647   :  { %3390 = vmatpush3.msra.mxu0 %v4174_v11 }
 0x648   :  { %3405 = vmatprep.subr.mxu0 %v4014_v0 }
 0x64c   :  { %v1035_v16 = vld [vmem:[#allocation5 + $0x28] sm:$0xff] }
 0x6fc   :  { %v1104_v62 = vpop.f32.mrf.mxu1 }
 0x6fd   :  { %v1115_v1 = vadd.f32 %v1104_v62, %v4295_v12  ;;  %v1108_v20 = vadd.f32 %v1104_v62, %v1035_v16 }
 0x6fe   :  { %v3382_v4 = vpop.f32.mrf.mxu1 }
 0x6ff   :  { %1117 = vrot.lane.b32.xlu1 %v1115_v1, %s4016_s11  ;;  %v3169_v23 = vmul.f32 -1.442695, %v1108_v20 }
 0x700   :  { %v1003_v9 = vpop.f32.mrf.mxu0 }
 0x701   :  { %v1014_v10 = vadd.f32 %v1003_v9, %v4243_v32  ;;  %v1007_v30 = vadd.f32 %v1003_v9, %v934_v22  ;;  %3583 = vpow2.f32 %v3169_v23 }
 0x702   :  { %v3371_v13 = vpop.f32.mrf.mxu0 }
 0x703   :  { %1016 = vrot.lane.b32.xlu0 %v1014_v10, %s4016_s11  ;;  %v3167_v26 = vmul.f32 -1.442695, %v1007_v30 }
 0x705   :  { %3585 = vpow2.f32 %v3167_v26 }
 0x70e   :  { %v3584_v3 = vpop.eup %3583 }
 0x70f   :  { %v1112_v6 = vadd.f32 1.0, %v3584_v3 }
 0x711   :  { %3587 = vrcp.f32 %v1112_v6 }
 0x712   :  { %v3586_v34 = vpop.eup %3585 }
 0x713   :  { %v1011_v35 = vadd.f32 1.0, %v3586_v34 }
 0x715   :  { %3589 = vrcp.f32 %v1011_v35 }
 0x71e   :  { %v3588_v37 = vpop.eup %3587 }
 0x71f   :  { %v1127_v62 = vsub.f32 1.0, %v3588_v37  ;;  %v1133_v4 = vmul.f32 %v3588_v37, %v4387_v56 }
 0x722   :  { %v3590_v44 = vpop.eup %3589 }
 0x723   :  { %v1026_v13 = vsub.f32 1.0, %v3590_v44 }
 0x771   :  { %v1118_v39 = vpop.permute.xlu1 %1117 }
 0x772   :  { %v1120_v40 = vmul.f32 %v3588_v37, %v1118_v39 }
 0x774   :  { %1122 = vrot.lane.b32.xlu1 %v1120_v40, %s4016_s11 }
 0x775   :  { %v1017_v46 = vpop.permute.xlu0 %1016 }
 0x776   :  { %v1019_v42 = vmul.f32 %v3590_v44, %v1017_v46  ;;  %v1162_v46 = vld [vmem:[#allocation4 + $0x18] sm:$0xff] }
 0x778   :  { %1145 = vperm.xlu1 %3558, %v1143_v49   ;;  %1021 = vrot.lane.b32.xlu0 %v1019_v42, %s4016_s11 }
 0x77c   :  { %1138 = vperm.xlu1 %3558, %v1136_v52  }
 0x7e6   :  { %v1123_v54 = vpop.permute.xlu1 %1122 }
 0x7e7   :  { %v1125_v47 = vadd.f32 %v1123_v54, %v1035_v16 }
 0x7e9   :  { %3591 = vtanh.f32 %v1125_v47 }
 0x7ea   :  { %v1022_v33 = vpop.permute.xlu0 %1021 }
 0x7eb   :  { %v1024_v17 = vadd.f32 %v1022_v33, %v934_v22  ;;  %v1032_v22 = vmul.f32 %v3590_v44, %v4395_v60 }
 0x7ed   :  { %3593 = vtanh.f32 %v1024_v17 }
 0x7f3   :  { %v4441_v58 = vpop.permute.xlu1 %1145 }
 0x7f4   :  { %vm1147_vm13 = vcmp.eq.s32.totalorder %v4441_v58, 1 }
 0x7f6   :  { %v3592_v61 = vpop.eup %3591 }
 0x7f7   :  { %1129 = vrot.lane.b32.xlu0 %v3592_v61, %s4019_s2  ;;  %v4445_v20 = vpop.permute.xlu1 %1138 }
 0x7f8   :  { %vm1140_vm14 = vcmp.eq.s32.totalorder %v4445_v20, 1 }
 0x7fa   :  { %v3594_v63 = vpop.eup %3593 }
 0x7fb   :  { %1028 = vrot.lane.b32.xlu0 %v3594_v63, %s4019_s2 }
 0x869   :  { %v1130_v1 = vpop.permute.xlu0 %1129 }
 0x86a   :  { %v1132_v9 = vmul.f32 %v1130_v1, %v1127_v62 }
 0x86c   :  { %v1134_v10 = vadd.f32 %v1133_v4, %v1132_v9  ;;  %v1371_v9 = vsel %vm1370_vm15, 1, %v4018_v24 }
 0x86d   :  { %v1029_v16 = vpop.permute.xlu0 %1028 }
 0x86e   :  { %v1031_v23 = vmul.f32 %v1029_v16, %v1026_v13  ;;  %v4451_v30 = vsel %vm1147_vm13, %v1134_v10, %v4387_v56  ;;  %v1364_v13 = vsel %vm1363_vm3, 1, %v4018_v24 }
 0x86f   :  { %1156 = vrot.lane.b32.xlu1 %v4451_v30, %s4019_s2 }
 0x870   :  { %v1033_v26 = vadd.f32 %v1032_v22, %v1031_v23 }
 0x872   :  { %v4459_v3 = vsel %vm1140_vm14, %v1033_v26, %v4395_v60 }
 0x873   :  { %424 = vrot.lane.b32.xlu1 %v4275_v57, %s4017_s12  ;;  %1150 = vrot.lane.b32.xlu0 %v4459_v3, %s4019_s2 }
 0x877   :  { %426 = vrot.lane.b32.xlu0 %v4279_v59, %s4017_s12 }
 0x8e1   :  { %v1157_v56 = vpop.permute.xlu1 %1156 }
 0x8e2   :  { %1160 = vst.msk [vmem:[#allocation3 + $0x28] sm:$0xff] %vm245_vm1, %v1157_v56  ;;  %3403 = vmatmul.mubr.msk.f32.vlgmr.msra.gmra.mxu1 %vm245_vm1, %v1157_v56 }
 0x8e3   :  { %3417 = vmatpush3.msra.mxu1 %v4179_v14  ;;  %3424 = vmatprep.mubr.msk.f32.mxu1 %vm4015_vm0, %v4014_v0 }
 0x8e4   :  { %3418 = vmatprep.subr.mxu1 %v4014_v0 }
 0x8e5   :  { %v1151_v60 = vpop.permute.xlu0 %1150  ;;  %3419 = vmatpush3.msra.mxu1 %v4184_v15  ;;  %v425_v57 = vpop.permute.xlu1 %424 }
 0x8e6   :  { %1154 = vst.msk [vmem:[#allocation2 + $0x10] sm:$0xff] %vm245_vm1, %v1151_v60  ;;  %3392 = vmatmul.mubr.msk.f32.vlgmr.msra.gmra.mxu0 %vm245_vm1, %v1151_v60  ;;  %3420 = vmatprep.subr.mxu1 %v4014_v0 }
 0x8e7   :  { %3406 = vmatpush3.msra.mxu0 %v4164_v2  ;;  %3421 = vmatpush3.msra.mxu1 %v4189_v18 }
 0x8e8   :  { %3407 = vmatprep.subr.mxu0 %v4014_v0  ;;  %3422 = vmatprep.subr.mxu1 %v4014_v0 }
 0x8e9   :  { %v427_v59 = vpop.permute.xlu0 %426  ;;  %3408 = vmatpush3.msra.mxu0 %v4167_v5  ;;  %3423 = vmatpush3.msra.mxu1 %v4197_v19 }
 0x8ea   :  { %v444_v6 = vsel %vm245_vm1, %v425_v57, %v427_v59  ;;  %3409 = vmatprep.subr.mxu0 %v4014_v0  ;;  %3413 = vmatprep.mubr.msk.f32.mxu0 %vm4015_vm0, %v4014_v0 }
 0x8eb   :  { %460 = vst.msk [vmem:[#allocation5 + $0x20] sm:$0xff] %vm383_vm2, %v444_v6  ;;  %3410 = vmatpush3.msra.mxu0 %v4170_v8  ;;  %3438 = vmatprep.subr.mxu1 %v4014_v0 }
 0x8ec   :  { %3411 = vmatprep.subr.mxu0 %v4014_v0 }
 0x8ed   :  { %3412 = vmatpush3.msra.mxu0 %v4174_v11 }
 0x8ee   :  { %3427 = vmatprep.subr.mxu0 %v4014_v0 }
 0x8f2   :  { %v1263_v8 = vld [vmem:[#allocation5 + $0x20] sm:$0xff] }
 0x9a2   :  { %v1332_v5 = vpop.f32.mrf.mxu1 }
 0x9a3   :  { %v1343_v34 = vadd.f32 %v1332_v5, %v4295_v12  ;;  %v1336_v44 = vadd.f32 %v1332_v5, %v1263_v8 }
 0x9a4   :  { %v3404_v35 = vpop.f32.mrf.mxu1 }
 0x9a5   :  { %1345 = vrot.lane.b32.xlu1 %v1343_v34, %s4016_s11  ;;  %v3173_v49 = vmul.f32 -1.442695, %v1336_v44 }
 0x9a6   :  { %v1231_v37 = vpop.f32.mrf.mxu0 }
 0x9a7   :  { %v1242_v39 = vadd.f32 %v1231_v37, %v4243_v32  ;;  %v1235_v42 = vadd.f32 %v1231_v37, %v1162_v46  ;;  %3595 = vpow2.f32 %v3173_v49 }
 0x9a8   :  { %v3393_v40 = vpop.f32.mrf.mxu0 }
 0x9a9   :  { %1244 = vrot.lane.b32.xlu0 %v1242_v39, %s4016_s11  ;;  %v3171_v52 = vmul.f32 -1.442695, %v1235_v42 }
 0x9ab   :  { %3597 = vpow2.f32 %v3171_v52 }
 0x9b4   :  { %v3596_v54 = vpop.eup %3595 }
 0x9b5   :  { %v1340_v47 = vadd.f32 1.0, %v3596_v54 }
 0x9b7   :  { %3599 = vrcp.f32 %v1340_v47 }
 0x9b8   :  { %v3598_v33 = vpop.eup %3597 }
 0x9b9   :  { %v1239_v17 = vadd.f32 1.0, %v3598_v33 }
 0x9bb   :  { %3601 = vrcp.f32 %v1239_v17  ;;  %v1390_v17 = vld [vmem:[#allocation4 + $0x20] sm:$0xff] }
 0x9c4   :  { %v3600_v61 = vpop.eup %3599 }
 0x9c5   :  { %v1355_v25 = vsub.f32 1.0, %v3600_v61  ;;  %v1361_v6 = vmul.f32 %v3600_v61, %v4451_v30 }
 0x9c8   :  { %v3602_v1 = vpop.eup %3601 }
 0x9c9   :  { %v1254_v34 = vsub.f32 1.0, %v3602_v1  ;;  %v1260_v39 = vmul.f32 %v3602_v1, %v4459_v3 }
 0xa17   :  { %v1346_v63 = vpop.permute.xlu1 %1345 }
 0xa18   :  { %v1348_v62 = vmul.f32 %v3600_v61, %v1346_v63 }
 0xa1a   :  { %1350 = vrot.lane.b32.xlu1 %v1348_v62, %s4016_s11 }
 0xa1b   :  { %v1245_v4 = vpop.permute.xlu0 %1244 }
 0xa1c   :  { %v1247_v10 = vmul.f32 %v3602_v1, %v1245_v4 }
 0xa1e   :  { %1373 = vperm.xlu1 %3558, %v1371_v9   ;;  %1249 = vrot.lane.b32.xlu0 %v1247_v10, %s4016_s11 }
 0xa22   :  { %1366 = vperm.xlu1 %3558, %v1364_v13  }
 0xa8c   :  { %v1351_v16 = vpop.permute.xlu1 %1350 }
 0xa8d   :  { %v1353_v22 = vadd.f32 %v1351_v16, %v1263_v8 }
 0xa8f   :  { %3603 = vtanh.f32 %v1353_v22 }
 0xa90   :  { %v1250_v23 = vpop.permute.xlu0 %1249 }
 0xa91   :  { %v1252_v26 = vadd.f32 %v1250_v23, %v1162_v46 }
 0xa93   :  { %3605 = vtanh.f32 %v1252_v26 }
 0xa99   :  { %v4505_v57 = vpop.permute.xlu1 %1373 }
 0xa9a   :  { %vm1375_vm4 = vcmp.eq.s32.totalorder %v4505_v57, 1  ;;  %v4597_v57 = vld [vmem:[#allocation12 + $0x10] sm:$0xff] }
 0xa9c   :  { %v3604_v56 = vpop.eup %3603 }
 0xa9d   :  { %1357 = vrot.lane.b32.xlu0 %v3604_v56, %s4019_s2  ;;  %v4509_v37 = vpop.permute.xlu1 %1366 }
 0xa9e   :  { %vm1368_vm7 = vcmp.eq.s32.totalorder %v4509_v37, 1 }
 0xaa0   :  { %v3606_v60 = vpop.eup %3605 }
 0xaa1   :  { %1256 = vrot.lane.b32.xlu0 %v3606_v60, %s4019_s2 }
 0xb0f   :  { %v1358_v59 = vpop.permute.xlu0 %1357 }
 0xb10   :  { %v1360_v24 = vmul.f32 %v1358_v59, %v1355_v25 }
 0xb12   :  { %v1362_v5 = vadd.f32 %v1361_v6, %v1360_v24 }
 0xb13   :  { %v1257_v35 = vpop.permute.xlu0 %1256 }
 0xb14   :  { %v1259_v40 = vmul.f32 %v1257_v35, %v1254_v34  ;;  %v4515_v8 = vsel %vm1375_vm4, %v1362_v5, %v4451_v30 }
 0xb15   :  { %1384 = vrot.lane.b32.xlu1 %v4515_v8, %s4019_s2 }
 0xb16   :  { %v1261_v44 = vadd.f32 %v1260_v39, %v1259_v40 }
 0xb18   :  { %v4523_v46 = vsel %vm1368_vm7, %v1261_v44, %v4459_v3 }
 0xb19   :  { %420 = vrot.lane.b32.xlu1 %v4269_v53, %s4017_s12  ;;  %1378 = vrot.lane.b32.xlu0 %v4523_v46, %s4019_s2 }
 0xb1d   :  { %422 = vrot.lane.b32.xlu0 %v4273_v55, %s4017_s12  ;;  %v4545_v55 = vld [vmem:[#allocation11 + $0x10] sm:$0xff] }
 0xb87   :  { %v1385_v30 = vpop.permute.xlu1 %1384 }
 0xb88   :  { %1388 = vst.msk [vmem:[#allocation3 + $0x20] sm:$0xff] %vm245_vm1, %v1385_v30  ;;  %3425 = vmatmul.mubr.msk.f32.vlgmr.msra.gmra.mxu1 %vm245_vm1, %v1385_v30 }
 0xb89   :  { %3439 = vmatpush3.msra.mxu1 %v4179_v14  ;;  %3446 = vmatprep.mubr.msk.f32.mxu1 %vm4015_vm0, %v4014_v0 }
 0xb8a   :  { %3440 = vmatprep.subr.mxu1 %v4014_v0 }
 0xb8b   :  { %v1379_v3 = vpop.permute.xlu0 %1378  ;;  %3441 = vmatpush3.msra.mxu1 %v4184_v15  ;;  %v421_v14 = vpop.permute.xlu1 %420 }
 0xb8c   :  { %1382 = vst.msk [vmem:[#allocation2 + $0x18] sm:$0xff] %vm245_vm1, %v1379_v3  ;;  %3414 = vmatmul.mubr.msk.f32.vlgmr.msra.gmra.mxu0 %vm245_vm1, %v1379_v3  ;;  %3442 = vmatprep.subr.mxu1 %v4014_v0 }
 0xb8d   :  { %3428 = vmatpush3.msra.mxu0 %v4164_v2  ;;  %3443 = vmatpush3.msra.mxu1 %v4189_v18  ;;  %v4554_v2 = vld [vmem:[#allocation11 + $0x8] sm:$0xff] }
 0xb8e   :  { %3429 = vmatprep.subr.mxu0 %v4014_v0  ;;  %3444 = vmatprep.subr.mxu1 %v4014_v0 }
 0xb8f   :  { %v423_v53 = vpop.permute.xlu0 %422  ;;  %3430 = vmatpush3.msra.mxu0 %v4545_v55  ;;  %3445 = vmatpush3.msra.mxu1 %v4197_v19 }
 0xb90   :  { %v443_v15 = vsel %vm245_vm1, %v421_v14, %v423_v53  ;;  %3431 = vmatprep.subr.mxu0 %v4014_v0  ;;  %3435 = vmatprep.mubr.msk.f32.mxu0 %vm4015_vm0, %v4014_v0 }
 0xb91   :  { %459 = vst.msk [vmem:[#allocation5 + $0x18] sm:$0xff] %vm383_vm2, %v443_v15  ;;  %3432 = vmatpush3.msra.mxu0 %v4554_v2  ;;  %3460 = vmatprep.subr.mxu1 %v4014_v0 }
 0xb92   :  { %3433 = vmatprep.subr.mxu0 %v4014_v0 }
 0xb93   :  { %3434 = vmatpush3.msra.mxu0 %v4174_v11 }
 0xb94   :  { %3449 = vmatprep.subr.mxu0 %v4014_v0 }
 0xb98   :  { %v1491_v47 = vld [vmem:[#allocation5 + $0x18] sm:$0xff] }
 0xc48   :  { %v1560_v18 = vpop.f32.mrf.mxu1 }
 0xc49   :  { %v1571_v19 = vadd.f32 %v1560_v18, %v4295_v12  ;;  %v1564_v33 = vadd.f32 %v1560_v18, %v1491_v47 }
 0xc4a   :  { %v3426_v49 = vpop.f32.mrf.mxu1 }
 0xc4b   :  { %1573 = vrot.lane.b32.xlu1 %v1571_v19, %s4016_s11  ;;  %v3177_v61 = vmul.f32 -1.442695, %v1564_v33 }
 0xc4c   :  { %v1459_v42 = vpop.f32.mrf.mxu0 }
 0xc4d   :  { %v1470_v52 = vadd.f32 %v1459_v42, %v4243_v32  ;;  %v1463_v63 = vadd.f32 %v1459_v42, %v1390_v17  ;;  %3607 = vpow2.f32 %v3177_v61  ;;  %v4612_v42 = vld [vmem:[#allocation12] sm:$0xff] }
 0xc4e   :  { %v3415_v54 = vpop.f32.mrf.mxu0 }
 0xc4f   :  { %1472 = vrot.lane.b32.xlu0 %v1470_v52, %s4016_s11  ;;  %v3175_v11 = vmul.f32 -1.442695, %v1463_v63  ;;  %v4623_v54 = vld [vmem:[#allocation11] sm:$0xff] }
 0xc51   :  { %3609 = vpow2.f32 %v3175_v11 }
 0xc5a   :  { %v3608_v62 = vpop.eup %3607 }
 0xc5b   :  { %v1568_v1 = vadd.f32 1.0, %v3608_v62 }
 0xc5d   :  { %3611 = vrcp.f32 %v1568_v1 }
 0xc5e   :  { %v3610_v4 = vpop.eup %3609 }
 0xc5f   :  { %v1467_v9 = vadd.f32 1.0, %v3610_v4  ;;  %v1606_v4 = vld [vmem:[#allocation4 + $0x28] sm:$0xff] }
 0xc61   :  { %3613 = vrcp.f32 %v1467_v9 }
 0xc6a   :  { %v3612_v10 = vpop.eup %3611 }
 0xc6b   :  { %v1583_v5 = vsub.f32 1.0, %v3612_v10  ;;  %v1589_v35 = vmul.f32 %v3612_v10, %v4515_v8 }
 0xc6e   :  { %v3614_v22 = vpop.eup %3613 }
 0xc6f   :  { %v1482_v44 = vsub.f32 1.0, %v3614_v22  ;;  %v1488_v3 = vmul.f32 %v3614_v22, %v4523_v46 }
 0xcbd   :  { %v1574_v13 = vpop.permute.xlu1 %1573 }
 0xcbe   :  { %v1576_v16 = vmul.f32 %v3612_v10, %v1574_v13 }
 0xcc0   :  { %1578 = vrot.lane.b32.xlu1 %v1576_v16, %s4016_s11 }
 0xcc1   :  { %v1473_v23 = vpop.permute.xlu0 %1472 }
 0xcc2   :  { %v1475_v26 = vmul.f32 %v3614_v22, %v1473_v23 }
 0xcc4   :  { %1477 = vrot.lane.b32.xlu0 %v1475_v26, %s4016_s11 }
 0xd32   :  { %v1579_v56 = vpop.permute.xlu1 %1578 }
 0xd33   :  { %v1581_v60 = vadd.f32 %v1579_v56, %v1491_v47 }
 0xd35   :  { %3615 = vtanh.f32 %v1581_v60 }
 0xd36   :  { %v1478_v25 = vpop.permute.xlu0 %1477 }
 0xd37   :  { %v1480_v59 = vadd.f32 %v1478_v25, %v1390_v17 }
 0xd39   :  { %3617 = vtanh.f32 %v1480_v59 }
 0xd42   :  { %v3616_v6 = vpop.eup %3615 }
 0xd43   :  { %1585 = vrot.lane.b32.xlu1 %v3616_v6, %s4019_s2 }
 0xd46   :  { %v3618_v24 = vpop.eup %3617 }
 0xd47   :  { %1484 = vrot.lane.b32.xlu0 %v3618_v24, %s4019_s2 }
 0xdb5   :  { %v1586_v34 = vpop.permute.xlu1 %1585 }
 0xdb6   :  { %v1588_v39 = vmul.f32 %v1586_v34, %v1583_v5 }
 0xdb8   :  { %v1590_v40 = vadd.f32 %v1589_v35, %v1588_v39 }
 0xdb9   :  { %v1485_v30 = vpop.permute.xlu0 %1484 }
 0xdba   :  { %v1487_v14 = vmul.f32 %v1485_v30, %v1482_v44  ;;  %v4574_v53 = vsel %vm1368_vm7, %v1590_v40, %v4515_v8  ;;  %v4591_v8 = vld [vmem:[#allocation12 + $0x18] sm:$0xff] }
 0xdbb   :  { %1600 = vrot.lane.b32.xlu1 %v4574_v53, %s4019_s2 }
 0xdbc   :  { %v1489_v15 = vadd.f32 %v1488_v3, %v1487_v14 }
 0xdbe   :  { %v4581_v18 = vsel %vm1375_vm4, %v1489_v15, %v4523_v46  ;;  %v4606_v46 = vld [vmem:[#allocation12 + $0x8] sm:$0xff] }
 0xdbf   :  { %416 = vrot.lane.b32.xlu1 %v4263_v48, %s4017_s12  ;;  %1594 = vrot.lane.b32.xlu0 %v4581_v18, %s4019_s2 }
 0xdc3   :  { %418 = vrot.lane.b32.xlu0 %v4267_v51, %s4017_s12  ;;  %v4603_v51 = vld [vmem:[#allocation11 + $0x18] sm:$0xff] }
 0xe2d   :  { %v1601_v37 = vpop.permute.xlu1 %1600 }
 0xe2e   :  { %1604 = vst.msk [vmem:[#allocation3 + $0x18] sm:$0xff] %vm245_vm1, %v1601_v37  ;;  %3447 = vmatmul.mubr.msk.f32.vlgmr.msra.gmra.mxu1 %vm245_vm1, %v1601_v37 }
 0xe2f   :  { %3461 = vmatpush3.msra.mxu1 %v4591_v8  ;;  %3468 = vmatprep.mubr.msk.f32.mxu1 %vm4015_vm0, %v4014_v0 }
 0xe30   :  { %3462 = vmatprep.subr.mxu1 %v4014_v0 }
 0xe31   :  { %v1595_v48 = vpop.permute.xlu0 %1594  ;;  %3463 = vmatpush3.msra.mxu1 %v4597_v57  ;;  %v417_v19 = vpop.permute.xlu1 %416 }
 0xe32   :  { %1598 = vst.msk [vmem:[#allocation2 + $0x20] sm:$0xff] %vm245_vm1, %v1595_v48  ;;  %3436 = vmatmul.mubr.msk.f32.vlgmr.msra.gmra.mxu0 %vm245_vm1, %v1595_v48  ;;  %3464 = vmatprep.subr.mxu1 %v4014_v0 }
 0xe33   :  { %3450 = vmatpush3.msra.mxu0 %v4603_v51  ;;  %3465 = vmatpush3.msra.mxu1 %v4606_v46 }
 0xe34   :  { %3451 = vmatprep.subr.mxu0 %v4014_v0  ;;  %3466 = vmatprep.subr.mxu1 %v4014_v0 }
 0xe35   :  { %v419_v49 = vpop.permute.xlu0 %418  ;;  %3452 = vmatpush3.msra.mxu0 %v4545_v55  ;;  %3467 = vmatpush3.msra.mxu1 %v4612_v42 }
 0xe36   :  { %v442_v52 = vsel %vm245_vm1, %v417_v19, %v419_v49  ;;  %3453 = vmatprep.subr.mxu0 %v4014_v0  ;;  %3457 = vmatprep.mubr.msk.f32.mxu0 %vm4015_vm0, %v4014_v0 }
 0xe37   :  { %458 = vst.msk [vmem:[#allocation5 + $0x10] sm:$0xff] %vm383_vm2, %v442_v52  ;;  %3454 = vmatpush3.msra.mxu0 %v4554_v2  ;;  %3482 = vmatprep.subr.mxu1 %v4014_v0 }
 0xe38   :  { %3455 = vmatprep.subr.mxu0 %v4014_v0 }
 0xe39   :  { %3456 = vmatpush3.msra.mxu0 %v4623_v54 }
 0xe3a   :  { %3471 = vmatprep.subr.mxu0 %v4014_v0 }
 0xe3e   :  { %v1707_v62 = vld [vmem:[#allocation5 + $0x10] sm:$0xff] }
 0xeee   :  { %v1776_v47 = vpop.f32.mrf.mxu1 }
 0xeef   :  { %v1787_v33 = vadd.f32 %v1776_v47, %v4295_v12  ;;  %v1780_v1 = vadd.f32 %v1776_v47, %v1707_v62 }
 0xef0   :  { %v3448_v17 = vpop.f32.mrf.mxu1 }
 0xef1   :  { %1789 = vrot.lane.b32.xlu1 %v1787_v33, %s4016_s11  ;;  %v3181_v9 = vmul.f32 -1.442695, %v1780_v1 }
 0xef2   :  { %v1675_v61 = vpop.f32.mrf.mxu0 }
 0xef3   :  { %v1686_v63 = vadd.f32 %v1675_v61, %v4243_v32  ;;  %v1679_v10 = vadd.f32 %v1675_v61, %v1606_v4  ;;  %3619 = vpow2.f32 %v3181_v9 }
 0xef4   :  { %v3437_v11 = vpop.f32.mrf.mxu0 }
 0xef5   :  { %1688 = vrot.lane.b32.xlu0 %v1686_v63, %s4016_s11  ;;  %v3179_v13 = vmul.f32 -1.442695, %v1679_v10  ;;  %v1822_v63 = vld [vmem:[#allocation4 + $0x30] sm:$0xff] }
 0xef7   :  { %3621 = vpow2.f32 %v3179_v13 }
 0xf00   :  { %v3620_v16 = vpop.eup %3619 }
 0xf01   :  { %v1784_v22 = vadd.f32 1.0, %v3620_v16 }
 0xf03   :  { %3623 = vrcp.f32 %v1784_v22 }
 0xf04   :  { %v3622_v23 = vpop.eup %3621 }
 0xf05   :  { %v1683_v26 = vadd.f32 1.0, %v3622_v23 }
 0xf07   :  { %3625 = vrcp.f32 %v1683_v26 }
 0xf10   :  { %v3624_v56 = vpop.eup %3623 }
 0xf11   :  { %v1799_v30 = vsub.f32 1.0, %v3624_v56  ;;  %v1805_v14 = vmul.f32 %v3624_v56, %v4574_v53 }
 0xf14   :  { %v3626_v59 = vpop.eup %3625 }
 0xf15   :  { %v1698_v48 = vsub.f32 1.0, %v3626_v59  ;;  %v1704_v49 = vmul.f32 %v3626_v59, %v4581_v18 }
 0xf63   :  { %v1790_v60 = vpop.permute.xlu1 %1789 }
 0xf64   :  { %v1792_v25 = vmul.f32 %v3624_v56, %v1790_v60 }
 0xf66   :  { %1794 = vrot.lane.b32.xlu1 %v1792_v25, %s4016_s11 }
 0xf67   :  { %v1689_v6 = vpop.permute.xlu0 %1688 }
 0xf68   :  { %v1691_v24 = vmul.f32 %v3626_v59, %v1689_v6 }
 0xf6a   :  { %1693 = vrot.lane.b32.xlu0 %v1691_v24, %s4016_s11 }
 0xfd8   :  { %v1795_v5 = vpop.permute.xlu1 %1794 }
 0xfd9   :  { %v1797_v34 = vadd.f32 %v1795_v5, %v1707_v62 }
 0xfdb   :  { %3627 = vtanh.f32 %v1797_v34 }
 0xfdc   :  { %v1694_v35 = vpop.permute.xlu0 %1693 }
 0xfdd   :  { %v1696_v39 = vadd.f32 %v1694_v35, %v1606_v4 }
 0xfdf   :  { %3629 = vtanh.f32 %v1696_v39 }
 0xfe8   :  { %v3628_v40 = vpop.eup %3627 }
 0xfe9   :  { %1801 = vrot.lane.b32.xlu1 %v3628_v40, %s4019_s2 }
 0xfec   :  { %v3630_v44 = vpop.eup %3629 }
 0xfed   :  { %1700 = vrot.lane.b32.xlu0 %v3630_v44, %s4019_s2 }
0x105b   :  { %v1802_v3 = vpop.permute.xlu1 %1801 }
0x105c   :  { %v1804_v15 = vmul.f32 %v1802_v3, %v1799_v30 }
0x105e   :  { %v1806_v37 = vadd.f32 %v1805_v14, %v1804_v15 }
0x105f   :  { %v1701_v19 = vpop.permute.xlu0 %1700 }
0x1060   :  { %v1703_v52 = vmul.f32 %v1701_v19, %v1698_v48  ;;  %v4640_v47 = vsel %vm1140_vm14, %v1806_v37, %v4574_v53 }
0x1061   :  { %1816 = vrot.lane.b32.xlu1 %v4640_v47, %s4019_s2 }
0x1062   :  { %v1705_v33 = vadd.f32 %v1704_v49, %v1703_v52 }
0x1064   :  { %v4647_v17 = vsel %vm1147_vm13, %v1705_v33, %v4581_v18 }
0x1065   :  { %412 = vrot.lane.b32.xlu1 %v4257_v43, %s4017_s12  ;;  %1810 = vrot.lane.b32.xlu0 %v4647_v17, %s4019_s2 }
0x1069   :  { %414 = vrot.lane.b32.xlu0 %v4261_v45, %s4017_s12 }
0x10d3   :  { %v1817_v20 = vpop.permute.xlu1 %1816 }
0x10d4   :  { %1820 = vst.msk [vmem:[#allocation3 + $0x10] sm:$0xff] %vm245_vm1, %v1817_v20  ;;  %3469 = vmatmul.mubr.msk.f32.vlgmr.msra.gmra.mxu1 %vm245_vm1, %v1817_v20 }
0x10d5   :  { %3483 = vmatpush3.msra.mxu1 %v4591_v8  ;;  %3490 = vmatprep.mubr.msk.f32.mxu1 %vm4015_vm0, %v4014_v0 }
0x10d6   :  { %3484 = vmatprep.subr.mxu1 %v4014_v0 }
0x10d7   :  { %v1811_v58 = vpop.permute.xlu0 %1810  ;;  %3485 = vmatpush3.msra.mxu1 %v4597_v57  ;;  %v413_v43 = vpop.permute.xlu1 %412 }
0x10d8   :  { %1814 = vst.msk [vmem:[#allocation2 + $0x28] sm:$0xff] %vm245_vm1, %v1811_v58  ;;  %3458 = vmatmul.mubr.msk.f32.vlgmr.msra.gmra.mxu0 %vm245_vm1, %v1811_v58  ;;  %3486 = vmatprep.subr.mxu1 %v4014_v0 }
0x10d9   :  { %3472 = vmatpush3.msra.mxu0 %v4603_v51  ;;  %3487 = vmatpush3.msra.mxu1 %v4606_v46 }
0x10da   :  { %3473 = vmatprep.subr.mxu0 %v4014_v0  ;;  %3488 = vmatprep.subr.mxu1 %v4014_v0 }
0x10db   :  { %v415_v45 = vpop.permute.xlu0 %414  ;;  %3474 = vmatpush3.msra.mxu0 %v4545_v55  ;;  %3489 = vmatpush3.msra.mxu1 %v4612_v42 }
0x10dc   :  { %v441_v53 = vsel %vm245_vm1, %v413_v43, %v415_v45  ;;  %3475 = vmatprep.subr.mxu0 %v4014_v0  ;;  %3479 = vmatprep.mubr.msk.f32.mxu0 %vm4015_vm0, %v4014_v0  ;;  %v2038_v45 = vld [vmem:[#allocation4 + $0x38] sm:$0xff]  ;;  %vm2823_vm0 = vcmask 523264  }
0x10dd   :  { %457 = vst.msk [vmem:[#allocation5 + $0x8] sm:$0xff] %vm383_vm2, %v441_v53  ;;  %3476 = vmatpush3.msra.mxu0 %v4554_v2 }
0x10de   :  { %3477 = vmatprep.subr.mxu0 %v4014_v0 }
0x10df   :  { %3478 = vmatpush3.msra.mxu0 %v4623_v54 }
0x10e4   :  { %v1923_v42 = vld [vmem:[#allocation5 + $0x8] sm:$0xff] }
0x1194   :  { %v1992_v18 = vpop.f32.mrf.mxu1 }
0x1195   :  { %v2003_v55 = vadd.f32 %v1992_v18, %v4295_v12  ;;  %v1996_v61 = vadd.f32 %v1992_v18, %v1923_v42 }
0x1196   :  { %v3470_v8 = vpop.f32.mrf.mxu1 }
0x1197   :  { %2005 = vrot.lane.b32.xlu1 %v2003_v55, %s4016_s11  ;;  %v3185_v2 = vmul.f32 -1.442695, %v1996_v61 }
0x1198   :  { %v1891_v57 = vpop.f32.mrf.mxu0 }
0x1199   :  { %v1902_v51 = vadd.f32 %v1891_v57, %v4243_v32  ;;  %v1895_v11 = vadd.f32 %v1891_v57, %v1822_v63  ;;  %3631 = vpow2.f32 %v3185_v2 }
0x119a   :  { %v3459_v46 = vpop.f32.mrf.mxu0 }
0x119b   :  { %1904 = vrot.lane.b32.xlu0 %v1902_v51, %s4016_s11  ;;  %v3183_v62 = vmul.f32 -1.442695, %v1895_v11 }
0x119d   :  { %3633 = vpow2.f32 %v3183_v62 }
0x11a6   :  { %v3632_v54 = vpop.eup %3631 }
0x11a7   :  { %v2000_v1 = vadd.f32 1.0, %v3632_v54 }
0x11a9   :  { %3635 = vrcp.f32 %v2000_v1 }
0x11aa   :  { %v3634_v4 = vpop.eup %3633 }
0x11ab   :  { %v1899_v9 = vadd.f32 1.0, %v3634_v4 }
0x11ad   :  { %3637 = vrcp.f32 %v1899_v9 }
0x11b6   :  { %v3636_v10 = vpop.eup %3635 }
0x11b7   :  { %v2015_v5 = vsub.f32 1.0, %v3636_v10  ;;  %v2021_v35 = vmul.f32 %v3636_v10, %v4640_v47 }
0x11ba   :  { %v3638_v22 = vpop.eup %3637 }
0x11bb   :  { %v1914_v44 = vsub.f32 1.0, %v3638_v22  ;;  %v1920_v3 = vmul.f32 %v3638_v22, %v4647_v17 }
0x1209   :  { %v2006_v13 = vpop.permute.xlu1 %2005 }
0x120a   :  { %v2008_v16 = vmul.f32 %v3636_v10, %v2006_v13 }
0x120c   :  { %2010 = vrot.lane.b32.xlu1 %v2008_v16, %s4016_s11 }
0x120d   :  { %v1905_v23 = vpop.permute.xlu0 %1904 }
0x120e   :  { %v1907_v26 = vmul.f32 %v3638_v22, %v1905_v23 }
0x1210   :  { %1909 = vrot.lane.b32.xlu0 %v1907_v26, %s4016_s11 }
0x127e   :  { %v2011_v56 = vpop.permute.xlu1 %2010 }
0x127f   :  { %v2013_v60 = vadd.f32 %v2011_v56, %v1923_v42 }
0x1281   :  { %3639 = vtanh.f32 %v2013_v60 }
0x1282   :  { %v1910_v25 = vpop.permute.xlu0 %1909 }
0x1283   :  { %v1912_v59 = vadd.f32 %v1910_v25, %v1822_v63 }
0x1285   :  { %3641 = vtanh.f32 %v1912_v59 }
0x128e   :  { %v3640_v6 = vpop.eup %3639 }
0x128f   :  { %2017 = vrot.lane.b32.xlu1 %v3640_v6, %s4019_s2 }
0x1292   :  { %v3642_v24 = vpop.eup %3641 }
0x1293   :  { %1916 = vrot.lane.b32.xlu0 %v3642_v24, %s4019_s2 }
0x1301   :  { %v2018_v34 = vpop.permute.xlu1 %2017 }
0x1302   :  { %v2020_v39 = vmul.f32 %v2018_v34, %v2015_v5  ;;  %v4731_v5 = vld [vmem:[#allocation2 + $0x8] sm:$0xff]  ;;  %v4733_v34 = vld [vmem:[#allocation2] sm:$0xff] }
0x1303   :  { %v2267_v7 = vsel %vm245_vm1, %v4733_v34, 0.0 }
0x1304   :  { %v2022_v40 = vadd.f32 %v2021_v35, %v2020_v39  ;;  %v2270_v35 = vsel %vm245_vm1, %v4731_v5, 0.0  ;;  %v4739_v39 = vld [vmem:[#allocation2 + $0x10] sm:$0xff] }
0x1305   :  { %v1917_v30 = vpop.permute.xlu0 %1916  ;;  %v2273_v21 = vsel %vm245_vm1, %v4739_v39, 0.0 }
0x1306   :  { %v1919_v14 = vmul.f32 %v1917_v30, %v1914_v44  ;;  %v4692_v15 = vsel %vm912_vm10, %v2022_v40, %v4640_v47  ;;  %v4747_v30 = vld [vmem:[#allocation2 + $0x18] sm:$0xff]  ;;  %vm2900_vm10 = vcmask 1046534  }
0x1307   :  { %2032 = vrot.lane.b32.xlu1 %v4692_v15, %s4019_s2 }
0x1308   :  { %v1921_v37 = vadd.f32 %v1920_v3, %v1919_v14  ;;  %v4749_v3 = vld [vmem:[#allocation3 + $0x10] sm:$0xff]  ;;  %v2276_v14 = vsel %vm245_vm1, %v4747_v30, 0.0 }
0x130a   :  { %v4699_v48 = vsel %vm919_vm9, %v1921_v37, %v4647_v17  ;;  %v4755_v37 = vld [vmem:[#allocation3 + $0x18] sm:$0xff]  ;;  %vm2898_vm9 = vcmask 1045509  }
0x130b   :  { %408 = vrot.lane.b32.xlu1 %v4250_v38, %s4017_s12  ;;  %2026 = vrot.lane.b32.xlu0 %v4699_v48, %s4019_s2 }
0x130f   :  { %410 = vrot.lane.b32.xlu0 %v4255_v41, %s4017_s12 }
0x1379   :  { %v2033_v50 = vpop.permute.xlu1 %2032 }
0x137a   :  { %2036 = vst.msk [vmem:[#allocation3 + $0x8] sm:$0xff] %vm245_vm1, %v2033_v50  ;;  %3491 = vmatmul.mubr.msk.f32.vlgmr.msra.gmra.mxu1 %vm245_vm1, %v2033_v50  ;;  %v4759_v50 = vld [vmem:[#allocation3 + $0x20] sm:$0xff] }
0x137d   :  { %v2027_v19 = vpop.permute.xlu0 %2026  ;;  %v409_v36 = vpop.permute.xlu1 %408 }
0x137e   :  { %2030 = vst.msk [vmem:[#allocation2 + $0x30] sm:$0xff] %vm245_vm1, %v2027_v19  ;;  %3480 = vmatmul.mubr.msk.f32.vlgmr.msra.gmra.mxu0 %vm245_vm1, %v2027_v19  ;;  %v2303_v19 = vsel %vm245_vm1, %v4759_v50, 0.0 }
0x1381   :  { %v411_v49 = vpop.permute.xlu0 %410  ;;  %v4741_v40 = vld [vmem:[#allocation3 + $0x8] sm:$0xff] }
0x1382   :  { %v440_v38 = vsel %vm245_vm1, %v409_v36, %v411_v49  ;;  %v2294_v44 = vsel %vm245_vm1, %v4741_v40, 0.0  ;;  %v4763_v36 = vld [vmem:[#allocation3 + $0x28] sm:$0xff] }
0x1383   :  { %456 = vst.msk [vmem:[#allocation5] sm:$0xff] %vm383_vm2, %v440_v38  ;;  %v2306_v49 = vsel %vm245_vm1, %v4763_v36, 0.0  ;;  %v4767_v38 = vld [vmem:[#allocation3 + $0x30] sm:$0xff]  ;;  %vm2890_vm2 = vcmask 1041409  }
0x138a   :  { %v2138_v58 = vld [vmem:[#allocation5] sm:$0xff] }
0x143a   :  { %v2207_v52 = vpop.f32.mrf.mxu1 }
0x143b   :  { %v2218_v47 = vadd.f32 %v2207_v52, %v4295_v12  ;;  %v2211_v43 = vadd.f32 %v2207_v52, %v2138_v58  ;;  %v2309_v52 = vsel %vm245_vm1, %v4767_v38, 0.0 }
0x143c   :  { %v3492_v41 = vpop.f32.mrf.mxu1 }
0x143d   :  { %2220 = vrot.lane.b32.xlu1 %v2218_v47, %s4016_s11  ;;  %v3189_v53 = vmul.f32 -1.442695, %v2211_v43  ;;  %v4771_v47 = vld [vmem:[#allocation3 + $0x38] sm:$0xff]  ;;  %v4781_v43 = vld [vmem:[#allocation2 + $0x20] sm:$0xff] }
0x143e   :  { %v2107_v33 = vpop.f32.mrf.mxu0  ;;  %v2312_v41 = vsel %vm245_vm1, %v4771_v47, 0.0 }
0x143f   :  { %v2118_v17 = vadd.f32 %v2107_v33, %v4243_v32  ;;  %v2111_v18 = vadd.f32 %v2107_v33, %v2038_v45  ;;  %3643 = vpow2.f32 %v3189_v53  ;;  %v4785_v53 = vld [vmem:[#allocation2 + $0x28] sm:$0xff] }
0x1440   :  { %v3481_v20 = vpop.f32.mrf.mxu0 }
0x1441   :  { %2120 = vrot.lane.b32.xlu0 %v2118_v17, %s4016_s11  ;;  %v3187_v55 = vmul.f32 -1.442695, %v2111_v18  ;;  %v2282_v18 = vsel %vm245_vm1, %v4785_v53, 0.0 }
0x1443   :  { %3645 = vpow2.f32 %v3187_v55  ;;  %v4789_v55 = vld [vmem:[#allocation2 + $0x30] sm:$0xff] }
0x144c   :  { %v3644_v8 = vpop.eup %3643 }
0x144d   :  { %v2215_v57 = vadd.f32 1.0, %v3644_v8  ;;  %v2285_v8 = vsel %vm245_vm1, %v4789_v55, 0.0 }
0x144f   :  { %3647 = vrcp.f32 %v2215_v57 }
0x1450   :  { %v3646_v12 = vpop.eup %3645 }
0x1451   :  { %v2115_v51 = vadd.f32 1.0, %v3646_v12 }
0x1453   :  { %3649 = vrcp.f32 %v2115_v51 }
0x145c   :  { %v3648_v46 = vpop.eup %3647 }
0x145d   :  { %v2230_v10 = vsub.f32 1.0, %v3648_v46  ;;  %v2236_v16 = vmul.f32 %v3648_v46, %v4692_v15 }
0x1460   :  { %v3650_v61 = vpop.eup %3649 }
0x1461   :  { %v2130_v26 = vsub.f32 1.0, %v3650_v61  ;;  %v2136_v60 = vmul.f32 %v3650_v61, %v4699_v48 }
0x14af   :  { %v2221_v42 = vpop.permute.xlu1 %2220 }
0x14b0   :  { %v2223_v32 = vmul.f32 %v3648_v46, %v2221_v42 }
0x14b2   :  { %2225 = vrot.lane.b32.xlu1 %v2223_v32, %s4016_s11 }
0x14b3   :  { %v2121_v63 = vpop.permute.xlu0 %2120 }
0x14b4   :  { %v2123_v2 = vmul.f32 %v3650_v61, %v2121_v63 }
0x14b6   :  { %2125 = vrot.lane.b32.xlu0 %v2123_v2, %s4016_s11 }
0x1524   :  { %v2226_v11 = vpop.permute.xlu1 %2225 }
0x1525   :  { %v2228_v62 = vadd.f32 %v2226_v11, %v2138_v58 }
0x1527   :  { %3651 = vtanh.f32 %v2228_v62 }
0x1528   :  { %v2126_v54 = vpop.permute.xlu0 %2125 }
0x1529   :  { %v2128_v1 = vadd.f32 %v2126_v54, %v2038_v45  ;;  %v2279_v45 = vsel %vm245_vm1, %v4781_v43, 0.0 }
0x152b   :  { %3653 = vtanh.f32 %v2128_v1 }
0x1534   :  { %v3652_v4 = vpop.eup %3651 }
0x1535   :  { %2232 = vrot.lane.b32.xlu1 %v3652_v4, %s4019_s2 }
0x1538   :  { %v3654_v9 = vpop.eup %3653 }
0x1539   :  { %2132 = vrot.lane.b32.xlu0 %v3654_v9, %s4019_s2 }
0x15a7   :  { %v2233_v13 = vpop.permute.xlu1 %2232 }
0x15a8   :  { %v2235_v22 = vmul.f32 %v2233_v13, %v2230_v10 }
0x15aa   :  { %v2237_v23 = vadd.f32 %v2236_v16, %v2235_v22 }
0x15ab   :  { %v2133_v56 = vpop.permute.xlu0 %2132 }
0x15ac   :  { %v2135_v25 = vmul.f32 %v2133_v56, %v2130_v26  ;;  %v2239_v59 = vsel %vm685_vm5, %v2237_v23, %v4692_v15  ;;  %v2297_v15 = vsel %vm245_vm1, %v4749_v3, 0.0  ;;  %vm2892_vm5 = vcmask 1042434  }
0x15ad   :  { %2247 = vrot.lane.b32.xlu1 %v2239_v59, %s4019_s2 }
0x15ae   :  { %v2137_v6 = vadd.f32 %v2136_v60, %v2135_v25 }
0x15b0   :  { %v2238_v24 = vsel %vm692_vm6, %v2137_v6, %v4699_v48  ;;  %v2300_v48 = vsel %vm245_vm1, %v4755_v37, 0.0  ;;  %vm2894_vm6 = vcmask 1043459  }
0x15b1   :  { %2241 = vrot.lane.b32.xlu0 %v2238_v24, %s4019_s2 }
0x15d0   :  { %2271 = vadd.xlane.f32.xlu0 %v2270_v35 }
0x15d1   :  { %2268 = vadd.xlane.f32.xlu1 %v2267_v7 }
0x15d4   :  { %2274 = vadd.xlane.f32.xlu0 %v2273_v21 }
0x15d5   :  { %2295 = vadd.xlane.f32.xlu1 %v2294_v44 }
0x15d8   :  { %2277 = vadd.xlane.f32.xlu0 %v2276_v14 }
0x15d9   :  { %2298 = vadd.xlane.f32.xlu1 %v2297_v15 }
0x15dd   :  { %2301 = vadd.xlane.f32.xlu1 %v2300_v48 }
0x15e1   :  { %2304 = vadd.xlane.f32.xlu1 %v2303_v19 }
0x15e5   :  { %2307 = vadd.xlane.f32.xlu1 %v2306_v49 }
0x15e9   :  { %2310 = vadd.xlane.f32.xlu1 %v2309_v52 }
0x15ed   :  { %2313 = vadd.xlane.f32.xlu1 %v2312_v41 }
0x161f   :  { %v2248_v33 = vpop.permute.xlu1 %2247 }
0x1620   :  { %2250 = vst.msk [vmem:[#allocation3] sm:$0xff] %vm245_vm1, %v2248_v33 }
0x1623   :  { %v2242_v17 = vpop.permute.xlu0 %2241 }
0x1624   :  { %2245 = vst.msk [vmem:[#allocation2 + $0x38] sm:$0xff] %vm245_vm1, %v2242_v17 }
0x1627   :  { %v4777_v20 = vld [vmem:[#allocation3] sm:$0xff] }
0x1628   :  { %v2291_v58 = vsel %vm245_vm1, %v4777_v20, 0.0 }
0x1629   :  { %2292 = vadd.xlane.f32.xlu0 %v2291_v58 }
0x162b   :  { %v4793_v57 = vld [vmem:[#allocation2 + $0x38] sm:$0xff] }
0x162c   :  { %v2288_v12 = vsel %vm245_vm1, %v4793_v57, 0.0 }
0x162d   :  { %2280 = vadd.xlane.f32.xlu0 %v2279_v45 }
0x1631   :  { %2283 = vadd.xlane.f32.xlu0 %v2282_v18 }
0x1635   :  { %2286 = vadd.xlane.f32.xlu0 %v2285_v8 }
0x1639   :  { %2289 = vadd.xlane.f32.xlu0 %v2288_v12 }
0x1659   :  { %v2272_v51 = vpop.xlane.xlu0 %2271 }
0x165a   :  { %v2269_v46 = vpop.xlane.xlu1 %2268 }
0x165d   :  { %v2275_v61 = vpop.xlane.xlu0 %2274 }
0x165e   :  { %v2296_v42 = vpop.xlane.xlu1 %2295 }
0x165f   :  { %v2316_v32 = vadd.f32 %v2296_v42, %v2272_v51 }
0x1661   :  { %v2324_v63 = vmul.f32 0.015625, %v2316_v32  ;;  %v2278_v10 = vpop.xlane.xlu0 %2277 }
0x1662   :  { %v2299_v2 = vpop.xlane.xlu1 %2298 }
0x1663   :  { %v4798_v11 = vsub.f32 %v4731_v5, %v2324_v63  ;;  %v4801_v62 = vsub.f32 %v4741_v40, %v2324_v63  ;;  %v2317_v54 = vadd.f32 %v2299_v2, %v2275_v61 }
0x1665   :  { %v2325_v1 = vmul.f32 0.015625, %v2317_v54  ;;  %v2380_v4 = vmul.f32 %v4801_v62, %v4801_v62  ;;  %v2348_v9 = vmul.f32 %v4798_v11, %v4798_v11 }
0x1666   :  { %v2302_v13 = vpop.xlane.xlu1 %2301 }
0x1667   :  { %v4808_v16 = vsub.f32 %v4739_v39, %v2325_v1  ;;  %v4811_v22 = vsub.f32 %v4749_v3, %v2325_v1  ;;  %v2318_v23 = vadd.f32 %v2302_v13, %v2278_v10  ;;  %v2390_v26 = vsel %vm245_vm1, %v2380_v4, 0.0 }
0x1668   :  { %2391 = vadd.xlane.f32.xlu1 %v2390_v26  ;;  %v2358_v56 = vsel %vm245_vm1, %v2348_v9, 0.0 }
0x1669   :  { %v2326_v60 = vmul.f32 0.015625, %v2318_v23  ;;  %2359 = vadd.xlane.f32.xlu0 %v2358_v56  ;;  %v2381_v25 = vmul.f32 %v4811_v22, %v4811_v22  ;;  %v2349_v59 = vmul.f32 %v4808_v16, %v4808_v16 }
0x166a   :  { %v2305_v48 = vpop.xlane.xlu1 %2304 }
0x166b   :  { %v4820_v6 = vsub.f32 %v4747_v30, %v2326_v60  ;;  %v4823_v24 = vsub.f32 %v4755_v37, %v2326_v60  ;;  %v2393_v35 = vsel %vm245_vm1, %v2381_v25, 0.0  ;;  %v2361_v7 = vsel %vm245_vm1, %v2349_v59, 0.0 }
0x166c   :  { %2394 = vadd.xlane.f32.xlu1 %v2393_v35 }
0x166d   :  { %2362 = vadd.xlane.f32.xlu0 %v2361_v7  ;;  %v2382_v21 = vmul.f32 %v4823_v24, %v4823_v24  ;;  %v2350_v44 = vmul.f32 %v4820_v6, %v4820_v6 }
0x166e   :  { %v2308_v41 = vpop.xlane.xlu1 %2307 }
0x166f   :  { %v2396_v14 = vsel %vm245_vm1, %v2382_v21, 0.0  ;;  %v2364_v15 = vsel %vm245_vm1, %v2350_v44, 0.0 }
0x1670   :  { %2397 = vadd.xlane.f32.xlu1 %v2396_v14 }
0x1671   :  { %2365 = vadd.xlane.f32.xlu0 %v2364_v15 }
0x1672   :  { %v2311_v63 = vpop.xlane.xlu1 %2310 }
0x1676   :  { %v2314_v35 = vpop.xlane.xlu1 %2313 }
0x16b2   :  { %v2293_v19 = vpop.xlane.xlu0 %2292 }
0x16b3   :  { %v2315_v49 = vadd.f32 %v2293_v19, %v2269_v46 }
0x16b5   :  { %v2323_v52 = vmul.f32 0.015625, %v2315_v49 }
0x16b6   :  { %v2281_v33 = vpop.xlane.xlu0 %2280 }
0x16b7   :  { %v4834_v17 = vsub.f32 %v4733_v34, %v2323_v52  ;;  %v4837_v58 = vsub.f32 %v4777_v20, %v2323_v52  ;;  %v2319_v45 = vadd.f32 %v2305_v48, %v2281_v33 }
0x16b9   :  { %v2327_v18 = vmul.f32 0.015625, %v2319_v45  ;;  %v2379_v8 = vmul.f32 %v4837_v58, %v4837_v58  ;;  %v2347_v12 = vmul.f32 %v4834_v17, %v4834_v17 }
0x16ba   :  { %v2284_v51 = vpop.xlane.xlu0 %2283 }
0x16bb   :  { %v4844_v46 = vsub.f32 %v4781_v43, %v2327_v18  ;;  %v4847_v42 = vsub.f32 %v4759_v50, %v2327_v18  ;;  %v2320_v32 = vadd.f32 %v2308_v41, %v2284_v51  ;;  %v2387_v61 = vsel %vm245_vm1, %v2379_v8, 0.0 }
0x16bc   :  { %2388 = vadd.xlane.f32.xlu1 %v2387_v61  ;;  %v2355_v2 = vsel %vm245_vm1, %v2347_v12, 0.0  ;;  %v2526_v61 = vld [vmem:[%s5043_s13 + $0x18] sm:$0xff] }
0x16bd   :  { %v2328_v54 = vmul.f32 0.015625, %v2320_v32  ;;  %2356 = vadd.xlane.f32.xlu0 %v2355_v2  ;;  %v2383_v1 = vmul.f32 %v4847_v42, %v4847_v42  ;;  %v2351_v4 = vmul.f32 %v4844_v46, %v4844_v46  ;;  %3493 = vmatprep.subr.mxu0 %v2526_v61  ;;  %v2525_v2 = vld [vmem:[%s5043_s13 + $0x10] sm:$0xff] }
0x16be   :  { %v2287_v9 = vpop.xlane.xlu0 %2286  ;;  %3494 = vmatpush3.msra.mxu0 %v2526_v61 }
0x16bf   :  { %v4856_v10 = vsub.f32 %v4785_v53, %v2328_v54  ;;  %v4859_v13 = vsub.f32 %v4763_v36, %v2328_v54  ;;  %v2321_v23 = vadd.f32 %v2311_v63, %v2287_v9  ;;  %v2399_v26 = vsel %vm245_vm1, %v2383_v1, 0.0  ;;  %v2522_v63 = vld [vmem:[#allocation24 + $0x18] sm:$0xff]  ;;  %v2521_v54 = vld [vmem:[#allocation24 + $0x10] sm:$0xff]  ;;  %3495 = vmatprep.subr.mxu0 %v2525_v2 }
0x16c0   :  { %2400 = vadd.xlane.f32.xlu1 %v2399_v26  ;;  %v2367_v56 = vsel %vm245_vm1, %v2351_v4, 0.0  ;;  %3513 = vmatprep.subr.mxu1 %v2522_v63  ;;  %v2524_v1 = vld [vmem:[%s5043_s13 + $0x8] sm:$0xff]  ;;  %v2520_v4 = vld [vmem:[#allocation24 + $0x8] sm:$0xff]  ;;  %v2523_v9 = vld [vmem:[%s5043_s13] sm:$0xff] }
0x16c1   :  { %v2329_v60 = vmul.f32 0.015625, %v2321_v23  ;;  %2368 = vadd.xlane.f32.xlu0 %v2367_v56  ;;  %v2384_v25 = vmul.f32 %v4859_v13, %v4859_v13  ;;  %v2352_v59 = vmul.f32 %v4856_v10, %v4856_v10  ;;  %3514 = vmatpush3.msra.mxu1 %v2522_v63  ;;  %v2519_v23 = vld [vmem:[#allocation24] sm:$0xff] }
0x16c2   :  { %v2290_v7 = vpop.xlane.xlu0 %2289  ;;  %3515 = vmatprep.subr.mxu1 %v2521_v54  ;;  %3496 = vmatpush3.msra.mxu0 %v2525_v2 }
0x16c3   :  { %v4868_v21 = vsub.f32 %v4789_v55, %v2329_v60  ;;  %v4871_v44 = vsub.f32 %v4767_v38, %v2329_v60  ;;  %v2322_v14 = vadd.f32 %v2314_v35, %v2290_v7  ;;  %v2402_v15 = vsel %vm245_vm1, %v2384_v25, 0.0  ;;  %3516 = vmatpush3.msra.mxu1 %v2521_v54  ;;  %3497 = vmatprep.subr.mxu0 %v2524_v1 }
0x16c4   :  { %2403 = vadd.xlane.f32.xlu1 %v2402_v15  ;;  %v2370_v48 = vsel %vm245_vm1, %v2352_v59, 0.0  ;;  %3517 = vmatprep.subr.mxu1 %v2520_v4 }
0x16c5   :  { %v2330_v19 = vmul.f32 0.015625, %v2322_v14  ;;  %2371 = vadd.xlane.f32.xlu0 %v2370_v48  ;;  %v2385_v49 = vmul.f32 %v4871_v44, %v4871_v44  ;;  %v2353_v52 = vmul.f32 %v4868_v21, %v4868_v21  ;;  %3498 = vmatpush3.msra.mxu0 %v2524_v1 }
0x16c6   :  { %3518 = vmatpush3.msra.mxu1 %v2520_v4  ;;  %3499 = vmatprep.subr.mxu0 %v2523_v9 }
0x16c7   :  { %v4880_v41 = vsub.f32 %v4793_v57, %v2330_v19  ;;  %v4883_v33 = vsub.f32 %v4771_v47, %v2330_v19  ;;  %v2405_v45 = vsel %vm245_vm1, %v2385_v49, 0.0  ;;  %v2373_v18 = vsel %vm245_vm1, %v2353_v52, 0.0  ;;  %3519 = vmatprep.subr.mxu1 %v2519_v23  ;;  %3500 = vmatpush3.msra.mxu0 %v2523_v9 }
0x16c8   :  { %2406 = vadd.xlane.f32.xlu1 %v2405_v45  ;;  %3520 = vmatpush3.msra.mxu1 %v2519_v23 }
0x16c9   :  { %2374 = vadd.xlane.f32.xlu0 %v2373_v18  ;;  %v2386_v8 = vmul.f32 %v4883_v33, %v4883_v33  ;;  %v2354_v12 = vmul.f32 %v4880_v41, %v4880_v41 }
0x16cb   :  { %v2408_v51 = vsel %vm245_vm1, %v2386_v8, 0.0  ;;  %v2376_v32 = vsel %vm245_vm1, %v2354_v12, 0.0 }
0x16cc   :  { %2409 = vadd.xlane.f32.xlu1 %v2408_v51 }
0x16cd   :  { %2377 = vadd.xlane.f32.xlu0 %v2376_v32 }
0x16f1   :  { %v2392_v26 = vpop.xlane.xlu1 %2391 }
0x16f2   :  { %v2360_v56 = vpop.xlane.xlu0 %2359 }
0x16f3   :  { %v2412_v59 = vadd.f32 %v2392_v26, %v2360_v56 }
0x16f5   :  { %v2395_v60 = vpop.xlane.xlu1 %2394  ;;  %v2420_v15 = vmul.f32 0.015625, %v2412_v59 }
0x16f6   :  { %v2363_v25 = vpop.xlane.xlu0 %2362 }
0x16f7   :  { %v2413_v35 = vadd.f32 %v2395_v60, %v2363_v25  ;;  %v2428_v49 = vadd.f32 1e-05, %v2420_v15 }
0x16f9   :  { %v2398_v7 = vpop.xlane.xlu1 %2397  ;;  %v2421_v48 = vmul.f32 0.015625, %v2413_v35  ;;  %3655 = vrsqrt.f32 %v2428_v49 }
0x16fa   :  { %v2366_v14 = vpop.xlane.xlu0 %2365 }
0x16fb   :  { %v2414_v19 = vadd.f32 %v2398_v7, %v2366_v14  ;;  %v2429_v52 = vadd.f32 1e-05, %v2421_v48 }
0x16fd   :  { %v2422_v45 = vmul.f32 0.015625, %v2414_v19  ;;  %3657 = vrsqrt.f32 %v2429_v52 }
0x16ff   :  { %v2430_v51 = vadd.f32 1e-05, %v2422_v45 }
0x1701   :  { %3659 = vrsqrt.f32 %v2430_v51 }
0x1706   :  { %v3656_v59 = vpop.eup %3655 }
0x1707   :  { %v2482_v49 = vmul.f32 %v3656_v59, %v4801_v62 }
0x170a   :  { %v3658_v14 = vpop.eup %3657 }
0x170e   :  { %v3660_v51 = vpop.eup %3659 }
0x1745   :  { %v2389_v18 = vpop.xlane.xlu1 %2388 }
0x1746   :  { %v2357_v8 = vpop.xlane.xlu0 %2356 }
0x1747   :  { %v2411_v12 = vadd.f32 %v2389_v18, %v2357_v8  ;;  %v4906_v18 = vld [vmem:[#allocation20] ss:$0 sm:$0xff]  ;;  %v2444_v8 = vmul.f32 %v3656_v59, %v4798_v11 }
0x1749   :  { %v2419_v32 = vmul.f32 0.015625, %v2411_v12  ;;  %v2401_v61 = vpop.xlane.xlu1 %2400  ;;  %v2483_v12 = vmul.f32 %v3658_v14, %v4811_v22 }
0x174a   :  { %v2369_v63 = vpop.xlane.xlu0 %2368 }
0x174b   :  { %v2427_v2 = vadd.f32 1e-05, %v2419_v32  ;;  %v2415_v54 = vadd.f32 %v2401_v61, %v2369_v63  ;;  %v4910_v61 = vld [vmem:[#allocation18] ss:$0 sm:$0xff]  ;;  %v2445_v63 = vmul.f32 %v3658_v14, %v4808_v16  ;;  %v2498_v22 = vmul.f32 %v4906_v18, %v2483_v12 }
0x174c   :  { %v2459_v11 = vmul.f32 %v4910_v61, %v2444_v8 }
0x174d   :  { %3661 = vrsqrt.f32 %v2427_v2  ;;  %v2423_v1 = vmul.f32 0.015625, %v2415_v54  ;;  %v2404_v4 = vpop.xlane.xlu1 %2403  ;;  %v2497_v54 = vmul.f32 %v4906_v18, %v2482_v49 }
0x174e   :  { %v2372_v9 = vpop.xlane.xlu0 %2371 }
0x174f   :  { %v2431_v23 = vadd.f32 1e-05, %v2423_v1  ;;  %v2416_v26 = vadd.f32 %v2404_v4, %v2372_v9  ;;  %v3193_v4 = vld [vmem:[#allocation23] ss:$0 sm:$0xff] }
0x1750   :  { %v2512_v59 = vadd.f32 %v3193_v4, %v2497_v54 }
0x1751   :  { %3663 = vrsqrt.f32 %v2431_v23  ;;  %v2424_v56 = vmul.f32 0.015625, %v2416_v26  ;;  %v2407_v60 = vpop.xlane.xlu1 %2406  ;;  %v2484_v23 = vmul.f32 %v3660_v51, %v4823_v24  ;;  %v2446_v26 = vmul.f32 %v3660_v51, %v4820_v6 }
0x1752   :  { %v2375_v25 = vpop.xlane.xlu0 %2374  ;;  %v2513_v24 = vadd.f32 %v3193_v4, %v2498_v22 }
0x1753   :  { %v2432_v35 = vadd.f32 1e-05, %v2424_v56  ;;  %v2417_v7 = vadd.f32 %v2407_v60, %v2375_v25  ;;  %v3191_v60 = vld [vmem:[#allocation21] ss:$0 sm:$0xff]  ;;  %v2460_v25 = vmul.f32 %v4910_v61, %v2445_v63  ;;  %v2499_v6 = vmul.f32 %v4906_v18, %v2484_v23 }
0x1755   :  { %3665 = vrsqrt.f32 %v2432_v35  ;;  %v2425_v15 = vmul.f32 0.015625, %v2417_v7  ;;  %v2410_v48 = vpop.xlane.xlu1 %2409 }
0x1756   :  { %v2378_v19 = vpop.xlane.xlu0 %2377 }
0x1757   :  { %v2433_v52 = vadd.f32 1e-05, %v2425_v15  ;;  %v2418_v45 = vadd.f32 %v2410_v48, %v2378_v19  ;;  %v2474_v15 = vadd.f32 %v3191_v60, %v2459_v11  ;;  %v2461_v48 = vmul.f32 %v4910_v61, %v2446_v26 }
0x1758   :  { %v2475_v19 = vadd.f32 %v3191_v60, %v2460_v25 }
0x1759   :  { %3667 = vrsqrt.f32 %v2433_v52  ;;  %v2426_v32 = vmul.f32 0.015625, %v2418_v45  ;;  %v2476_v8 = vadd.f32 %v3191_v60, %v2461_v48 }
0x175a   :  { %v3662_v2 = vpop.eup %3661 }
0x175b   :  { %v2434_v1 = vadd.f32 1e-05, %v2426_v32  ;;  %v2481_v62 = vmul.f32 %v3662_v2, %v4837_v58  ;;  %v2443_v9 = vmul.f32 %v3662_v2, %v4834_v17 }
0x175d   :  { %3669 = vrsqrt.f32 %v2434_v1  ;;  %v2496_v16 = vmul.f32 %v4906_v18, %v2481_v62  ;;  %v2458_v56 = vmul.f32 %v4910_v61, %v2443_v9 }
0x175e   :  { %v3664_v58 = vpop.eup %3663 }
0x175f   :  { %v2511_v35 = vadd.f32 %v3193_v4, %v2496_v16  ;;  %v2473_v17 = vadd.f32 %v3191_v60, %v2458_v56  ;;  %v2485_v7 = vmul.f32 %v3664_v58, %v4847_v42  ;;  %v2447_v14 = vmul.f32 %v3664_v58, %v4844_v46 }
0x1760   :  { %v2514_v42 = vadd.f32 %v3193_v4, %v2499_v6 }
0x1761   :  { %3501 = vmatprep.mubr.msk.f32.mxu0 %vm245_vm1, %v2511_v35  ;;  %3521 = vmatprep.mubr.msk.f32.mxu1 %vm245_vm1, %v2473_v17  ;;  %v2500_v49 = vmul.f32 %v4906_v18, %v2485_v7  ;;  %v2462_v52 = vmul.f32 %v4910_v61, %v2447_v14 }
0x1762   :  { %v3666_v45 = vpop.eup %3665  ;;  %3502 = vmatmul.mubr.msk.f32.vlgmr.msra.gmra.mxu0 %vm245_vm1, %v2512_v59  ;;  %3522 = vmatmul.mubr.msk.f32.vlgmr.msra.gmra.mxu1 %vm245_vm1, %v2474_v15 }
0x1763   :  { %3504 = vmatprep.mubr.msk.f32.mxu0 %vm245_vm1, %v2513_v24  ;;  %3524 = vmatprep.mubr.msk.f32.mxu1 %vm245_vm1, %v2475_v19  ;;  %v2486_v46 = vmul.f32 %v3666_v45, %v4859_v13  ;;  %v2448_v12 = vmul.f32 %v3666_v45, %v4856_v10  ;;  %v2515_v51 = vadd.f32 %v3193_v4, %v2500_v49 }
0x1764   :  { %v2477_v32 = vadd.f32 %v3191_v60, %v2462_v52 }
0x1765   :  { %v2501_v63 = vmul.f32 %v4906_v18, %v2486_v46  ;;  %v2463_v54 = vmul.f32 %v4910_v61, %v2448_v12 }
0x1766   :  { %v3668_v2 = vpop.eup %3667  ;;  %3505 = vmatmul.mubr.msk.f32.gmra.mxu0 %vm245_vm1, %v2514_v42  ;;  %3525 = vmatmul.mubr.msk.f32.gmra.mxu1 %vm245_vm1, %v2476_v8 }
0x1767   :  { %3507 = vmatprep.mubr.msk.f32.mxu0 %vm245_vm1, %v2515_v51  ;;  %3527 = vmatprep.mubr.msk.f32.mxu1 %vm245_vm1, %v2477_v32  ;;  %v2516_v13 = vadd.f32 %v3193_v4, %v2501_v63  ;;  %v2487_v1 = vmul.f32 %v3668_v2, %v4871_v44  ;;  %v2449_v10 = vmul.f32 %v3668_v2, %v4868_v21 }
0x1768   :  { %v2478_v62 = vadd.f32 %v3191_v60, %v2463_v54 }
0x1769   :  { %v2502_v9 = vmul.f32 %v4906_v18, %v2487_v1  ;;  %v2464_v11 = vmul.f32 %v4910_v61, %v2449_v10 }
0x176a   :  { %v3670_v22 = vpop.eup %3669  ;;  %3508 = vmatmul.mubr.msk.f32.gmra.mxu0 %vm245_vm1, %v2516_v13  ;;  %3528 = vmatmul.mubr.msk.f32.gmra.mxu1 %vm245_vm1, %v2478_v62  ;;  %v3211_v13 = vld [vmem:[%s5045_s15] ss:$0 sm:$0xff] }
0x176b   :  { %v2517_v23 = vadd.f32 %v3193_v4, %v2502_v9  ;;  %v2479_v26 = vadd.f32 %v3191_v60, %v2464_v11  ;;  %v2488_v16 = vmul.f32 %v3670_v22, %v4883_v33  ;;  %v2450_v56 = vmul.f32 %v3670_v22, %v4880_v41  ;;  %v3210_v41 = vld [vmem:[%s5044_s14] ss:$0 sm:$0xff] }
0x176d   :  { %3510 = vmatprep.mubr.msk.f32.mxu0 %vm245_vm1, %v2517_v23  ;;  %3530 = vmatprep.mubr.msk.f32.mxu1 %vm245_vm1, %v2479_v26  ;;  %v2503_v21 = vmul.f32 %v4906_v18, %v2488_v16  ;;  %v2465_v44 = vmul.f32 %v4910_v61, %v2450_v56 }
0x176f   :  { %v2518_v25 = vadd.f32 %v3193_v4, %v2503_v21  ;;  %v2480_v58 = vadd.f32 %v3191_v60, %v2465_v44 }
0x1771   :  { %3511 = vmatmul.mubr.msk.f32.gmra.mxu0 %vm245_vm1, %v2518_v25  ;;  %3531 = vmatmul.mubr.msk.f32.gmra.mxu1 %vm245_vm1, %v2480_v58 }
0x1822   :  { %v3503_v59 = vpop.f32.mrf.mxu0  ;;  %v3523_v35 = vpop.f32.mrf.mxu1 }
0x1823   :  { %v2752_v33 = vadd.f32 %v3523_v35, %v3503_v59 }
0x1824   :  { %v2617_v17 = vpop.f32.mrf.mxu0  ;;  %v2746_v7 = vpop.f32.mrf.mxu1 }
0x1825   :  { %v2793_v14 = vadd.f32 %v3210_v41, %v2752_v33  ;;  %v2747_v15 = vadd.f32 %v2746_v7, %v2617_v17 }
0x1826   :  { %v3506_v18 = vpop.f32.mrf.mxu0  ;;  %v3526_v24 = vpop.f32.mrf.mxu1 }
0x1827   :  { %3671 = vtanh.f32 %v2793_v14  ;;  %v2792_v61 = vadd.f32 %v3210_v41, %v2747_v15  ;;  %v2762_v4 = vadd.f32 %v3526_v24, %v3506_v18 }
0x1828   :  { %v2627_v60 = vpop.f32.mrf.mxu0  ;;  %v2756_v6 = vpop.f32.mrf.mxu1 }
0x1829   :  { %3673 = vtanh.f32 %v2792_v61  ;;  %v2795_v48 = vadd.f32 %v3210_v41, %v2762_v4  ;;  %v2757_v19 = vadd.f32 %v2756_v6, %v2627_v60 }
0x182a   :  { %v3509_v49 = vpop.f32.mrf.mxu0  ;;  %v3529_v52 = vpop.f32.mrf.mxu1 }
0x182b   :  { %3675 = vtanh.f32 %v2795_v48  ;;  %v2794_v45 = vadd.f32 %v3210_v41, %v2757_v19  ;;  %v2772_v46 = vadd.f32 %v3529_v52, %v3509_v49  ;;  %v2857_v49 = vand.u32 127, %v235_v27 }
0x182c   :  { %v2637_v42 = vpop.f32.mrf.mxu0  ;;  %v2766_v8 = vpop.f32.mrf.mxu1 }
0x182d   :  { %3677 = vtanh.f32 %v2794_v45  ;;  %v2797_v12 = vadd.f32 %v3210_v41, %v2772_v46  ;;  %v2767_v51 = vadd.f32 %v2766_v8, %v2637_v42  ;;  %v2860_v45 = vsub.s32 %v2857_v49, %v4239_v28 }
0x182f   :  { %3679 = vtanh.f32 %v2797_v12  ;;  %v2796_v32 = vadd.f32 %v3210_v41, %v2767_v51 }
0x1831   :  { %3681 = vtanh.f32 %v2796_v32  ;;  %v3512_v63 = vpop.f32.mrf.mxu0  ;;  %v3532_v2 = vpop.f32.mrf.mxu1 }
0x1832   :  { %v2782_v54 = vadd.f32 %v3532_v2, %v3512_v63 }
0x1833   :  { %v2647_v1 = vpop.f32.mrf.mxu0  ;;  %v2776_v10 = vpop.f32.mrf.mxu1 }
0x1834   :  { %v3672_v62 = vpop.eup %3671  ;;  %v2799_v9 = vadd.f32 %v3210_v41, %v2782_v54  ;;  %v2777_v11 = vadd.f32 %v2776_v10, %v2647_v1 }
0x1835   :  { %v2816_v22 = vmul.f32 %v3672_v62, %v3211_v13 }
0x1836   :  { %v3674_v23 = vpop.eup %3673  ;;  %3683 = vtanh.f32 %v2799_v9  ;;  %v2798_v26 = vadd.f32 %v3210_v41, %v2777_v11 }
0x1837   :  { %v2827_v16 = vsel %vm2823_vm0, %v2816_v22, 0.0  ;;  %v2815_v56 = vmul.f32 %v3674_v23, %v3211_v13 }
0x1838   :  { %v3676_v21 = vpop.eup %3675  ;;  %3685 = vtanh.f32 %v2798_v26  ;;  %2828 = vadd.xlane.f32.xlu1 %v2827_v16 }
0x1839   :  { %v2824_v44 = vsel %vm2823_vm0, %v2815_v56, 0.0  ;;  %v2818_v25 = vmul.f32 %v3676_v21, %v3211_v13 }
0x183a   :  { %v3678_v58 = vpop.eup %3677  ;;  %2825 = vadd.xlane.f32.xlu0 %v2824_v44 }
0x183b   :  { %v2833_v59 = vsel %vm2823_vm0, %v2818_v25, 0.0  ;;  %v2817_v35 = vmul.f32 %v3678_v58, %v3211_v13  ;;  %v3699_v25 = vld [vmem:[%s5052_s24] sm:$0xff] }
0x183c   :  { %v3680_v33 = vpop.eup %3679  ;;  %2834 = vadd.xlane.f32.xlu1 %v2833_v59 }
0x183d   :  { %v2830_v17 = vsel %vm2823_vm0, %v2817_v35, 0.0  ;;  %v2820_v7 = vmul.f32 %v3680_v33, %v3211_v13 }
0x183e   :  { %v3682_v41 = vpop.eup %3681  ;;  %2831 = vadd.xlane.f32.xlu0 %v2830_v17 }
0x183f   :  { %v2839_v14 = vsel %vm2823_vm0, %v2820_v7, 0.0  ;;  %v2819_v15 = vmul.f32 %v3682_v41, %v3211_v13 }
0x1840   :  { %2840 = vadd.xlane.f32.xlu1 %v2839_v14 }
0x1841   :  { %v2836_v18 = vsel %vm2823_vm0, %v2819_v15, 0.0 }
0x1842   :  { %2837 = vadd.xlane.f32.xlu0 %v2836_v18 }
0x1843   :  { %v3684_v24 = vpop.eup %3683 }
0x1844   :  { %v2822_v61 = vmul.f32 %v3684_v24, %v3211_v13 }
0x1845   :  { %v3686_v4 = vpop.eup %3685 }
0x1846   :  { %v2845_v60 = vsel %vm2823_vm0, %v2822_v61, 0.0  ;;  %v2821_v6 = vmul.f32 %v3686_v4, %v3211_v13 }
0x1847   :  { %2846 = vadd.xlane.f32.xlu1 %v2845_v60 }
0x1848   :  { %v2842_v48 = vsel %vm2823_vm0, %v2821_v6, 0.0 }
0x1849   :  { %2843 = vadd.xlane.f32.xlu0 %v2842_v48  ;;  %v3034_v48 = vsub.s32 6, %v4239_v28 }
0x18c1   :  { %v2829_v19 = vpop.xlane.xlu1 %2828 }
0x18c2   :  { %v2865_v51 = vrot.slane %v2829_v19, %v2860_v45 }
0x18c3   :  { %v2826_v52 = vpop.xlane.xlu0 %2825 }
0x18c4   :  { %v2861_v8 = vrot.slane %v2826_v52, %v2860_v45  ;;  %v3013_v52 = vsub.s32 3, %v4239_v28 }
0x18c5   :  { %v2835_v46 = vpop.xlane.xlu1 %2834 }
0x18c6   :  { %v2891_v63 = vsel %vm2890_vm2, %v2865_v51, %v2861_v8  ;;  %v2873_v1 = vrot.slane %v2835_v46, %v2860_v45  ;;  %v3020_v46 = vsub.s32 4, %v4239_v28  ;;  %v3041_v8 = vsub.s32 7, %v4239_v28 }
0x18c7   :  { %v2832_v42 = vpop.xlane.xlu0 %2831 }
0x18c8   :  { %v2869_v12 = vrot.slane %v2832_v42, %v2860_v45  ;;  %v3027_v42 = vsub.s32 5, %v4239_v28 }
0x18c9   :  { %v2841_v54 = vpop.xlane.xlu1 %2840 }
0x18ca   :  { %v2893_v2 = vsel %vm2892_vm5, %v2869_v12, %v2891_v63  ;;  %v2881_v9 = vrot.slane %v2841_v54, %v2860_v45 }
0x18cb   :  { %v2838_v32 = vpop.xlane.xlu0 %2837  ;;  %v2895_v10 = vsel %vm2894_vm6, %v2873_v1, %v2893_v2 }
0x18cc   :  { %v2877_v13 = vrot.slane %v2838_v32, %v2860_v45 }
0x18ce   :  { %v2897_v27 = vsel %vm2896_vm8, %v2877_v13, %v2895_v10 }
0x18cf   :  { %v2899_v26 = vsel %vm2898_vm9, %v2881_v9, %v2897_v27 }
0x18d0   :  { %v2847_v62 = vpop.xlane.xlu1 %2846 }
0x18d1   :  { %v2889_v23 = vrot.slane %v2847_v62, %v2860_v45 }
0x18d2   :  { %v2844_v11 = vpop.xlane.xlu0 %2843 }
0x18d3   :  { %v2885_v22 = vrot.slane %v2844_v11, %v2860_v45 }
0x18d5   :  { %v2901_v16 = vsel %vm2900_vm10, %v2885_v22, %v2899_v26 }
0x18d6   :  { %v2903_v56 = vsel %vm2902_vm11, %v2889_v23, %v2901_v16 }
0x18d7   :  { %2905 = vxpose.xlu0.b32.start.end [1/1] (short) (narrow) %v2903_v56, 8 }
0x1953   :  { %v2921_v21 = vpop.trf.xlu0 }
0x1954   :  { %v2944_v44 = vsel %vm2943_vm12, %v2921_v21, -inf }
0x1955   :  { %2945 = vmax.xlane.f32.xlu1 %v2944_v44 }
0x1966   :  { %2938 = vperm.xlu1 %3558, %v3699_v25  }
0x19de   :  { %v2946_v58 = vpop.xlane.xlu1 %2945 }
0x19df   :  { %v2947_v59 = vsub.f32 %v2921_v21, %v2946_v58 }
0x19e1   :  { %v2948_v35 = vmul.f32 1.442695, %v2947_v59 }
0x19e2   :  { %v2939_v33 = vpop.permute.xlu1 %2938 }
0x19e3   :  { %3687 = vpow2.f32 %v2948_v35  ;;  %vm2940_vm13 = vcmp.lt.s32.totalorder %v2857_v49, %v2939_v33 }
0x19e4   :  { %v3212_v7 = vsel %vm2940_vm13, 1.0, %v4014_v0  ;;  %v3006_v0 = vsub.s32 2, %v4239_v28 }
0x19f0   :  { %v3688_v17 = vpop.eup %3687 }
0x19f1   :  { %v2950_v41 = vmul.f32 %v3688_v17, %v3212_v7 }
0x19f3   :  { %v2951_v14 = vsel %vm2943_vm12, %v2950_v41, 0.0 }
0x19f4   :  { %2952 = vadd.xlane.f32.xlu1 %v2951_v14 }
0x1a7d   :  { %v2953_v15 = vpop.xlane.xlu1 %2952 }
0x1a7e   :  { %v2954_v18 = vmax.f32 %v2953_v15, 1e-30 }
0x1a80   :  { %3689 = vrcp.f32 %v2954_v18 }
0x1a8d   :  { %v3690_v24 = vpop.eup %3689 }
0x1a8e   :  { %v2956_v61 = vmul.f32 %v3690_v24, %v2950_v41 }
0x1a90   :  { %2958 = vxpose.xlu0.b32.start.end [1/1] (short) (narrow) %v2956_v61, 8  ;;  %2957 = vst.msk [vmem:[#allocation27] sm:$0xff] %vm2943_vm12, %v2956_v61 }
0x1b0c   :  { %v2974_v4 = vpop.trf.xlu0 }
0x1b0d   :  { %v3000_v60 = vrot.slane %v2974_v4, %v241_v31  ;;  %v2993_v6 = vrot.slane %v2974_v4, %v237_v29  ;;  %v3007_v19 = vrot.slane %v2974_v4, %v3006_v0  ;;  %v3035_v49 = vrot.slane %v2974_v4, %v3034_v48 }
0x1b0e   :  { %v3014_v45 = vrot.slane %v2974_v4, %v3013_v52  ;;  %v3021_v31 = vrot.slane %v2974_v4, %v3020_v46  ;;  %v3028_v29 = vrot.slane %v2974_v4, %v3027_v42  ;;  %v3042_v12 = vrot.slane %v2974_v4, %v3041_v8 }
0x1b0f   :  { %3002 = vbcast.lane.b32.xlu1 %v3000_v60, 256  ;;  %2995 = vbcast.lane.b32.xlu0 %v2993_v6, 256 }
0x1b13   :  { %3009 = vbcast.lane.b32.xlu1 %v3007_v19, 256  ;;  %3037 = vbcast.lane.b32.xlu0 %v3035_v49, 256 }
0x1b17   :  { %3016 = vbcast.lane.b32.xlu1 %v3014_v45, 256 }
0x1b1b   :  { %3023 = vbcast.lane.b32.xlu1 %v3021_v31, 256 }
0x1b1f   :  { %3030 = vbcast.lane.b32.xlu1 %v3028_v29, 256 }
0x1b23   :  { %3044 = vbcast.lane.b32.xlu1 %v3042_v12, 256 }
0x1b81   :  { %v3003_v51 = vpop.permute.xlu1 %3002  ;;  %v2996_v32 = vpop.permute.xlu0 %2995 }
0x1b82   :  { %v3055_v63 = vmul.f32 %v3003_v51, %v4731_v5  ;;  %v3087_v2 = vmul.f32 %v3003_v51, %v4741_v40  ;;  %v3054_v13 = vmul.f32 %v2996_v32, %v4733_v34  ;;  %v3086_v1 = vmul.f32 %v2996_v32, %v4777_v20 }
0x1b84   :  { %v3063_v28 = vsel %vm245_vm1, %v3055_v63, 0.0  ;;  %v3095_v62 = vsel %vm245_vm1, %v3087_v2, 0.0  ;;  %v3062_v11 = vsel %vm245_vm1, %v3054_v13, 0.0  ;;  %v3094_v5 = vsel %vm245_vm1, %v3086_v1, 0.0 }
0x1b85   :  { %v3010_v54 = vpop.permute.xlu1 %3009  ;;  %v3096_v23 = vadd.f32 %v3095_v62, %v3094_v5 }
0x1b86   :  { %v3056_v10 = vmul.f32 %v3010_v54, %v4739_v39  ;;  %v3088_v27 = vmul.f32 %v3010_v54, %v4749_v3  ;;  %v3064_v39 = vadd.f32 %v3063_v28, %v3062_v11 }
0x1b88   :  { %v3065_v34 = vsel %vm245_vm1, %v3056_v10, 0.0  ;;  %v3097_v20 = vsel %vm245_vm1, %v3088_v27, 0.0 }
0x1b89   :  { %v3017_v9 = vpop.permute.xlu1 %3016  ;;  %v3098_v44 = vadd.f32 %v3097_v20, %v3096_v23 }
0x1b8a   :  { %v3057_v40 = vmul.f32 %v3017_v9, %v4747_v30  ;;  %v3089_v22 = vmul.f32 %v3017_v9, %v4755_v37  ;;  %v3066_v30 = vadd.f32 %v3065_v34, %v3064_v39  ;;  %v3038_v37 = vpop.permute.xlu0 %3037 }
0x1b8c   :  { %v3067_v26 = vsel %vm245_vm1, %v3057_v40, 0.0  ;;  %v3099_v16 = vsel %vm245_vm1, %v3089_v22, 0.0 }
0x1b8d   :  { %v3024_v3 = vpop.permute.xlu1 %3023 }
0x1b8e   :  { %v3058_v56 = vmul.f32 %v3024_v3, %v4781_v43  ;;  %v3090_v21 = vmul.f32 %v3024_v3, %v4759_v50 }
0x1b90   :  { %v3069_v25 = vsel %vm245_vm1, %v3058_v56, 0.0  ;;  %v3101_v58 = vsel %vm245_vm1, %v3090_v21, 0.0 }
0x1b91   :  { %3951 = shalt.err (!%p3948_p8)
}
0x1b92   :  { %3134 = dma.vmem_to_hbm [thread:$0]  %s3132_s7, 128, %s5047_s17, [#allocation28]   ;;  %v3068_v50 = vadd.f32 %v3067_v26, %v3066_v30  ;;  %v3100_v43 = vadd.f32 %v3099_v16, %v3098_v44  ;;  %v3031_v59 = vpop.permute.xlu1 %3030  ;;  %v3060_v35 = vmul.f32 %v3038_v37, %v4789_v55  ;;  %v3092_v33 = vmul.f32 %v3038_v37, %v4767_v38 }
0x1b93   :  { %v3059_v17 = vmul.f32 %v3031_v59, %v4785_v53  ;;  %v3091_v7 = vmul.f32 %v3031_v59, %v4763_v36  ;;  %s4021_s17 = smov [#allocation26]   ;;  %vm3113_vm14 = vcmask 523520  }
0x1b94   :  { %v3070_v41 = vadd.f32 %v3069_v25, %v3068_v50  ;;  %v3102_v14 = vadd.f32 %v3101_v58, %v3100_v43  ;;  %v3073_v60 = vsel %vm245_vm1, %v3060_v35, 0.0  ;;  %v3105_v6 = vsel %vm245_vm1, %v3092_v33, 0.0  ;;  %s3121_s23 = sshll.u32 %s4021_s17, 4  ;;  %s3122_s23 = int_to_ptr.vmem [resolvable:$true] %s3121_s23 }
0x1b95   :  { %v3071_v15 = vsel %vm245_vm1, %v3059_v17, 0.0  ;;  %v3103_v18 = vsel %vm245_vm1, %v3091_v7, 0.0  ;;  %s3960_s6 = scalar_lea.vmem %s3122_s23, 128  ;;  %p3965_p10 = scmp.lt.s32.totalorder %s3122_s23, %s3122_s23 }
0x1b96   :  { %v3072_v24 = vadd.f32 %v3071_v15, %v3070_v41  ;;  %v3104_v61 = vadd.f32 %v3103_v18, %v3102_v14  ;;  %v3045_v4 = vpop.permute.xlu1 %3044  ;;  %p3961_p9 = scmp.ne.s32.totalorder %s3122_s23, %s3960_s6  ;;  %p3966_p11 = scmp.lt.s32.totalorder %s3960_s6, %s3960_s6 }
0x1b97   :  { %v3061_v55 = vmul.f32 %v3045_v4, %v4793_v57  ;;  %v3093_v38 = vmul.f32 %v3045_v4, %v4771_v47 }
0x1b98   :  { %v3074_v53 = vadd.f32 %v3073_v60, %v3072_v24  ;;  %v3106_v0 = vadd.f32 %v3105_v6, %v3104_v61  ;;  %p3967_p12 = por %p3966_p11, %p3965_p10 }
0x1b99   :  { %v3075_v36 = vsel %vm245_vm1, %v3061_v55, 0.0  ;;  %v3107_v48 = vsel %vm245_vm1, %v3093_v38, 0.0 }
0x1b9a   :  { %v3076_v19 = vadd.f32 %v3075_v36, %v3074_v53  ;;  %v3108_v49 = vadd.f32 %v3107_v48, %v3106_v0  ;;  %p3968_p13 = pnand %p3967_p12, %p3961_p9 }
0x1b9c   :  { %3077 = vst.msk [vmem:[#allocation26] sm:$0xff] %vm245_vm1, %v3076_v19  ;;  %3110 = vrot.lane.b32.xlu0 %v3108_v49, %s4017_s12 }
0x1c0e   :  { %v3111_v52 = vpop.permute.xlu0 %3110 }
0x1c0f   :  { %3114 = vst.msk [vmem:[#allocation26] sm:$0xff] %vm3113_vm14, %v3111_v52 }
0x1c10   :  { %3971 = shalt.err (!%p3968_p13)
}
0x1c11   :  { %3124 = dma.vmem_to_hbm [thread:$0]  %s3122_s23, 128, %s5046_s16, [#allocation8]  }
0x1c12   :  { %3994 = dma.done.wait [#allocation8], 128  }
0x1c13   :  { %3995 = vsyncadd [#allocation8], 4294967168 }
0x1c14   :  { %3996 = dma.done.wait [#allocation28], 128  }
0x1c15   :  { %3997 = vsyncadd [#allocation28], 4294967168 }
0x1c16   :  { %3141 = vsyncpa [#allocation7], 1 }
0x1c17   :  { %3142 = vsyncpa [#allocation10], 1 }
0x1c18   :  { %3143 = vsyncpa [#allocation13], 1 }
0x1c19   :  { %3144 = vsyncpa [#allocation16], 1 }
0x1c1a   :  { %3145 = vsyncpa [#allocation19], 1 }
0x1c1b   :  { %3146 = vsyncpa [#allocation22], 1 }
0x1c1c   :  { %3147 = vsyncpa [#allocation25], 1 }
0x1c1d   :  { %3148 = vsyncpa [#allocation8], 1 }
0x1c1e   :  { %3149 = vsyncpa [#allocation28], 1 }

</bundles_post_ra>
